<compile_context>
chip_gen: v5e
topology: v5e:2x2
jax: 0.10.0
libtpu: 0.0.40
codegen_flags: <defaults>
</compile_context>

<pallas_src>
import math
from functools import partial

import jax
import jax.numpy as jnp
from jax.experimental import pallas as pl
from jax.experimental.pallas import tpu as pltpu


def _round_up(x: int, m: int) -> int:
    return (x + m - 1) // m * m


# ------------------------------------------------------------------ kernel ---
def _expnorm_kernel(dist_ref, onehot_ref, params_ref, o_ref, *,
                    cutoff, neg_alpha, pi_over_cutoff):
    # dist_ref   : (tile_rows, 128)        f32  -- 128 distances per row (dense vregs)
    # onehot_ref : (128, n_rbf*128)        bf16 -- onehot[p, l] = (l // n_rbf == p)
    # params_ref : (2, n_rbf*128)          f32  -- row0: tiled means, row1: tiled -betas
    # o_ref      : (tile_rows, n_rbf*128)  out  -- flat order == PyTorch (N, n_rbf)
    d = dist_ref[...]
    s_mat = onehot_ref[...]
    means_t = params_ref[0:1, :]
    neg_betas_t = params_ref[1:2, :]

    # CosineCutoff and exp(-alpha*d) on fully dense (tile_rows, 128) vregs.
    cut = 0.5 * (jnp.cos(d * pi_over_cutoff) + 1.0)
    cut = jnp.where(d < cutoff, cut, 0.0)
    e = jnp.exp(neg_alpha * d)

    # Exact lane-spread: y[j, l] = x[j, l // n_rbf], via one-hot matmuls on the MXU
    # (pure data movement, not an MXU reformulation of the math).  x is split into
    # bf16-exactly-representable pieces so multiplying by the 0/1 matrix is exact.
    def spread(x, pieces):
        acc = None
        rem = x
        for _ in range(pieces):
            p = rem.astype(jnp.bfloat16)
            rem = rem - p.astype(jnp.float32)
            y = jnp.dot(p, s_mat, preferred_element_type=jnp.float32)
            acc = y if acc is None else acc + y
        return acc

    e_s = spread(e, 3)      # feeds exp(-beta*(.)^2): 3 pieces -> ~2^-24 error
    cut_s = spread(cut, 2)  # enters linearly: 2 pieces -> ~2^-18 error, well < 1e-5

    diff = e_s - means_t
    o_ref[...] = (cut_s * jnp.exp(neg_betas_t * diff * diff)).astype(o_ref.dtype)


# ----------------------------------------------------------------- wrapper ---
def exp_normal_smearing_params(cutoff: float = 5.0, n_rbf: int = 16):
    """Deterministic parameter init, identical to ExpNormalSmearing._initial_params."""
    start_value = math.exp(-cutoff)
    means = jnp.linspace(start_value, 1.0, n_rbf, dtype=jnp.float32)
    betas = jnp.full((n_rbf,), (2.0 / n_rbf * (1.0 - start_value)) ** (-2),
                     dtype=jnp.float32)
    return means, betas


def exp_normal_smearing(dist, means, betas, *, cutoff: float = 5.0,
                        tile_n: int = 16384, out_dtype=jnp.float32):
    """Forward pass of ExpNormalSmearing; returns dist.shape + (n_rbf,).

    out_dtype=jnp.bfloat16 halves the dominant output HBM traffic if the consumer
    tolerates it; the default stays float32 to match the PyTorch module exactly.
    """
    n_rbf = int(means.shape[0])
    lane_w = n_rbf * 128
    alpha = 5.0 / cutoff

    orig_shape = dist.shape
    flat = dist.reshape(-1).astype(jnp.float32)
    n = int(flat.shape[0])

    # Tiling: rows of 128 distances; keep row counts multiples of 8 for (8,128) tiles.
    rows = max(8, _round_up(pl.cdiv(n, 128), 8))
    target_rows = _round_up(max(1, tile_n // 128), 8)
    steps = max(pl.cdiv(rows, target_rows), 2 if rows >= 16 else 1)  # >=2: dual-TC v7x
    tile_rows = _round_up(pl.cdiv(rows, steps), 8)
    grid_rows = pl.cdiv(rows, tile_rows)
    rows_pad = grid_rows * tile_rows
    n_pad = rows_pad * 128
    if n_pad != n:                          # pad only when actually ragged
        flat = jnp.pad(flat, (0, n_pad - n))
    dist2 = flat.reshape(rows_pad, 128)     # contiguous (free) view, fully dense

    # Constant operands; their index_map is constant so they are fetched once.
    lane = jnp.arange(lane_w, dtype=jnp.int32)
    onehot = (jnp.arange(128, dtype=jnp.int32)[:, None] == (lane[None, :] // n_rbf))
    onehot = onehot.astype(jnp.bfloat16)                        # (128, lane_w)
    means_t = jnp.tile(means.astype(jnp.float32), 128)          # (lane_w,)
    neg_betas_t = jnp.tile((-betas).astype(jnp.float32), 128)   # (lane_w,)
    params = jnp.stack([means_t, neg_betas_t], axis=0)          # (2, lane_w)

    kernel = partial(_expnorm_kernel,
                     cutoff=float(cutoff),
                     neg_alpha=-float(alpha),
                     pi_over_cutoff=float(math.pi / cutoff))

    out_bytes = jnp.dtype(out_dtype).itemsize
    cost = pl.CostEstimate(
        flops=int(2 * 5 * rows_pad * 128 * lane_w + 8 * rows_pad * lane_w),
        transcendentals=int(rows_pad * lane_w + 2 * rows_pad * 128),
        bytes_accessed=int(4 * n_pad + out_bytes * rows_pad * lane_w
                           + 2 * 128 * lane_w + 2 * 4 * lane_w),
    )

    out2d = pl.pallas_call(
        kernel,
        out_shape=jax.ShapeDtypeStruct((rows_pad, lane_w), out_dtype),
        grid=(grid_rows,),
        in_specs=[
            pl.BlockSpec((tile_rows, 128), lambda i: (i, 0)),
            pl.BlockSpec((128, lane_w), lambda i: (0, 0)),
            pl.BlockSpec((2, lane_w), lambda i: (0, 0)),
        ],
        out_specs=pl.BlockSpec((tile_rows, lane_w), lambda i: (i, 0)),
        compiler_params=pltpu.CompilerParams(dimension_semantics=("parallel",)),
        cost_estimate=cost,
    )(dist2, onehot, params)

    # Flat order of (rows_pad, n_rbf*128) equals (n_pad, n_rbf): zero-copy reshape.
    # The slice only materializes when the input was ragged (n % 1024 != 0).
    out = out2d.reshape(n_pad, n_rbf)
    if n_pad != n:
        out = out[:n]
    return out.reshape(*orig_shape, n_rbf)


# --------------------------------------------------------------- reference ---
def _reference(dist, means, betas, cutoff=5.0):
    alpha = 5.0 / cutoff
    d = dist[..., None].astype(jnp.float32)
    cut = 0.5 * (jnp.cos(d * math.pi / cutoff) + 1.0)
    cut = cut * (d < cutoff).astype(jnp.float32)
    return cut * jnp.exp(-betas * (jnp.exp(-alpha * d) - means) ** 2)


if __name__ == "__main__":
    cutoff = 5.0
    n_rbf = 16
    means, betas = exp_normal_smearing_params(cutoff, n_rbf)

    key = jax.random.PRNGKey(0)
    k1, k2 = jax.random.split(key)

    # Case 1: small 2-D batch of edge distances in [0, 7) (some exceed the cutoff).
    dist_a = jax.random.uniform(k1, (2, 128), dtype=jnp.float32) * 7.0
    out_a = jax.block_until_ready(
        exp_normal_smearing(dist_a, means, betas, cutoff=cutoff))
    ref_a = _reference(dist_a, means, betas, cutoff)
    assert out_a.shape == (2, 128, n_rbf)
    assert jnp.allclose(out_a, ref_a, atol=1e-5, rtol=1e-5), "mismatch (case 1)"

    # Case 2: ragged 1-D size exercising padding and a multi-step grid.
    dist_b = jax.random.uniform(k2, (3000,), dtype=jnp.float32) * 7.0
    out_b = jax.block_until_ready(
        exp_normal_smearing(dist_b, means, betas, cutoff=cutoff))
    ref_b = _reference(dist_b, means, betas, cutoff)
    assert out_b.shape == (3000, n_rbf)
    assert jnp.allclose(out_b, ref_b, atol=1e-5, rtol=1e-5), "mismatch (case 2)"

    print("KERNEL_OK")
</pallas_src>

<mosaic_0001>
module attributes {stable_mosaic.version = 11 : i64} {
  func.func @_expnorm_kernel(%arg0: i32, %arg1: memref<8x128xf32, #tpu.memory_space<vmem>>, %arg2: memref<128x2048xbf16, #tpu.memory_space<vmem>>, %arg3: memref<2x2048xf32, #tpu.memory_space<vmem>>, %arg4: memref<8x2048xf32, #tpu.memory_space<vmem>>) attributes {dimension_semantics = [#tpu.dimension_semantics<parallel>], iteration_bounds = array<i64: 1>, scalar_prefetch = 0 : i64, scratch_operands = 0 : i64, tpu.core_type = #tpu.core_type<tc>, window_params = [{transform_indices = @transform_0, window_bounds = array<i64: 8, 128>}, {pipeline_mode = #tpu.pipeline_mode<synchronous>, transform_indices = @transform_1, window_bounds = array<i64: 128, 2048>}, {pipeline_mode = #tpu.pipeline_mode<synchronous>, transform_indices = @transform_2, window_bounds = array<i64: 2, 2048>}, {transform_indices = @transform_3, window_bounds = array<i64: 8, 2048>}]} {
    %c0 = arith.constant 0 : index
    %c0_0 = arith.constant 0 : index
    %0 = vector.load %arg1[%c0, %c0_0] : memref<8x128xf32, #tpu.memory_space<vmem>>, vector<8x128xf32>
    %c0_1 = arith.constant 0 : index
    %c0_2 = arith.constant 0 : index
    %1 = vector.load %arg2[%c0_1, %c0_2] : memref<128x2048xbf16, #tpu.memory_space<vmem>>, vector<128x2048xbf16>
    %c0_3 = arith.constant 0 : index
    %c0_4 = arith.constant 0 : index
    %2 = vector.load %arg3[%c0_3, %c0_4] : memref<2x2048xf32, #tpu.memory_space<vmem>>, vector<1x2048xf32>
    %c1 = arith.constant 1 : index
    %c0_5 = arith.constant 0 : index
    %3 = vector.load %arg3[%c1, %c0_5] : memref<2x2048xf32, #tpu.memory_space<vmem>>, vector<1x2048xf32>
    %cst = arith.constant 0.628318548 : f32
    %4 = vector.broadcast %cst : f32 to vector<8x128xf32>
    %5 = arith.mulf %0, %4 : vector<8x128xf32>
    %6 = math.cos %5 : vector<8x128xf32>
    %cst_6 = arith.constant 1.000000e+00 : f32
    %7 = vector.broadcast %cst_6 : f32 to vector<8x128xf32>
    %8 = arith.addf %6, %7 : vector<8x128xf32>
    %cst_7 = arith.constant 5.000000e-01 : f32
    %9 = vector.broadcast %cst_7 : f32 to vector<8x128xf32>
    %10 = arith.mulf %9, %8 : vector<8x128xf32>
    %cst_8 = arith.constant 5.000000e+00 : f32
    %11 = vector.broadcast %cst_8 : f32 to vector<8x128xf32>
    %12 = arith.cmpf olt, %0, %11 : vector<8x128xf32>
    %cst_9 = arith.constant 0.000000e+00 : f32
    %13 = vector.broadcast %cst_9 : f32 to vector<8x128xf32>
    %14 = arith.select %12, %10, %13 : vector<8x128xi1>, vector<8x128xf32>
    %cst_10 = arith.constant -1.000000e+00 : f32
    %15 = vector.broadcast %cst_10 : f32 to vector<8x128xf32>
    %16 = arith.mulf %15, %0 : vector<8x128xf32>
    %17 = math.exp %16 : vector<8x128xf32>
    %18 = arith.truncf %17 : vector<8x128xf32> to vector<8x128xbf16>
    %19 = arith.extf %18 : vector<8x128xbf16> to vector<8x128xf32>
    %20 = arith.subf %17, %19 : vector<8x128xf32>
    %cst_11 = arith.constant dense<0.000000e+00> : vector<8x2048xf32>
    %21 = tpu.matmul %18, %1, %cst_11 {dimension_numbers = #tpu.dot_dimension_numbers<[1], [0], [0], [1], [0, 0, 1, 1], [], []>} : vector<8x128xbf16>, vector<128x2048xbf16>, vector<8x2048xf32> -> vector<8x2048xf32>
    %22 = arith.truncf %20 : vector<8x128xf32> to vector<8x128xbf16>
    %23 = arith.extf %22 : vector<8x128xbf16> to vector<8x128xf32>
    %24 = arith.subf %20, %23 : vector<8x128xf32>
    %cst_12 = arith.constant dense<0.000000e+00> : vector<8x2048xf32>
    %25 = tpu.matmul %22, %1, %cst_12 {dimension_numbers = #tpu.dot_dimension_numbers<[1], [0], [0], [1], [0, 0, 1, 1], [], []>} : vector<8x128xbf16>, vector<128x2048xbf16>, vector<8x2048xf32> -> vector<8x2048xf32>
    %26 = arith.addf %21, %25 : vector<8x2048xf32>
    %27 = arith.truncf %24 : vector<8x128xf32> to vector<8x128xbf16>
    %cst_13 = arith.constant dense<0.000000e+00> : vector<8x2048xf32>
    %28 = tpu.matmul %27, %1, %cst_13 {dimension_numbers = #tpu.dot_dimension_numbers<[1], [0], [0], [1], [0, 0, 1, 1], [], []>} : vector<8x128xbf16>, vector<128x2048xbf16>, vector<8x2048xf32> -> vector<8x2048xf32>
    %29 = arith.addf %26, %28 : vector<8x2048xf32>
    %30 = arith.truncf %14 : vector<8x128xf32> to vector<8x128xbf16>
    %31 = arith.extf %30 : vector<8x128xbf16> to vector<8x128xf32>
    %32 = arith.subf %14, %31 : vector<8x128xf32>
    %cst_14 = arith.constant dense<0.000000e+00> : vector<8x2048xf32>
    %33 = tpu.matmul %30, %1, %cst_14 {dimension_numbers = #tpu.dot_dimension_numbers<[1], [0], [0], [1], [0, 0, 1, 1], [], []>} : vector<8x128xbf16>, vector<128x2048xbf16>, vector<8x2048xf32> -> vector<8x2048xf32>
    %34 = arith.truncf %32 : vector<8x128xf32> to vector<8x128xbf16>
    %cst_15 = arith.constant dense<0.000000e+00> : vector<8x2048xf32>
    %35 = tpu.matmul %34, %1, %cst_15 {dimension_numbers = #tpu.dot_dimension_numbers<[1], [0], [0], [1], [0, 0, 1, 1], [], []>} : vector<8x128xbf16>, vector<128x2048xbf16>, vector<8x2048xf32> -> vector<8x2048xf32>
    %36 = arith.addf %33, %35 : vector<8x2048xf32>
    %37 = vector.broadcast %2 : vector<1x2048xf32> to vector<8x2048xf32>
    %38 = arith.subf %29, %37 : vector<8x2048xf32>
    %39 = vector.broadcast %3 : vector<1x2048xf32> to vector<8x2048xf32>
    %40 = arith.mulf %39, %38 : vector<8x2048xf32>
    %41 = arith.mulf %40, %38 : vector<8x2048xf32>
    %42 = math.exp %41 : vector<8x2048xf32>
    %43 = arith.mulf %36, %42 : vector<8x2048xf32>
    %c0_16 = arith.constant 0 : index
    %c0_17 = arith.constant 0 : index
    %44 = vector.load %arg4[%c0_16, %c0_17] : memref<8x2048xf32, #tpu.memory_space<vmem>>, vector<8x2048xf32>
    tpu.vector_store %arg4[%c0_16, %c0_17], %43 {strides = array<i32>} : memref<8x2048xf32, #tpu.memory_space<vmem>>, vector<8x2048xf32>,
    return
  }
  func.func @transform_0(%arg0: i32) -> (i32, i32) {
    %c0_i32 = arith.constant 0 : i32
    %c0_i32_0 = arith.constant 0 : i32
    return %arg0, %c0_i32 : i32, i32
  }
  func.func @transform_1(%arg0: i32) -> (i32, i32) {
    %c0_i32 = arith.constant 0 : i32
    %c0_i32_0 = arith.constant 0 : i32
    %c0_i32_1 = arith.constant 0 : i32
    return %c0_i32, %c0_i32_0 : i32, i32
  }
  func.func @transform_2(%arg0: i32) -> (i32, i32) {
    %c0_i32 = arith.constant 0 : i32
    %c0_i32_0 = arith.constant 0 : i32
    %c0_i32_1 = arith.constant 0 : i32
    return %c0_i32, %c0_i32_0 : i32, i32
  }
  func.func @transform_3(%arg0: i32) -> (i32, i32) {
    %c0_i32 = arith.constant 0 : i32
    %c0_i32_0 = arith.constant 0 : i32
    return %arg0, %c0_i32 : i32, i32
  }
}

</mosaic_0001>

<bundles_post_ra>
// kernel: tpu_custom_call.1
= control target key start
LH: loop header
LB: loop body
LE: loop exit
PB: predicated region body
PF: predicated region fallthrough
CT: control target
= control target key end

     0   :  { %8 = vsyncpa [#allocation3], 0  ;;  %s4513_s0 = inlined_call_operand.hbm [shape: f32[8,128], index: 0, kind: input, shape index: {}]   ;;  %s4514_s1 = inlined_call_operand.hbm [shape: bf16[128,2048], index: 1, kind: input, shape index: {}]   ;;  %s4515_s2 = inlined_call_operand.hbm [shape: f32[2,2048], index: 2, kind: input, shape index: {}]   ;;  %s4516_s3 = inlined_call_operand.hbm [shape: f32[8,2048], index: 3, kind: output, shape index: {}]  }
   0x1   :  { %9 = vsyncpa [#allocation6], 0  ;;  %s26_s14 = sshll.u32 %s4514_s1, 4  ;;  %s27_s14 = int_to_ptr.hbm [resolvable:$true] %s26_s14 }
   0x2   :  { %10 = vsyncpa [#allocation4], 0  ;;  %s3102_s15 = smov [#allocation5]   ;;  %s16_s19 = sshll.u32 %s4513_s0, 4  ;;  %s17_s19 = int_to_ptr.hbm [resolvable:$true] %s16_s19 }
   0x3   :  { %s28_s16 = sshll.u32 %s3102_s15, 4  ;;  %s3103_s20 = smov 1024   ;;  %s29_s16 = int_to_ptr.vmem [resolvable:$true] %s28_s16 }
   0x4   :  { %s3104_s21 = smov 64   ;;  %s3105_s22 = smov [#allocation2]  }
   0x5   :  { %34 = dma.hbm_to_vmem [thread:$0]  %s27_s14, 16384, %s29_s16, [#allocation6], %s3103_s20, %s3103_s20, %s3104_s21  }
   0x6   :  { %s18_s23 = sshll.u32 %s3105_s22, 4  ;;  %s40_s26 = sshll.u32 %s4515_s2, 4  ;;  %s19_s23 = int_to_ptr.vmem [resolvable:$true] %s18_s23  ;;  %s41_s26 = int_to_ptr.hbm [resolvable:$true] %s40_s26 }
   0x7   :  { %21 = dma.hbm_to_vmem [thread:$0]  %s17_s19, 128, %s19_s23, [#allocation3]  }
   0x8   :  { %s3106_s1 = smov [#allocation7]  }
   0x9   :  { %s42_s27 = sshll.u32 %s3106_s1, 4  ;;  %s43_s27 = int_to_ptr.vmem [resolvable:$true] %s42_s27 }
   0xa   :  { %45 = dma.hbm_to_vmem [thread:$0]  %s41_s26, 512, %s43_s27, [#allocation6]  }
   0xb   :  { %3096 = dma.done.wait [#allocation3], 128  }
   0xc   :  { %3097 = vsyncadd [#allocation3], 4294967168 }
   0xd   :  { %3098 = dma.done.wait [#allocation6], 16896  }
   0xe   :  { %3099 = vsyncadd [#allocation6], 4294950400  ;;  %v2714_v0 = vld [vmem:[#allocation5 + $0x380] sm:$0xf]  ;;  %v2936_v2 = vld [vmem:[#allocation5 + $0x384] sm:$0xf] }
   0xf   :  { %v2944_v1 = vld [vmem:[#allocation5 + $0x3bc] sm:$0xf0]  ;;  %v2716_v4 = vld [vmem:[#allocation5 + $0x3c0] sm:$0xf0]  ;;  %v2722_v5 = vld [vmem:[#allocation5 + $0x388] sm:$0xf] }
  0x10   :  { %v3144_v3 = vor.u32 %v2944_v1, %v2714_v0  ;;  %v2945_v6 = vld [vmem:[#allocation5 + $0x3c4] sm:$0xf0]  ;;  %v3146_v7 = vor.u32 %v2936_v2, %v2716_v4  ;;  %v2937_v9 = vld [vmem:[#allocation5 + $0x38c] sm:$0xf]  ;;  %v2650_v11 = vld [vmem:[#allocation5 + $0x300] sm:$0xf] }
  0x11   :  { %v3148_v8 = vor.u32 %v2945_v6, %v2722_v5  ;;  %v2724_v10 = vld [vmem:[#allocation5 + $0x3c8] sm:$0xf0]  ;;  %v2928_v13 = vld [vmem:[#allocation5 + $0x33c] sm:$0xf0]  ;;  %v2920_v14 = vld [vmem:[#allocation5 + $0x304] sm:$0xf] }
  0x12   :  { %1002 = vmatpush.bf16.msra.mxu0 %v3144_v3  ;;  %v3151_v12 = vor.u32 %v2937_v9, %v2724_v10  ;;  %v2652_v15 = vld [vmem:[#allocation5 + $0x340] sm:$0xf0]  ;;  %1015 = vmatpush.bf16.msra.mxu1 %v3146_v7  ;;  %v3155_v16 = vor.u32 %v2928_v13, %v2650_v11  ;;  %v2658_v18 = vld [vmem:[#allocation5 + $0x308] sm:$0xf]  ;;  %v2921_v20 = vld [vmem:[#allocation5 + $0x30c] sm:$0xf] }
  0x13   :  { %4759 = vst [vmem:[#allocation12_spill] sm:$0xff] %v3148_v8  ;;  %1028 = vmatpush.bf16.msra.mxu2 %v3148_v8  ;;  %v3157_v17 = vor.u32 %v2920_v14, %v2652_v15  ;;  %v2929_v19 = vld [vmem:[#allocation5 + $0x344] sm:$0xf0]  ;;  %v2660_v22 = vld [vmem:[#allocation5 + $0x348] sm:$0xf0]  ;;  %s3114_s0 = smov [#allocation8]  }
  0x14   :  { %4760 = vst [vmem:[#allocation13_spill] sm:$0xff] %v3151_v12  ;;  %1041 = vmatpush.bf16.msra.mxu3 %v3151_v12  ;;  %v3160_v21 = vor.u32 %v2929_v19, %v2658_v18  ;;  %v2586_v23 = vld [vmem:[#allocation5 + $0x280] sm:$0xf]  ;;  %v3162_v25 = vor.u32 %v2921_v20, %v2660_v22  ;;  %v2904_v26 = vld [vmem:[#allocation5 + $0x284] sm:$0xf]  ;;  %s2248_s2 = sshll.u32 %s3114_s0, 4  ;;  %s2249_s2 = int_to_ptr.vmem [resolvable:$true] %s2248_s2 }
  0x15   :  { %4761 = vst [vmem:[#allocation14_spill] sm:$0xff] %v3155_v16  ;;  %v2912_v24 = vld [vmem:[#allocation5 + $0x2bc] sm:$0xf0]  ;;  %v2588_v27 = vld [vmem:[#allocation5 + $0x2c0] sm:$0xf0]  ;;  %s2250_s30 = sshll.u32 %s4516_s3, 4  ;;  %s2251_s30 = int_to_ptr.hbm [resolvable:$true] %s2250_s30 }
  0x16   :  { %4762 = vst [vmem:[#allocation15_spill] sm:$0xff] %v3157_v17  ;;  %v2594_v28 = vld [vmem:[#allocation5 + $0x288] sm:$0xf]  ;;  %1003 = vmatpush.bf16.msra.mxu0 %v3155_v16  ;;  %v3165_v29 = vor.u32 %v2912_v24, %v2586_v23  ;;  %v2905_v31 = vld [vmem:[#allocation5 + $0x28c] sm:$0xf]  ;;  %1016 = vmatpush.bf16.msra.mxu1 %v3157_v17  ;;  %v3169_v33 = vor.u32 %v2904_v26, %v2588_v27 }
  0x17   :  { %4763 = vst [vmem:[#allocation16_spill] sm:$0xff] %v3160_v21  ;;  %v2913_v30 = vld [vmem:[#allocation5 + $0x2c4] sm:$0xf0]  ;;  %v2596_v32 = vld [vmem:[#allocation5 + $0x2c8] sm:$0xf0]  ;;  %1029 = vmatpush.bf16.msra.mxu2 %v3160_v21 }
  0x18   :  { %4764 = vst [vmem:[#allocation17_spill] sm:$0xff] %v3162_v25  ;;  %v3171_v34 = vor.u32 %v2913_v30, %v2594_v28  ;;  %v2522_v35 = vld [vmem:[#allocation5 + $0x200] sm:$0xf]  ;;  %v2888_v37 = vld [vmem:[#allocation5 + $0x204] sm:$0xf]  ;;  %1042 = vmatpush.bf16.msra.mxu3 %v3162_v25  ;;  %v3174_v38 = vor.u32 %v2905_v31, %v2596_v32 }
  0x19   :  { %4765 = vst [vmem:[#allocation18_spill] sm:$0xff] %v3165_v29  ;;  %v2896_v36 = vld [vmem:[#allocation5 + $0x23c] sm:$0xf0]  ;;  %v2524_v39 = vld [vmem:[#allocation5 + $0x240] sm:$0xf0] }
  0x1a   :  { %4766 = vst [vmem:[#allocation19_spill] sm:$0xff] %v3169_v33  ;;  %v2530_v40 = vld [vmem:[#allocation5 + $0x208] sm:$0xf]  ;;  %v2889_v42 = vld [vmem:[#allocation5 + $0x20c] sm:$0xf]  ;;  %1004 = vmatpush.bf16.msra.mxu0 %v3165_v29  ;;  %v3177_v44 = vor.u32 %v2896_v36, %v2522_v35  ;;  %1017 = vmatpush.bf16.msra.mxu1 %v3169_v33  ;;  %v3181_v45 = vor.u32 %v2888_v37, %v2524_v39 }
  0x1b   :  { %4767 = vst [vmem:[#allocation20_spill] sm:$0xff] %v3171_v34  ;;  %v2897_v41 = vld [vmem:[#allocation5 + $0x244] sm:$0xf0]  ;;  %v2532_v43 = vld [vmem:[#allocation5 + $0x248] sm:$0xf0]  ;;  %1030 = vmatpush.bf16.msra.mxu2 %v3171_v34 }
  0x1c   :  { %4768 = vst [vmem:[#allocation21_spill] sm:$0xff] %v3174_v38  ;;  %v3183_v46 = vor.u32 %v2897_v41, %v2530_v40  ;;  %v2458_v47 = vld [vmem:[#allocation5 + $0x180] sm:$0xf]  ;;  %v2872_v49 = vld [vmem:[#allocation5 + $0x184] sm:$0xf]  ;;  %1043 = vmatpush.bf16.msra.mxu3 %v3174_v38  ;;  %v3186_v50 = vor.u32 %v2889_v42, %v2532_v43 }
  0x1d   :  { %4769 = vst [vmem:[#allocation22_spill] sm:$0xff] %v3177_v44  ;;  %v2880_v48 = vld [vmem:[#allocation5 + $0x1bc] sm:$0xf0]  ;;  %v2460_v51 = vld [vmem:[#allocation5 + $0x1c0] sm:$0xf0] }
  0x1e   :  { %4770 = vst [vmem:[#allocation23_spill] sm:$0xff] %v3181_v45  ;;  %v2466_v52 = vld [vmem:[#allocation5 + $0x188] sm:$0xf]  ;;  %v2873_v54 = vld [vmem:[#allocation5 + $0x18c] sm:$0xf]  ;;  %1005 = vmatpush.bf16.msra.mxu0 %v3177_v44  ;;  %v3189_v56 = vor.u32 %v2880_v48, %v2458_v47  ;;  %1018 = vmatpush.bf16.msra.mxu1 %v3181_v45  ;;  %v3193_v57 = vor.u32 %v2872_v49, %v2460_v51 }
  0x1f   :  { %4771 = vst [vmem:[#allocation24_spill] sm:$0xff] %v3183_v46  ;;  %v2881_v53 = vld [vmem:[#allocation5 + $0x1c4] sm:$0xf0]  ;;  %v2468_v55 = vld [vmem:[#allocation5 + $0x1c8] sm:$0xf0]  ;;  %1031 = vmatpush.bf16.msra.mxu2 %v3183_v46 }
  0x20   :  { %4772 = vst [vmem:[#allocation25_spill] sm:$0xff] %v3186_v50  ;;  %v3195_v58 = vor.u32 %v2881_v53, %v2466_v52  ;;  %v2394_v59 = vld [vmem:[#allocation5 + $0x100] sm:$0xf]  ;;  %v2856_v61 = vld [vmem:[#allocation5 + $0x104] sm:$0xf]  ;;  %1044 = vmatpush.bf16.msra.mxu3 %v3186_v50  ;;  %v3198_v62 = vor.u32 %v2873_v54, %v2468_v55 }
  0x21   :  { %4773 = vst [vmem:[#allocation26_spill] sm:$0xff] %v3189_v56  ;;  %v2864_v60 = vld [vmem:[#allocation5 + $0x13c] sm:$0xf0]  ;;  %v2396_v63 = vld [vmem:[#allocation5 + $0x140] sm:$0xf0] }
  0x22   :  { %4774 = vst [vmem:[#allocation27_spill] sm:$0xff] %v3193_v57  ;;  %v2402_v0 = vld [vmem:[#allocation5 + $0x108] sm:$0xf]  ;;  %v2857_v2 = vld [vmem:[#allocation5 + $0x10c] sm:$0xf]  ;;  %1006 = vmatpush.bf16.msra.mxu0 %v3189_v56  ;;  %v3201_v5 = vor.u32 %v2864_v60, %v2394_v59  ;;  %1019 = vmatpush.bf16.msra.mxu1 %v3193_v57  ;;  %v3205_v6 = vor.u32 %v2856_v61, %v2396_v63 }
  0x23   :  { %4775 = vst [vmem:[#allocation28_spill] sm:$0xff] %v3195_v58  ;;  %v2865_v1 = vld [vmem:[#allocation5 + $0x144] sm:$0xf0]  ;;  %v2404_v4 = vld [vmem:[#allocation5 + $0x148] sm:$0xf0]  ;;  %1032 = vmatpush.bf16.msra.mxu2 %v3195_v58 }
  0x24   :  { %4776 = vst [vmem:[#allocation29_spill] sm:$0xff] %v3198_v62  ;;  %v3207_v9 = vor.u32 %v2865_v1, %v2402_v0  ;;  %v2330_v10 = vld [vmem:[#allocation5 + $0x80] sm:$0xf]  ;;  %v2840_v13 = vld [vmem:[#allocation5 + $0x84] sm:$0xf]  ;;  %1045 = vmatpush.bf16.msra.mxu3 %v3198_v62  ;;  %v3210_v14 = vor.u32 %v2857_v2, %v2404_v4 }
  0x25   :  { %4777 = vst [vmem:[#allocation30_spill] sm:$0xff] %v3201_v5  ;;  %v2848_v11 = vld [vmem:[#allocation5 + $0xbc] sm:$0xf0]  ;;  %v2332_v15 = vld [vmem:[#allocation5 + $0xc0] sm:$0xf0] }
  0x26   :  { %4778 = vst [vmem:[#allocation31_spill] sm:$0xff] %v3205_v6  ;;  %v2338_v18 = vld [vmem:[#allocation5 + $0x88] sm:$0xf]  ;;  %v2841_v20 = vld [vmem:[#allocation5 + $0x8c] sm:$0xf]  ;;  %1007 = vmatpush.bf16.msra.mxu0 %v3201_v5  ;;  %v3213_v23 = vor.u32 %v2848_v11, %v2330_v10  ;;  %1020 = vmatpush.bf16.msra.mxu1 %v3205_v6  ;;  %v3217_v27 = vor.u32 %v2840_v13, %v2332_v15 }
  0x27   :  { %4779 = vst [vmem:[#allocation32_spill] sm:$0xff] %v3207_v9  ;;  %v2849_v19 = vld [vmem:[#allocation5 + $0xc4] sm:$0xf0]  ;;  %v2340_v22 = vld [vmem:[#allocation5 + $0xc8] sm:$0xf0]  ;;  %1033 = vmatpush.bf16.msra.mxu2 %v3207_v9 }
  0x28   :  { %4780 = vst [vmem:[#allocation33_spill] sm:$0xff] %v3210_v14  ;;  %v2266_v24 = vld [vmem:[#allocation5] sm:$0xf]  ;;  %v3219_v28 = vor.u32 %v2849_v19, %v2338_v18  ;;  %v2824_v30 = vld [vmem:[#allocation5 + $0x4] sm:$0xf]  ;;  %1046 = vmatpush.bf16.msra.mxu3 %v3210_v14  ;;  %v3222_v35 = vor.u32 %v2841_v20, %v2340_v22 }
  0x29   :  { %4781 = vst [vmem:[#allocation34_spill] sm:$0xff] %v3213_v23  ;;  %v2832_v26 = vld [vmem:[#allocation5 + $0x3c] sm:$0xf0]  ;;  %v2268_v31 = vld [vmem:[#allocation5 + $0x40] sm:$0xf0] }
  0x2a   :  { %4782 = vst [vmem:[#allocation35_spill] sm:$0xff] %v3217_v27  ;;  %v2274_v32 = vld [vmem:[#allocation5 + $0x8] sm:$0xf]  ;;  %v2825_v37 = vld [vmem:[#allocation5 + $0xc] sm:$0xf]  ;;  %1008 = vmatpush.bf16.msra.mxu0 %v3213_v23  ;;  %v3225_v43 = vor.u32 %v2832_v26, %v2266_v24  ;;  %1021 = vmatpush.bf16.msra.mxu1 %v3217_v27  ;;  %v3229_v51 = vor.u32 %v2824_v30, %v2268_v31 }
  0x2b   :  { %4783 = vst [vmem:[#allocation36_spill] sm:$0xff] %v3219_v28  ;;  %v2833_v36 = vld [vmem:[#allocation5 + $0x44] sm:$0xf0]  ;;  %v2276_v39 = vld [vmem:[#allocation5 + $0x48] sm:$0xf0]  ;;  %1034 = vmatpush.bf16.msra.mxu2 %v3219_v28 }
  0x2c   :  { %4784 = vst [vmem:[#allocation37_spill] sm:$0xff] %v3222_v35  ;;  %v2730_v40 = vld [vmem:[#allocation5 + $0x390] sm:$0xf]  ;;  %v2938_v42 = vld [vmem:[#allocation5 + $0x394] sm:$0xf]  ;;  %v3231_v52 = vor.u32 %v2833_v36, %v2274_v32  ;;  %1047 = vmatpush.bf16.msra.mxu3 %v3222_v35  ;;  %v3234_v55 = vor.u32 %v2825_v37, %v2276_v39 }
  0x2d   :  { %v2946_v41 = vld [vmem:[#allocation5 + $0x3cc] sm:$0xf0]  ;;  %4785 = vst [vmem:[#allocation38_spill] sm:$0xff] %v3225_v43  ;;  %v2732_v47 = vld [vmem:[#allocation5 + $0x3d0] sm:$0xf0] }
  0x2e   :  { %v2738_v48 = vld [vmem:[#allocation5 + $0x398] sm:$0xf]  ;;  %4786 = vst [vmem:[#allocation39_spill] sm:$0xff] %v3229_v51  ;;  %v2939_v53 = vld [vmem:[#allocation5 + $0x39c] sm:$0xf]  ;;  %v3236_v59 = vor.u32 %v2946_v41, %v2730_v40  ;;  %v3238_v60 = vor.u32 %v2938_v42, %v2732_v47  ;;  %1009 = vmatpush.bf16.msra.mxu0 %v3225_v43  ;;  %1022 = vmatpush.bf16.msra.mxu1 %v3229_v51 }
  0x2f   :  { %v2947_v49 = vld [vmem:[#allocation5 + $0x3d4] sm:$0xf0]  ;;  %4787 = vst [vmem:[#allocation40_spill] sm:$0xff] %v3231_v52  ;;  %v2740_v54 = vld [vmem:[#allocation5 + $0x3d8] sm:$0xf0]  ;;  %1035 = vmatpush.bf16.msra.mxu2 %v3231_v52 }
  0x30   :  { %4788 = vst [vmem:[#allocation41_spill] sm:$0xff] %v3234_v55  ;;  %v3240_v61 = vor.u32 %v2947_v49, %v2738_v48  ;;  %v2666_v63 = vld [vmem:[#allocation5 + $0x310] sm:$0xf]  ;;  %v2922_v1 = vld [vmem:[#allocation5 + $0x314] sm:$0xf]  ;;  %v3243_v2 = vor.u32 %v2939_v53, %v2740_v54  ;;  %1048 = vmatpush.bf16.msra.mxu3 %v3234_v55  ;;  %v58_v42 = vld [vmem:[#allocation2] sm:$0xff] }
  0x31   :  { %4789 = vst [vmem:[#allocation42_spill] sm:$0xff] %v3236_v59  ;;  %v2930_v0 = vld [vmem:[#allocation5 + $0x34c] sm:$0xf0]  ;;  %v2668_v4 = vld [vmem:[#allocation5 + $0x350] sm:$0xf0]  ;;  %v353_v54 = vmul.f32 -1.0, %v58_v42 }
  0x32   :  { %4790 = vst [vmem:[#allocation43_spill] sm:$0xff] %v3238_v60  ;;  %v2674_v10 = vld [vmem:[#allocation5 + $0x318] sm:$0xf]  ;;  %v2923_v13 = vld [vmem:[#allocation5 + $0x31c] sm:$0xf]  ;;  %1054 = vmatpush.bf16.msrb.mxu0 %v3236_v59  ;;  %v3249_v18 = vor.u32 %v2930_v0, %v2666_v63  ;;  %1067 = vmatpush.bf16.msrb.mxu1 %v3238_v60  ;;  %v3253_v19 = vor.u32 %v2922_v1, %v2668_v4 }
  0x33   :  { %4791 = vst [vmem:[#allocation44_spill] sm:$0xff] %v3240_v61  ;;  %v2931_v11 = vld [vmem:[#allocation5 + $0x354] sm:$0xf0]  ;;  %v2676_v15 = vld [vmem:[#allocation5 + $0x358] sm:$0xf0]  ;;  %1080 = vmatpush.bf16.msrb.mxu2 %v3240_v61 }
  0x34   :  { %4792 = vst [vmem:[#allocation45_spill] sm:$0xff] %v3243_v2  ;;  %v3255_v20 = vor.u32 %v2931_v11, %v2674_v10  ;;  %v2602_v22 = vld [vmem:[#allocation5 + $0x290] sm:$0xf]  ;;  %v2906_v26 = vld [vmem:[#allocation5 + $0x294] sm:$0xf]  ;;  %1093 = vmatpush.bf16.msrb.mxu3 %v3243_v2  ;;  %v3258_v30 = vor.u32 %v2923_v13, %v2676_v15 }
  0x35   :  { %4793 = vst [vmem:[#allocation46_spill] sm:$0xff] %v3249_v18  ;;  %v2914_v24 = vld [vmem:[#allocation5 + $0x2cc] sm:$0xf0]  ;;  %v2604_v31 = vld [vmem:[#allocation5 + $0x2d0] sm:$0xf0] }
  0x36   :  { %4794 = vst [vmem:[#allocation47_spill] sm:$0xff] %v3253_v19  ;;  %v2610_v32 = vld [vmem:[#allocation5 + $0x298] sm:$0xf]  ;;  %v2907_v37 = vld [vmem:[#allocation5 + $0x29c] sm:$0xf]  ;;  %1055 = vmatpush.bf16.msrb.mxu0 %v3249_v18  ;;  %v3261_v40 = vor.u32 %v2914_v24, %v2602_v22  ;;  %1068 = vmatpush.bf16.msrb.mxu1 %v3253_v19  ;;  %v3265_v47 = vor.u32 %v2906_v26, %v2604_v31 }
  0x37   :  { %4795 = vst [vmem:[#allocation48_spill] sm:$0xff] %v3255_v20  ;;  %v2915_v36 = vld [vmem:[#allocation5 + $0x2d4] sm:$0xf0]  ;;  %v2612_v39 = vld [vmem:[#allocation5 + $0x2d8] sm:$0xf0]  ;;  %1081 = vmatpush.bf16.msrb.mxu2 %v3255_v20 }
  0x38   :  { %4796 = vst [vmem:[#allocation49_spill] sm:$0xff] %v3258_v30  ;;  %v2538_v41 = vld [vmem:[#allocation5 + $0x210] sm:$0xf]  ;;  %v3267_v48 = vor.u32 %v2915_v36, %v2610_v32  ;;  %v2890_v53 = vld [vmem:[#allocation5 + $0x214] sm:$0xf]  ;;  %1094 = vmatpush.bf16.msrb.mxu3 %v3258_v30  ;;  %v3270_v63 = vor.u32 %v2907_v37, %v2612_v39 }
  0x39   :  { %4797 = vst [vmem:[#allocation50_spill] sm:$0xff] %v3261_v40  ;;  %v2898_v49 = vld [vmem:[#allocation5 + $0x24c] sm:$0xf0]  ;;  %v2540_v0 = vld [vmem:[#allocation5 + $0x250] sm:$0xf0] }
  0x3a   :  { %4798 = vst [vmem:[#allocation51_spill] sm:$0xff] %v3265_v47  ;;  %v2546_v1 = vld [vmem:[#allocation5 + $0x218] sm:$0xf]  ;;  %v2891_v10 = vld [vmem:[#allocation5 + $0x21c] sm:$0xf]  ;;  %1056 = vmatpush.bf16.msrb.mxu0 %v3261_v40  ;;  %v3273_v15 = vor.u32 %v2898_v49, %v2538_v41  ;;  %1069 = vmatpush.bf16.msrb.mxu1 %v3265_v47  ;;  %v3277_v22 = vor.u32 %v2890_v53, %v2540_v0 }
  0x3b   :  { %4799 = vst [vmem:[#allocation52_spill] sm:$0xff] %v3267_v48  ;;  %v2899_v4 = vld [vmem:[#allocation5 + $0x254] sm:$0xf0]  ;;  %v2548_v11 = vld [vmem:[#allocation5 + $0x258] sm:$0xf0]  ;;  %1082 = vmatpush.bf16.msrb.mxu2 %v3267_v48 }
  0x3c   :  { %4800 = vst [vmem:[#allocation53_spill] sm:$0xff] %v3270_v63  ;;  %v354_v13 = vmul.f32 1.442695, %v353_v54  ;;  %v3279_v24 = vor.u32 %v2899_v4, %v2546_v1  ;;  %v2474_v26 = vld [vmem:[#allocation5 + $0x190] sm:$0xf]  ;;  %1095 = vmatpush.bf16.msrb.mxu3 %v3270_v63  ;;  %v3282_v36 = vor.u32 %v2891_v10, %v2548_v11 }
  0x3d   :  { %4801 = vst [vmem:[#allocation54_spill] sm:$0xff] %v3273_v15  ;;  %v2882_v31 = vld [vmem:[#allocation5 + $0x1cc] sm:$0xf0]  ;;  %v2874_v32 = vld [vmem:[#allocation5 + $0x194] sm:$0xf] }
  0x3e   :  { %4802 = vst [vmem:[#allocation55_spill] sm:$0xff] %v3277_v22  ;;  %2965 = vpow2.f32 %v354_v13  ;;  %v2476_v37 = vld [vmem:[#allocation5 + $0x1d0] sm:$0xf0]  ;;  %v2482_v39 = vld [vmem:[#allocation5 + $0x198] sm:$0xf]  ;;  %1057 = vmatpush.bf16.msrb.mxu0 %v3273_v15  ;;  %v3285_v54 = vor.u32 %v2882_v31, %v2474_v26  ;;  %1070 = vmatpush.bf16.msrb.mxu1 %v3277_v22 }
  0x3f   :  { %4803 = vst [vmem:[#allocation56_spill] sm:$0xff] %v3279_v24  ;;  %v2883_v41 = vld [vmem:[#allocation5 + $0x1d4] sm:$0xf0]  ;;  %v2875_v42 = vld [vmem:[#allocation5 + $0x19c] sm:$0xf]  ;;  %1083 = vmatpush.bf16.msrb.mxu2 %v3279_v24  ;;  %v3289_v53 = vor.u32 %v2874_v32, %v2476_v37 }
  0x40   :  { %4804 = vst [vmem:[#allocation57_spill] sm:$0xff] %v3282_v36  ;;  %v2484_v49 = vld [vmem:[#allocation5 + $0x1d8] sm:$0xf0]  ;;  %v3291_v0 = vor.u32 %v2883_v41, %v2482_v39  ;;  %v2410_v1 = vld [vmem:[#allocation5 + $0x110] sm:$0xf]  ;;  %1096 = vmatpush.bf16.msrb.mxu3 %v3282_v36 }
  0x41   :  { %4805 = vst [vmem:[#allocation58_spill] sm:$0xff] %v3285_v54  ;;  %v2866_v4 = vld [vmem:[#allocation5 + $0x14c] sm:$0xf0]  ;;  %v2858_v10 = vld [vmem:[#allocation5 + $0x114] sm:$0xf]  ;;  %v3294_v11 = vor.u32 %v2875_v42, %v2484_v49 }
  0x42   :  { %4806 = vst [vmem:[#allocation59_spill] sm:$0xff] %v3289_v53  ;;  %v2412_v13 = vld [vmem:[#allocation5 + $0x150] sm:$0xf0]  ;;  %v2418_v63 = vld [vmem:[#allocation5 + $0x118] sm:$0xf]  ;;  %1058 = vmatpush.bf16.msrb.mxu0 %v3285_v54  ;;  %v3297_v24 = vor.u32 %v2866_v4, %v2410_v1  ;;  %1071 = vmatpush.bf16.msrb.mxu1 %v3289_v53 }
  0x43   :  { %4807 = vst [vmem:[#allocation60_spill] sm:$0xff] %v3291_v0  ;;  %v2867_v15 = vld [vmem:[#allocation5 + $0x154] sm:$0xf0]  ;;  %v2859_v31 = vld [vmem:[#allocation5 + $0x11c] sm:$0xf]  ;;  %1084 = vmatpush.bf16.msrb.mxu2 %v3291_v0  ;;  %v3303_v37 = vor.u32 %v2858_v10, %v2412_v13 }
  0x44   :  { %4808 = vst [vmem:[#allocation61_spill] sm:$0xff] %v3294_v11  ;;  %v2966_v26 = vpop.eup %2965  ;;  %v2420_v48 = vld [vmem:[#allocation5 + $0x158] sm:$0xf0]  ;;  %v3305_v39 = vor.u32 %v2867_v15, %v2418_v63  ;;  %v2346_v41 = vld [vmem:[#allocation5 + $0x90] sm:$0xf]  ;;  %1097 = vmatpush.bf16.msrb.mxu3 %v3294_v11 }
  0x45   :  { %4809 = vst [vmem:[#allocation62_spill] sm:$0xff] %v3297_v24  ;;  %v3299_v32 = vpack.c.bf16 %v2966_v26, %v2966_v26  ;;  %v2850_v42 = vld [vmem:[#allocation5 + $0xcc] sm:$0xf0]  ;;  %v3308_v49 = vor.u32 %v2859_v31, %v2420_v48  ;;  %v2842_v1 = vld [vmem:[#allocation5 + $0x94] sm:$0xf] }
  0x46   :  { %4811 = vst [vmem:[#allocation64_spill] sm:$0xff] %v3303_v37  ;;  %v2348_v4 = vld [vmem:[#allocation5 + $0xd0] sm:$0xf0]  ;;  %v2354_v36 = vld [vmem:[#allocation5 + $0x98] sm:$0xf]  ;;  %1059 = vmatpush.bf16.msrb.mxu0 %v3297_v24  ;;  %1072 = vmatpush.bf16.msrb.mxu1 %v3303_v37  ;;  %v3316_v15 = vor.u32 %v2850_v42, %v2346_v41 }
  0x47   :  { %4810 = vst [vmem:[#allocation63_spill] sm:$0xff] %v3299_v32  ;;  %v357_v54 = vunpack.c.l.bf16 %v3299_v32  ;;  %v2851_v22 = vld [vmem:[#allocation5 + $0xd4] sm:$0xf0]  ;;  %v2843_v47 = vld [vmem:[#allocation5 + $0x9c] sm:$0xf]  ;;  %1085 = vmatpush.bf16.msrb.mxu2 %v3305_v39  ;;  %v3318_v48 = vor.u32 %v2842_v1, %v2348_v4 }
  0x48   :  { %4812 = vst [vmem:[#allocation65_spill] sm:$0xff] %v3305_v39  ;;  %v2356_v53 = vld [vmem:[#allocation5 + $0xd8] sm:$0xf0]  ;;  %v2282_v63 = vld [vmem:[#allocation5 + $0x10] sm:$0xf]  ;;  %1098 = vmatpush.bf16.msrb.mxu3 %v3308_v49 }
  0x49   :  { %4813 = vst [vmem:[#allocation66_spill] sm:$0xff] %v3308_v49  ;;  %v3312_v10 = vsub.f32 %v2966_v26, %v357_v54  ;;  %v2834_v13 = vld [vmem:[#allocation5 + $0x4c] sm:$0xf0]  ;;  %v2826_v31 = vld [vmem:[#allocation5 + $0x14] sm:$0xf]  ;;  %v3325_v54 = vor.u32 %v2851_v22, %v2354_v36  ;;  %v3327_v26 = vor.u32 %v2843_v47, %v2356_v53 }
  0x4a   :  { %4815 = vst [vmem:[#allocation68_spill] sm:$0xff] %v3316_v15  ;;  %v2284_v11 = vld [vmem:[#allocation5 + $0x50] sm:$0xf0]  ;;  %v2290_v37 = vld [vmem:[#allocation5 + $0x18] sm:$0xf]  ;;  %1060 = vmatpush.bf16.msrb.mxu0 %v3316_v15  ;;  %1073 = vmatpush.bf16.msrb.mxu1 %v3318_v48  ;;  %v3333_v22 = vor.u32 %v2834_v13, %v2282_v63 }
  0x4b   :  { %4814 = vst [vmem:[#allocation67_spill] sm:$0xff] %v3312_v10  ;;  %v3323_v0 = vpack.c.bf16 %v3312_v10, %v3312_v10  ;;  %v2835_v24 = vld [vmem:[#allocation5 + $0x54] sm:$0xf0]  ;;  %v2827_v39 = vld [vmem:[#allocation5 + $0x1c] sm:$0xf]  ;;  %v3335_v47 = vor.u32 %v2826_v31, %v2284_v11  ;;  %1086 = vmatpush.bf16.msrb.mxu2 %v3325_v54 }
  0x4c   :  { %4816 = vst [vmem:[#allocation69_spill] sm:$0xff] %v3318_v48  ;;  %v2292_v41 = vld [vmem:[#allocation5 + $0x58] sm:$0xf0]  ;;  %v2746_v42 = vld [vmem:[#allocation5 + $0x3a0] sm:$0xf]  ;;  %1099 = vmatpush.bf16.msrb.mxu3 %v3327_v26  ;;  %v3339_v30 = vor.u32 %v2835_v24, %v2290_v37 }
  0x4d   :  { %4817 = vst [vmem:[#allocation70_spill] sm:$0xff] %v3325_v54  ;;  %v2948_v1 = vld [vmem:[#allocation5 + $0x3dc] sm:$0xf0]  ;;  %1036 = vmatmul.bf16.vlgmr.msra.gmra.mxu2 %v3323_v0  ;;  %1049 = vmatmul.bf16.vlgmr.msra.gmra.mxu3 %v3323_v0  ;;  %v2940_v4 = vld [vmem:[#allocation5 + $0x3a4] sm:$0xf]  ;;  %v3341_v20 = vor.u32 %v2827_v39, %v2292_v41 }
  0x4e   :  { %4818 = vst [vmem:[#allocation71_spill] sm:$0xff] %v3327_v26  ;;  %v2748_v49 = vld [vmem:[#allocation5 + $0x3e0] sm:$0xf0]  ;;  %v2754_v40 = vld [vmem:[#allocation5 + $0x3a8] sm:$0xf]  ;;  %1010 = vmatmul.bf16.vlgmr.msra.gmra.mxu0 %v3323_v0  ;;  %1023 = vmatmul.bf16.vlgmr.msra.gmra.mxu1 %v3323_v0  ;;  %v3345_v48 = vor.u32 %v2948_v1, %v2746_v42 }
  0x4f   :  { %4819 = vst [vmem:[#allocation72_spill] sm:$0xff] %v3333_v22  ;;  %v2949_v36 = vld [vmem:[#allocation5 + $0x3e4] sm:$0xf0]  ;;  %v2941_v53 = vld [vmem:[#allocation5 + $0x3ac] sm:$0xf]  ;;  %v3347_v63 = vor.u32 %v2940_v4, %v2748_v49  ;;  %1061 = vmatpush.bf16.msrb.mxu0 %v3333_v22  ;;  %1074 = vmatpush.bf16.msrb.mxu1 %v3335_v47 }
  0x50   :  { %4820 = vst [vmem:[#allocation73_spill] sm:$0xff] %v3335_v47  ;;  %v2756_v10 = vld [vmem:[#allocation5 + $0x3e8] sm:$0xf0]  ;;  %v2682_v11 = vld [vmem:[#allocation5 + $0x320] sm:$0xf]  ;;  %v3349_v31 = vor.u32 %v2949_v36, %v2754_v40  ;;  %1087 = vmatpush.bf16.msrb.mxu2 %v3339_v30  ;;  %1100 = vmatpush.bf16.msrb.mxu3 %v3341_v20 }
  0x51   :  { %4821 = vst [vmem:[#allocation74_spill] sm:$0xff] %v3339_v30  ;;  %v2932_v13 = vld [vmem:[#allocation5 + $0x35c] sm:$0xf0]  ;;  %v3351_v15 = vor.u32 %v2941_v53, %v2756_v10  ;;  %v2924_v54 = vld [vmem:[#allocation5 + $0x324] sm:$0xf] }
  0x52   :  { %4822 = vst [vmem:[#allocation75_spill] sm:$0xff] %v3341_v20  ;;  %v2684_v26 = vld [vmem:[#allocation5 + $0x360] sm:$0xf0]  ;;  %v2690_v24 = vld [vmem:[#allocation5 + $0x328] sm:$0xf]  ;;  %v3359_v40 = vor.u32 %v2932_v13, %v2682_v11 }
  0x53   :  { %4823 = vst [vmem:[#allocation76_spill] sm:$0xff] %v3345_v48  ;;  %v2933_v37 = vld [vmem:[#allocation5 + $0x364] sm:$0xf0]  ;;  %v2925_v39 = vld [vmem:[#allocation5 + $0x32c] sm:$0xf]  ;;  %1106 = vmatpush.bf16.msra.mxu0 %v3345_v48  ;;  %1119 = vmatpush.bf16.msra.mxu1 %v3347_v63  ;;  %v3361_v49 = vor.u32 %v2924_v54, %v2684_v26 }
  0x54   :  { %4824 = vst [vmem:[#allocation77_spill] sm:$0xff] %v3347_v63  ;;  %v2692_v41 = vld [vmem:[#allocation5 + $0x368] sm:$0xf0]  ;;  %v2618_v10 = vld [vmem:[#allocation5 + $0x2a0] sm:$0xf]  ;;  %1132 = vmatpush.bf16.msra.mxu2 %v3349_v31  ;;  %1145 = vmatpush.bf16.msra.mxu3 %v3351_v15  ;;  %v3365_v1 = vor.u32 %v2933_v37, %v2690_v24 }
  0x55   :  { %4825 = vst [vmem:[#allocation78_spill] sm:$0xff] %v3349_v31  ;;  %v2916_v42 = vld [vmem:[#allocation5 + $0x2dc] sm:$0xf0]  ;;  %v3367_v4 = vor.u32 %v2925_v39, %v2692_v41  ;;  %v2908_v36 = vld [vmem:[#allocation5 + $0x2a4] sm:$0xf] }
  0x56   :  { %4826 = vst [vmem:[#allocation79_spill] sm:$0xff] %v3351_v15  ;;  %v2620_v53 = vld [vmem:[#allocation5 + $0x2e0] sm:$0xf0]  ;;  %v2626_v20 = vld [vmem:[#allocation5 + $0x2a8] sm:$0xf]  ;;  %v3371_v54 = vor.u32 %v2916_v42, %v2618_v10 }
  0x57   :  { %4827 = vst [vmem:[#allocation80_spill] sm:$0xff] %v3359_v40  ;;  %v2917_v48 = vld [vmem:[#allocation5 + $0x2e4] sm:$0xf0]  ;;  %v2909_v30 = vld [vmem:[#allocation5 + $0x2ac] sm:$0xf]  ;;  %1107 = vmatpush.bf16.msra.mxu0 %v3359_v40  ;;  %1120 = vmatpush.bf16.msra.mxu1 %v3361_v49  ;;  %v3373_v26 = vor.u32 %v2908_v36, %v2620_v53 }
  0x58   :  { %4828 = vst [vmem:[#allocation81_spill] sm:$0xff] %v3361_v49  ;;  %v2628_v63 = vld [vmem:[#allocation5 + $0x2e8] sm:$0xf0]  ;;  %v2554_v11 = vld [vmem:[#allocation5 + $0x220] sm:$0xf]  ;;  %1133 = vmatpush.bf16.msra.mxu2 %v3365_v1  ;;  %1146 = vmatpush.bf16.msra.mxu3 %v3367_v4  ;;  %v3377_v24 = vor.u32 %v2917_v48, %v2626_v20 }
  0x59   :  { %4829 = vst [vmem:[#allocation82_spill] sm:$0xff] %v3365_v1  ;;  %v2900_v13 = vld [vmem:[#allocation5 + $0x25c] sm:$0xf0]  ;;  %v3379_v37 = vor.u32 %v2909_v30, %v2628_v63  ;;  %v2892_v39 = vld [vmem:[#allocation5 + $0x224] sm:$0xf] }
  0x5a   :  { %4830 = vst [vmem:[#allocation83_spill] sm:$0xff] %v3367_v4  ;;  %v2556_v41 = vld [vmem:[#allocation5 + $0x260] sm:$0xf0]  ;;  %v2562_v15 = vld [vmem:[#allocation5 + $0x228] sm:$0xf]  ;;  %v3383_v10 = vor.u32 %v2900_v13, %v2554_v11 }
  0x5b   :  { %4831 = vst [vmem:[#allocation84_spill] sm:$0xff] %v3371_v54  ;;  %v2901_v40 = vld [vmem:[#allocation5 + $0x264] sm:$0xf0]  ;;  %v2893_v31 = vld [vmem:[#allocation5 + $0x22c] sm:$0xf]  ;;  %1108 = vmatpush.bf16.msra.mxu0 %v3371_v54  ;;  %1121 = vmatpush.bf16.msra.mxu1 %v3373_v26  ;;  %v3385_v42 = vor.u32 %v2892_v39, %v2556_v41 }
  0x5c   :  { %4832 = vst [vmem:[#allocation85_spill] sm:$0xff] %v3373_v26  ;;  %v2564_v49 = vld [vmem:[#allocation5 + $0x268] sm:$0xf0]  ;;  %v2490_v36 = vld [vmem:[#allocation5 + $0x1a0] sm:$0xf]  ;;  %1134 = vmatpush.bf16.msra.mxu2 %v3377_v24  ;;  %1147 = vmatpush.bf16.msra.mxu3 %v3379_v37  ;;  %v3389_v20 = vor.u32 %v2901_v40, %v2562_v15 }
  0x5d   :  { %4833 = vst [vmem:[#allocation86_spill] sm:$0xff] %v3377_v24  ;;  %v2884_v53 = vld [vmem:[#allocation5 + $0x1dc] sm:$0xf0]  ;;  %v3391_v30 = vor.u32 %v2893_v31, %v2564_v49  ;;  %v2876_v48 = vld [vmem:[#allocation5 + $0x1a4] sm:$0xf]  ;;  %1088 = vmatmul.bf16.vlgmr.msrb.gmra.mxu2 %v3323_v0  ;;  %1101 = vmatmul.bf16.vlgmr.msrb.gmra.mxu3 %v3323_v0 }
  0x5e   :  { %4834 = vst [vmem:[#allocation87_spill] sm:$0xff] %v3379_v37  ;;  %v2492_v63 = vld [vmem:[#allocation5 + $0x1e0] sm:$0xf0]  ;;  %v2498_v4 = vld [vmem:[#allocation5 + $0x1a8] sm:$0xf]  ;;  %v3397_v11 = vor.u32 %v2884_v53, %v2490_v36  ;;  %1062 = vmatmul.bf16.vlgmr.msrb.gmra.mxu0 %v3323_v0  ;;  %1075 = vmatmul.bf16.vlgmr.msrb.gmra.mxu1 %v3323_v0 }
  0x5f   :  { %4835 = vst [vmem:[#allocation88_spill] sm:$0xff] %v3383_v10  ;;  %v2885_v54 = vld [vmem:[#allocation5 + $0x1e4] sm:$0xf0]  ;;  %v2877_v1 = vld [vmem:[#allocation5 + $0x1ac] sm:$0xf]  ;;  %1109 = vmatpush.bf16.msra.mxu0 %v3383_v10  ;;  %1122 = vmatpush.bf16.msra.mxu1 %v3385_v42  ;;  %v3399_v15 = vor.u32 %v2876_v48, %v2492_v63 }
  0x60   :  { %4836 = vst [vmem:[#allocation89_spill] sm:$0xff] %v3385_v42  ;;  %v2500_v26 = vld [vmem:[#allocation5 + $0x1e8] sm:$0xf0]  ;;  %v2426_v31 = vld [vmem:[#allocation5 + $0x120] sm:$0xf]  ;;  %1135 = vmatpush.bf16.msra.mxu2 %v3389_v20  ;;  %1148 = vmatpush.bf16.msra.mxu3 %v3391_v30  ;;  %v3403_v49 = vor.u32 %v2885_v54, %v2498_v4 }
  0x61   :  { %4837 = vst [vmem:[#allocation90_spill] sm:$0xff] %v3389_v20  ;;  %v2868_v40 = vld [vmem:[#allocation5 + $0x15c] sm:$0xf0]  ;;  %v3405_v13 = vor.u32 %v2877_v1, %v2500_v26  ;;  %v2860_v39 = vld [vmem:[#allocation5 + $0x124] sm:$0xf] }
  0x62   :  { %4838 = vst [vmem:[#allocation91_spill] sm:$0xff] %v3391_v30  ;;  %v2428_v41 = vld [vmem:[#allocation5 + $0x160] sm:$0xf0]  ;;  %v2434_v37 = vld [vmem:[#allocation5 + $0x128] sm:$0xf]  ;;  %v3411_v36 = vor.u32 %v2868_v40, %v2426_v31 }
  0x63   :  { %4839 = vst [vmem:[#allocation92_spill] sm:$0xff] %v3397_v11  ;;  %v2869_v10 = vld [vmem:[#allocation5 + $0x164] sm:$0xf0]  ;;  %v2861_v24 = vld [vmem:[#allocation5 + $0x12c] sm:$0xf]  ;;  %1110 = vmatpush.bf16.msra.mxu0 %v3397_v11  ;;  %1123 = vmatpush.bf16.msra.mxu1 %v3399_v15  ;;  %v3413_v4 = vor.u32 %v2860_v39, %v2428_v41 }
  0x64   :  { %4840 = vst [vmem:[#allocation93_spill] sm:$0xff] %v3399_v15  ;;  %v2436_v42 = vld [vmem:[#allocation5 + $0x168] sm:$0xf0]  ;;  %v2362_v1 = vld [vmem:[#allocation5 + $0xa0] sm:$0xf]  ;;  %1136 = vmatpush.bf16.msra.mxu2 %v3403_v49  ;;  %1149 = vmatpush.bf16.msra.mxu3 %v3405_v13  ;;  %v3417_v26 = vor.u32 %v2869_v10, %v2434_v37 }
  0x65   :  { %4841 = vst [vmem:[#allocation94_spill] sm:$0xff] %v3403_v49  ;;  %v2852_v54 = vld [vmem:[#allocation5 + $0xdc] sm:$0xf0]  ;;  %v3419_v53 = vor.u32 %v2861_v24, %v2436_v42  ;;  %v2844_v48 = vld [vmem:[#allocation5 + $0xa4] sm:$0xf] }
  0x66   :  { %4842 = vst [vmem:[#allocation95_spill] sm:$0xff] %v3405_v13  ;;  %v2364_v63 = vld [vmem:[#allocation5 + $0xe0] sm:$0xf0]  ;;  %v2370_v30 = vld [vmem:[#allocation5 + $0xa8] sm:$0xf]  ;;  %v3423_v40 = vor.u32 %v2852_v54, %v2362_v1 }
  0x67   :  { %4843 = vst [vmem:[#allocation96_spill] sm:$0xff] %v3411_v36  ;;  %v2853_v11 = vld [vmem:[#allocation5 + $0xe4] sm:$0xf0]  ;;  %v2845_v20 = vld [vmem:[#allocation5 + $0xac] sm:$0xf]  ;;  %1111 = vmatpush.bf16.msra.mxu0 %v3411_v36  ;;  %1124 = vmatpush.bf16.msra.mxu1 %v3413_v4  ;;  %v3425_v39 = vor.u32 %v2844_v48, %v2364_v63 }
  0x68   :  { %4844 = vst [vmem:[#allocation97_spill] sm:$0xff] %v3413_v4  ;;  %v2372_v15 = vld [vmem:[#allocation5 + $0xe8] sm:$0xf0]  ;;  %v2298_v31 = vld [vmem:[#allocation5 + $0x20] sm:$0xf]  ;;  %1137 = vmatpush.bf16.msra.mxu2 %v3417_v26  ;;  %1150 = vmatpush.bf16.msra.mxu3 %v3419_v53  ;;  %v3429_v24 = vor.u32 %v2853_v11, %v2370_v30 }
  0x69   :  { %4845 = vst [vmem:[#allocation98_spill] sm:$0xff] %v3417_v26  ;;  %v2836_v41 = vld [vmem:[#allocation5 + $0x5c] sm:$0xf0]  ;;  %v2828_v37 = vld [vmem:[#allocation5 + $0x24] sm:$0xf]  ;;  %v3431_v42 = vor.u32 %v2845_v20, %v2372_v15 }
  0x6a   :  { %4846 = vst [vmem:[#allocation99_spill] sm:$0xff] %v3419_v53  ;;  %v2300_v10 = vld [vmem:[#allocation5 + $0x60] sm:$0xf0]  ;;  %v2306_v13 = vld [vmem:[#allocation5 + $0x28] sm:$0xf]  ;;  %v3435_v26 = vor.u32 %v2836_v41, %v2298_v31 }
  0x6b   :  { %4847 = vst [vmem:[#allocation100_spill] sm:$0xff] %v3423_v40  ;;  %v2837_v49 = vld [vmem:[#allocation5 + $0x64] sm:$0xf0]  ;;  %v2829_v36 = vld [vmem:[#allocation5 + $0x2c] sm:$0xf]  ;;  %1112 = vmatpush.bf16.msra.mxu0 %v3423_v40  ;;  %1125 = vmatpush.bf16.msra.mxu1 %v3425_v39  ;;  %v3437_v53 = vor.u32 %v2828_v37, %v2300_v10 }
  0x6c   :  { %4848 = vst [vmem:[#allocation101_spill] sm:$0xff] %v3425_v39  ;;  %v2308_v47 = vld [vmem:[#allocation5 + $0x68] sm:$0xf0]  ;;  %v2762_v4 = vld [vmem:[#allocation5 + $0x3b0] sm:$0xf]  ;;  %1138 = vmatpush.bf16.msra.mxu2 %v3429_v24  ;;  %1151 = vmatpush.bf16.msra.mxu3 %v3431_v42  ;;  %v3441_v15 = vor.u32 %v2837_v49, %v2306_v13 }
  0x6d   :  { %4849 = vst [vmem:[#allocation102_spill] sm:$0xff] %v3429_v24  ;;  %v2950_v1 = vld [vmem:[#allocation5 + $0x3ec] sm:$0xf0]  ;;  %v2942_v54 = vld [vmem:[#allocation5 + $0x3b4] sm:$0xf]  ;;  %v3443_v22 = vor.u32 %v2829_v36, %v2308_v47 }
  0x6e   :  { %4850 = vst [vmem:[#allocation103_spill] sm:$0xff] %v3431_v42  ;;  %v2764_v48 = vld [vmem:[#allocation5 + $0x3f0] sm:$0xf0]  ;;  %v2770_v63 = vld [vmem:[#allocation5 + $0x3b8] sm:$0xf]  ;;  %v3445_v19 = vor.u32 %v2950_v1, %v2762_v4 }
  0x6f   :  { %4851 = vst [vmem:[#allocation104_spill] sm:$0xff] %v3435_v26  ;;  %v2951_v30 = vld [vmem:[#allocation5 + $0x3f4] sm:$0xf0]  ;;  %v2943_v20 = vld [vmem:[#allocation5 + $0x3bc] sm:$0xf]  ;;  %v3447_v40 = vor.u32 %v2942_v54, %v2764_v48  ;;  %1113 = vmatpush.bf16.msra.mxu0 %v3435_v26  ;;  %1126 = vmatpush.bf16.msra.mxu1 %v3437_v53 }
  0x70   :  { %4852 = vst [vmem:[#allocation105_spill] sm:$0xff] %v3437_v53  ;;  %v2772_v11 = vld [vmem:[#allocation5 + $0x3f8] sm:$0xf0]  ;;  %v2698_v39 = vld [vmem:[#allocation5 + $0x330] sm:$0xf]  ;;  %v3449_v41 = vor.u32 %v2951_v30, %v2770_v63  ;;  %1139 = vmatpush.bf16.msra.mxu2 %v3441_v15  ;;  %1152 = vmatpush.bf16.msra.mxu3 %v3443_v22 }
  0x71   :  { %4853 = vst [vmem:[#allocation106_spill] sm:$0xff] %v3441_v15  ;;  %v2934_v31 = vld [vmem:[#allocation5 + $0x36c] sm:$0xf0]  ;;  %v3451_v37 = vor.u32 %v2943_v20, %v2772_v11  ;;  %v2926_v10 = vld [vmem:[#allocation5 + $0x334] sm:$0xf] }
  0x72   :  { %4854 = vst [vmem:[#allocation107_spill] sm:$0xff] %v3443_v22  ;;  %v2700_v18 = vld [vmem:[#allocation5 + $0x370] sm:$0xf0]  ;;  %v2706_v32 = vld [vmem:[#allocation5 + $0x338] sm:$0xf]  ;;  %v3459_v36 = vor.u32 %v2934_v31, %v2698_v39  ;;  %1114 = vmatmul.bf16.vlgmr.msra.gmra.mxu0 %v3323_v0  ;;  %1127 = vmatmul.bf16.vlgmr.msra.gmra.mxu1 %v3323_v0 }
  0x73   :  { %4855 = vst [vmem:[#allocation108_spill] sm:$0xff] %v3445_v19  ;;  %v2935_v49 = vld [vmem:[#allocation5 + $0x374] sm:$0xf0]  ;;  %v2927_v47 = vld [vmem:[#allocation5 + $0x33c] sm:$0xf]  ;;  %1158 = vmatpush.bf16.msrb.mxu0 %v3445_v19  ;;  %1171 = vmatpush.bf16.msrb.mxu1 %v3447_v40  ;;  %v3461_v4 = vor.u32 %v2926_v10, %v2700_v18 }
  0x74   :  { %4856 = vst [vmem:[#allocation109_spill] sm:$0xff] %v3447_v40  ;;  %v2708_v13 = vld [vmem:[#allocation5 + $0x378] sm:$0xf0]  ;;  %v2634_v1 = vld [vmem:[#allocation5 + $0x2b0] sm:$0xf]  ;;  %1184 = vmatpush.bf16.msrb.mxu2 %v3449_v41  ;;  %1197 = vmatpush.bf16.msrb.mxu3 %v3451_v37  ;;  %v3465_v48 = vor.u32 %v2935_v49, %v2706_v32 }
  0x75   :  { %4857 = vst [vmem:[#allocation110_spill] sm:$0xff] %v3449_v41  ;;  %v2918_v54 = vld [vmem:[#allocation5 + $0x2ec] sm:$0xf0]  ;;  %v3467_v63 = vor.u32 %v2927_v47, %v2708_v13  ;;  %v2910_v30 = vld [vmem:[#allocation5 + $0x2b4] sm:$0xf]  ;;  %1140 = vmatmul.bf16.vlgmr.msra.gmra.mxu2 %v3323_v0  ;;  %1153 = vmatmul.bf16.vlgmr.msra.gmra.mxu3 %v3323_v0 }
  0x76   :  { %4858 = vst [vmem:[#allocation111_spill] sm:$0xff] %v3451_v37  ;;  %v2636_v20 = vld [vmem:[#allocation5 + $0x2f0] sm:$0xf0]  ;;  %v2642_v11 = vld [vmem:[#allocation5 + $0x2b8] sm:$0xf]  ;;  %v3475_v18 = vor.u32 %v2918_v54, %v2634_v1 }
  0x77   :  { %4859 = vst [vmem:[#allocation112_spill] sm:$0xff] %v3459_v36  ;;  %v2919_v19 = vld [vmem:[#allocation5 + $0x2f4] sm:$0xf0]  ;;  %v2911_v22 = vld [vmem:[#allocation5 + $0x2bc] sm:$0xf]  ;;  %1159 = vmatpush.bf16.msrb.mxu0 %v3459_v36  ;;  %1172 = vmatpush.bf16.msrb.mxu1 %v3461_v4  ;;  %v3477_v32 = vor.u32 %v2910_v30, %v2636_v20 }
  0x78   :  { %4860 = vst [vmem:[#allocation113_spill] sm:$0xff] %v3461_v4  ;;  %v2644_v40 = vld [vmem:[#allocation5 + $0x2f8] sm:$0xf0]  ;;  %v2570_v39 = vld [vmem:[#allocation5 + $0x230] sm:$0xf]  ;;  %1185 = vmatpush.bf16.msrb.mxu2 %v3465_v48  ;;  %1198 = vmatpush.bf16.msrb.mxu3 %v3467_v63  ;;  %v3481_v10 = vor.u32 %v2919_v19, %v2642_v11 }
  0x79   :  { %4861 = vst [vmem:[#allocation114_spill] sm:$0xff] %v3465_v48  ;;  %v2902_v31 = vld [vmem:[#allocation5 + $0x26c] sm:$0xf0]  ;;  %v3483_v49 = vor.u32 %v2911_v22, %v2644_v40  ;;  %v2894_v47 = vld [vmem:[#allocation5 + $0x234] sm:$0xf] }
  0x7a   :  { %4862 = vst [vmem:[#allocation115_spill] sm:$0xff] %v3467_v63  ;;  %v2572_v13 = vld [vmem:[#allocation5 + $0x270] sm:$0xf0]  ;;  %v2578_v37 = vld [vmem:[#allocation5 + $0x238] sm:$0xf]  ;;  %v3487_v1 = vor.u32 %v2902_v31, %v2570_v39 }
  0x7b   :  { %4863 = vst [vmem:[#allocation116_spill] sm:$0xff] %v3475_v18  ;;  %v2903_v36 = vld [vmem:[#allocation5 + $0x274] sm:$0xf0]  ;;  %v2895_v41 = vld [vmem:[#allocation5 + $0x23c] sm:$0xf]  ;;  %1160 = vmatpush.bf16.msrb.mxu0 %v3475_v18  ;;  %1173 = vmatpush.bf16.msrb.mxu1 %v3477_v32  ;;  %v3489_v54 = vor.u32 %v2894_v47, %v2572_v13 }
  0x7c   :  { %4864 = vst [vmem:[#allocation117_spill] sm:$0xff] %v3477_v32  ;;  %v2580_v4 = vld [vmem:[#allocation5 + $0x278] sm:$0xf0]  ;;  %v2506_v30 = vld [vmem:[#allocation5 + $0x1b0] sm:$0xf]  ;;  %1186 = vmatpush.bf16.msrb.mxu2 %v3481_v10  ;;  %1199 = vmatpush.bf16.msrb.mxu3 %v3483_v49  ;;  %v3493_v19 = vor.u32 %v2903_v36, %v2578_v37 }
  0x7d   :  { %4865 = vst [vmem:[#allocation118_spill] sm:$0xff] %v3481_v10  ;;  %v2886_v20 = vld [vmem:[#allocation5 + $0x1ec] sm:$0xf0]  ;;  %v3495_v22 = vor.u32 %v2895_v41, %v2580_v4  ;;  %v2878_v40 = vld [vmem:[#allocation5 + $0x1b4] sm:$0xf] }
  0x7e   :  { %4866 = vst [vmem:[#allocation119_spill] sm:$0xff] %v3483_v49  ;;  %v2508_v11 = vld [vmem:[#allocation5 + $0x1f0] sm:$0xf0]  ;;  %v2514_v63 = vld [vmem:[#allocation5 + $0x1b8] sm:$0xf]  ;;  %v3499_v39 = vor.u32 %v2886_v20, %v2506_v30 }
  0x7f   :  { %4867 = vst [vmem:[#allocation120_spill] sm:$0xff] %v3487_v1  ;;  %v2887_v18 = vld [vmem:[#allocation5 + $0x1f4] sm:$0xf0]  ;;  %v2879_v48 = vld [vmem:[#allocation5 + $0x1bc] sm:$0xf]  ;;  %1161 = vmatpush.bf16.msrb.mxu0 %v3487_v1  ;;  %1174 = vmatpush.bf16.msrb.mxu1 %v3489_v54  ;;  %v3501_v31 = vor.u32 %v2878_v40, %v2508_v11 }
  0x80   :  { %4868 = vst [vmem:[#allocation121_spill] sm:$0xff] %v3489_v54  ;;  %v2516_v32 = vld [vmem:[#allocation5 + $0x1f8] sm:$0xf0]  ;;  %v2442_v47 = vld [vmem:[#allocation5 + $0x130] sm:$0xf]  ;;  %1187 = vmatpush.bf16.msrb.mxu2 %v3493_v19  ;;  %1200 = vmatpush.bf16.msrb.mxu3 %v3495_v22  ;;  %v3505_v41 = vor.u32 %v2887_v18, %v2514_v63 }
  0x81   :  { %4869 = vst [vmem:[#allocation122_spill] sm:$0xff] %v3493_v19  ;;  %v2870_v13 = vld [vmem:[#allocation5 + $0x16c] sm:$0xf0]  ;;  %v3507_v37 = vor.u32 %v2879_v48, %v2516_v32  ;;  %v2862_v36 = vld [vmem:[#allocation5 + $0x134] sm:$0xf] }
  0x82   :  { %4870 = vst [vmem:[#allocation123_spill] sm:$0xff] %v3495_v22  ;;  %v2444_v4 = vld [vmem:[#allocation5 + $0x170] sm:$0xf0]  ;;  %v2450_v49 = vld [vmem:[#allocation5 + $0x138] sm:$0xf]  ;;  %v3511_v30 = vor.u32 %v2870_v13, %v2442_v47 }
  0x83   :  { %4871 = vst [vmem:[#allocation124_spill] sm:$0xff] %v3499_v39  ;;  %v2871_v1 = vld [vmem:[#allocation5 + $0x174] sm:$0xf0]  ;;  %v2863_v10 = vld [vmem:[#allocation5 + $0x13c] sm:$0xf]  ;;  %1162 = vmatpush.bf16.msrb.mxu0 %v3499_v39  ;;  %1175 = vmatpush.bf16.msrb.mxu1 %v3501_v31  ;;  %v3513_v20 = vor.u32 %v2862_v36, %v2444_v4 }
  0x84   :  { %4872 = vst [vmem:[#allocation125_spill] sm:$0xff] %v3501_v31  ;;  %v2452_v54 = vld [vmem:[#allocation5 + $0x178] sm:$0xf0]  ;;  %v2378_v40 = vld [vmem:[#allocation5 + $0xb0] sm:$0xf]  ;;  %1188 = vmatpush.bf16.msrb.mxu2 %v3505_v41  ;;  %1201 = vmatpush.bf16.msrb.mxu3 %v3507_v37  ;;  %v3517_v48 = vor.u32 %v2871_v1, %v2450_v49 }
  0x85   :  { %4873 = vst [vmem:[#allocation126_spill] sm:$0xff] %v3505_v41  ;;  %v2854_v11 = vld [vmem:[#allocation5 + $0xec] sm:$0xf0]  ;;  %v3519_v63 = vor.u32 %v2863_v10, %v2452_v54  ;;  %v2846_v18 = vld [vmem:[#allocation5 + $0xb4] sm:$0xf] }
  0x86   :  { %4874 = vst [vmem:[#allocation127_spill] sm:$0xff] %v3507_v37  ;;  %v2380_v32 = vld [vmem:[#allocation5 + $0xf0] sm:$0xf0]  ;;  %v2386_v22 = vld [vmem:[#allocation5 + $0xb8] sm:$0xf]  ;;  %v3523_v47 = vor.u32 %v2854_v11, %v2378_v40 }
  0x87   :  { %4875 = vst [vmem:[#allocation128_spill] sm:$0xff] %v3511_v30  ;;  %v2855_v39 = vld [vmem:[#allocation5 + $0xf4] sm:$0xf0]  ;;  %v2847_v19 = vld [vmem:[#allocation5 + $0xbc] sm:$0xf]  ;;  %1163 = vmatpush.bf16.msrb.mxu0 %v3511_v30  ;;  %1176 = vmatpush.bf16.msrb.mxu1 %v3513_v20  ;;  %v3525_v13 = vor.u32 %v2846_v18, %v2380_v32  ;;  %v4887_v32 = vld [vmem:[#allocation52_spill] sm:$0xff] }
  0x88   :  { %4876 = vst [vmem:[#allocation129_spill] sm:$0xff] %v3513_v20  ;;  %v2388_v31 = vld [vmem:[#allocation5 + $0xf8] sm:$0xf0]  ;;  %v2314_v36 = vld [vmem:[#allocation5 + $0x30] sm:$0xf]  ;;  %1189 = vmatpush.bf16.msrb.mxu2 %v3517_v48  ;;  %1202 = vmatpush.bf16.msrb.mxu3 %v3519_v63  ;;  %v3529_v10 = vor.u32 %v2855_v39, %v2386_v22 }
  0x89   :  { %v2838_v4 = vld [vmem:[#allocation5 + $0x6c] sm:$0xf0]  ;;  %v3531_v49 = vor.u32 %v2847_v19, %v2388_v31  ;;  %v2830_v1 = vld [vmem:[#allocation5 + $0x34] sm:$0xf]  ;;  %v2322_v37 = vld [vmem:[#allocation5 + $0x38] sm:$0xf] }
  0x8a   :  { %v2316_v54 = vld [vmem:[#allocation5 + $0x70] sm:$0xf0]  ;;  %v2839_v30 = vld [vmem:[#allocation5 + $0x74] sm:$0xf0]  ;;  %v2831_v41 = vld [vmem:[#allocation5 + $0x3c] sm:$0xf]  ;;  %v3535_v40 = vor.u32 %v2838_v4, %v2314_v36 }
  0x8b   :  { %v2324_v20 = vld [vmem:[#allocation5 + $0x78] sm:$0xf0]  ;;  %1164 = vmatpush.bf16.msrb.mxu0 %v3523_v47  ;;  %1177 = vmatpush.bf16.msrb.mxu1 %v3525_v13  ;;  %v3537_v11 = vor.u32 %v2830_v1, %v2316_v54  ;;  %v3541_v19 = vor.u32 %v2839_v30, %v2322_v37  ;;  %v4881_v31 = vld [vmem:[#allocation46_spill] sm:$0xff]  ;;  %v4883_v37 = vld [vmem:[#allocation48_spill] sm:$0xff] }
  0x8c   :  { %1190 = vmatpush.bf16.msrb.mxu2 %v3529_v10  ;;  %1203 = vmatpush.bf16.msrb.mxu3 %v3531_v49  ;;  %v3543_v22 = vor.u32 %v2831_v41, %v2324_v20  ;;  %v4880_v39 = vld [vmem:[#allocation63_spill] sm:$0xff]  ;;  %v4884_v30 = vld [vmem:[#allocation49_spill] sm:$0xff]  ;;  %v4885_v20 = vld [vmem:[#allocation50_spill] sm:$0xff] }
  0x8d   :  { %4877 = vst [vmem:[#allocation130_spill] sm:$0xff] %v3537_v11  ;;  %v4882_v41 = vld [vmem:[#allocation47_spill] sm:$0xff]  ;;  %v4888_v36 = vld [vmem:[#allocation53_spill] sm:$0xff]  ;;  %v4889_v4 = vld [vmem:[#allocation54_spill] sm:$0xff] }
  0x8e   :  { %4878 = vst [vmem:[#allocation131_spill] sm:$0xff] %v3541_v19  ;;  %v4886_v18 = vld [vmem:[#allocation51_spill] sm:$0xff]  ;;  %v4891_v54 = vld [vmem:[#allocation56_spill] sm:$0xff] }
  0x8f   :  { %4879 = vst [vmem:[#allocation132_spill] sm:$0xff] %v3543_v22  ;;  %1165 = vmatpush.bf16.msrb.mxu0 %v3535_v40  ;;  %1178 = vmatpush.bf16.msrb.mxu1 %v3537_v11  ;;  %v4890_v1 = vld [vmem:[#allocation55_spill] sm:$0xff] }
  0x90   :  { %1191 = vmatpush.bf16.msrb.mxu2 %v3541_v19  ;;  %1204 = vmatpush.bf16.msrb.mxu3 %v3543_v22 }
  0x92   :  { %1166 = vmatmul.bf16.vlgmr.msrb.gmra.mxu0 %v3323_v0  ;;  %1179 = vmatmul.bf16.vlgmr.msrb.gmra.mxu1 %v3323_v0 }
  0x93   :  { %1210 = vmatpush.bf16.msra.mxu0 %v3144_v3  ;;  %1223 = vmatpush.bf16.msra.mxu1 %v3146_v7 }
  0x94   :  { %1236 = vmatpush.bf16.msra.mxu2 %v3148_v8  ;;  %1249 = vmatpush.bf16.msra.mxu3 %v3151_v12 }
  0x95   :  { %1192 = vmatmul.bf16.vlgmr.msrb.gmra.mxu2 %v3323_v0  ;;  %1205 = vmatmul.bf16.vlgmr.msrb.gmra.mxu3 %v3323_v0 }
  0x97   :  { %1211 = vmatpush.bf16.msra.mxu0 %v3155_v16  ;;  %1224 = vmatpush.bf16.msra.mxu1 %v3157_v17 }
  0x98   :  { %1237 = vmatpush.bf16.msra.mxu2 %v3160_v21  ;;  %1250 = vmatpush.bf16.msra.mxu3 %v3162_v25 }
  0x9b   :  { %1212 = vmatpush.bf16.msra.mxu0 %v3165_v29  ;;  %1225 = vmatpush.bf16.msra.mxu1 %v3169_v33 }
  0x9c   :  { %1238 = vmatpush.bf16.msra.mxu2 %v3171_v34  ;;  %1251 = vmatpush.bf16.msra.mxu3 %v3174_v38 }
  0x9f   :  { %1213 = vmatpush.bf16.msra.mxu0 %v3177_v44  ;;  %1226 = vmatpush.bf16.msra.mxu1 %v3181_v45 }
  0xa0   :  { %1239 = vmatpush.bf16.msra.mxu2 %v3183_v46  ;;  %1252 = vmatpush.bf16.msra.mxu3 %v3186_v50 }
  0xa3   :  { %1214 = vmatpush.bf16.msra.mxu0 %v3189_v56  ;;  %1227 = vmatpush.bf16.msra.mxu1 %v3193_v57 }
  0xa4   :  { %1240 = vmatpush.bf16.msra.mxu2 %v3195_v58  ;;  %1253 = vmatpush.bf16.msra.mxu3 %v3198_v62 }
  0xa7   :  { %1215 = vmatpush.bf16.msra.mxu0 %v3201_v5  ;;  %1228 = vmatpush.bf16.msra.mxu1 %v3205_v6 }
  0xa8   :  { %1241 = vmatpush.bf16.msra.mxu2 %v3207_v9  ;;  %1254 = vmatpush.bf16.msra.mxu3 %v3210_v14 }
  0xab   :  { %1216 = vmatpush.bf16.msra.mxu0 %v3213_v23  ;;  %1229 = vmatpush.bf16.msra.mxu1 %v3217_v27 }
  0xac   :  { %1242 = vmatpush.bf16.msra.mxu2 %v3219_v28  ;;  %1255 = vmatpush.bf16.msra.mxu3 %v3222_v35 }
  0xaf   :  { %1217 = vmatpush.bf16.msra.mxu0 %v3225_v43  ;;  %1230 = vmatpush.bf16.msra.mxu1 %v3229_v51 }
  0xb0   :  { %1243 = vmatpush.bf16.msra.mxu2 %v3231_v52  ;;  %1256 = vmatpush.bf16.msra.mxu3 %v3234_v55 }
  0xb2   :  { %1218 = vmatmul.bf16.vlgmr.msra.gmra.mxu0 %v4880_v39  ;;  %1231 = vmatmul.bf16.vlgmr.msra.gmra.mxu1 %v4880_v39 }
  0xb3   :  { %1262 = vmatpush.bf16.msrb.mxu0 %v3236_v59  ;;  %1275 = vmatpush.bf16.msrb.mxu1 %v3238_v60 }
  0xb4   :  { %1288 = vmatpush.bf16.msrb.mxu2 %v3240_v61  ;;  %1301 = vmatpush.bf16.msrb.mxu3 %v3243_v2  ;;  %v4925_v2 = vld [vmem:[#allocation88_spill] sm:$0xff]  ;;  %v4927_v61 = vld [vmem:[#allocation90_spill] sm:$0xff] }
  0xb5   :  { %1244 = vmatmul.bf16.vlgmr.msra.gmra.mxu2 %v4880_v39  ;;  %1257 = vmatmul.bf16.vlgmr.msra.gmra.mxu3 %v4880_v39 }
  0xb7   :  { %1263 = vmatpush.bf16.msrb.mxu0 %v4881_v31  ;;  %1276 = vmatpush.bf16.msrb.mxu1 %v4882_v41  ;;  %v4892_v31 = vld [vmem:[#allocation57_spill] sm:$0xff]  ;;  %v4893_v41 = vld [vmem:[#allocation58_spill] sm:$0xff] }
  0xb8   :  { %1289 = vmatpush.bf16.msrb.mxu2 %v4883_v37  ;;  %1302 = vmatpush.bf16.msrb.mxu3 %v4884_v30  ;;  %v4894_v37 = vld [vmem:[#allocation59_spill] sm:$0xff]  ;;  %v4895_v30 = vld [vmem:[#allocation60_spill] sm:$0xff] }
  0xbb   :  { %1264 = vmatpush.bf16.msrb.mxu0 %v4885_v20  ;;  %1277 = vmatpush.bf16.msrb.mxu1 %v4886_v18  ;;  %v4896_v20 = vld [vmem:[#allocation61_spill] sm:$0xff]  ;;  %v4897_v18 = vld [vmem:[#allocation62_spill] sm:$0xff] }
  0xbc   :  { %1290 = vmatpush.bf16.msrb.mxu2 %v4887_v32  ;;  %1303 = vmatpush.bf16.msrb.mxu3 %v4888_v36  ;;  %v4898_v32 = vld [vmem:[#allocation64_spill] sm:$0xff]  ;;  %v4899_v36 = vld [vmem:[#allocation65_spill] sm:$0xff] }
  0xbf   :  { %1265 = vmatpush.bf16.msrb.mxu0 %v4889_v4  ;;  %1278 = vmatpush.bf16.msrb.mxu1 %v4890_v1  ;;  %v4900_v4 = vld [vmem:[#allocation66_spill] sm:$0xff]  ;;  %v4901_v1 = vld [vmem:[#allocation68_spill] sm:$0xff] }
  0xc0   :  { %1291 = vmatpush.bf16.msrb.mxu2 %v4891_v54  ;;  %1304 = vmatpush.bf16.msrb.mxu3 %v4892_v31  ;;  %v4902_v54 = vld [vmem:[#allocation69_spill] sm:$0xff]  ;;  %v4903_v31 = vld [vmem:[#allocation70_spill] sm:$0xff] }
  0xc3   :  { %1266 = vmatpush.bf16.msrb.mxu0 %v4893_v41  ;;  %1279 = vmatpush.bf16.msrb.mxu1 %v4894_v37  ;;  %v4904_v41 = vld [vmem:[#allocation71_spill] sm:$0xff]  ;;  %v4905_v37 = vld [vmem:[#allocation72_spill] sm:$0xff] }
  0xc4   :  { %1292 = vmatpush.bf16.msrb.mxu2 %v4895_v30  ;;  %1305 = vmatpush.bf16.msrb.mxu3 %v4896_v20  ;;  %v4906_v30 = vld [vmem:[#allocation73_spill] sm:$0xff]  ;;  %v4907_v20 = vld [vmem:[#allocation74_spill] sm:$0xff] }
  0xc7   :  { %1267 = vmatpush.bf16.msrb.mxu0 %v4897_v18  ;;  %1280 = vmatpush.bf16.msrb.mxu1 %v4898_v32  ;;  %v4908_v18 = vld [vmem:[#allocation75_spill] sm:$0xff]  ;;  %v4909_v32 = vld [vmem:[#allocation76_spill] sm:$0xff] }
  0xc8   :  { %1293 = vmatpush.bf16.msrb.mxu2 %v4899_v36  ;;  %1306 = vmatpush.bf16.msrb.mxu3 %v4900_v4  ;;  %v4910_v36 = vld [vmem:[#allocation77_spill] sm:$0xff]  ;;  %v4911_v4 = vld [vmem:[#allocation78_spill] sm:$0xff] }
  0xcb   :  { %1268 = vmatpush.bf16.msrb.mxu0 %v4901_v1  ;;  %1281 = vmatpush.bf16.msrb.mxu1 %v4902_v54  ;;  %v4912_v1 = vld [vmem:[#allocation79_spill] sm:$0xff]  ;;  %v3625_v54 = vpop.f32.mrf.mxu0 }
  0xcc   :  { %1294 = vmatpush.bf16.msrb.mxu2 %v4903_v31  ;;  %1307 = vmatpush.bf16.msrb.mxu3 %v4904_v41  ;;  %4913 = vst [vmem:[#allocation63_spill] sm:$0xff] %v3625_v54  ;;  %v3627_v31 = vpop.f32.mrf.mxu1  ;;  %v4920_v54 = vld [vmem:[#allocation83_spill] sm:$0xff] }
  0xcd   :  { %4914 = vst [vmem:[#allocation133_spill] sm:$0xff] %v3627_v31  ;;  %v4921_v31 = vld [vmem:[#allocation84_spill] sm:$0xff] }
  0xcf   :  { %1269 = vmatpush.bf16.msrb.mxu0 %v4905_v37  ;;  %1282 = vmatpush.bf16.msrb.mxu1 %v4906_v30  ;;  %v4923_v30 = vld [vmem:[#allocation86_spill] sm:$0xff]  ;;  %v4924_v37 = vld [vmem:[#allocation87_spill] sm:$0xff] }
  0xd0   :  { %1295 = vmatpush.bf16.msrb.mxu2 %v4907_v20  ;;  %1308 = vmatpush.bf16.msrb.mxu3 %v4908_v18  ;;  %v4915_v18 = vld [vmem:[#allocation80_spill] sm:$0xff]  ;;  %v4922_v20 = vld [vmem:[#allocation85_spill] sm:$0xff] }
  0xd2   :  { %1270 = vmatmul.bf16.vlgmr.msrb.gmra.mxu0 %v4880_v39  ;;  %1283 = vmatmul.bf16.vlgmr.msrb.gmra.mxu1 %v4880_v39 }
  0xd3   :  { %1314 = vmatpush.bf16.msra.mxu0 %v4909_v32  ;;  %1327 = vmatpush.bf16.msra.mxu1 %v4910_v36  ;;  %v4916_v32 = vld [vmem:[#allocation81_spill] sm:$0xff]  ;;  %v3635_v36 = vpop.f32.mrf.mxu2  ;;  %v1013_v41 = vpop.f32.mrf.mxu0 }
  0xd4   :  { %1340 = vmatpush.bf16.msra.mxu2 %v4911_v4  ;;  %1353 = vmatpush.bf16.msra.mxu3 %v4912_v1  ;;  %4917 = vst [vmem:[#allocation134_spill] sm:$0xff] %v3635_v36  ;;  %v3637_v4 = vpop.f32.mrf.mxu3  ;;  %v4919_v1 = vld [vmem:[#allocation82_spill] sm:$0xff] }
  0xd5   :  { %1296 = vmatmul.bf16.vlgmr.msrb.gmra.mxu2 %v4880_v39  ;;  %1309 = vmatmul.bf16.vlgmr.msrb.gmra.mxu3 %v4880_v39  ;;  %4918 = vst [vmem:[#allocation135_spill] sm:$0xff] %v3637_v4 }
  0xd7   :  { %1315 = vmatpush.bf16.msra.mxu0 %v4915_v18  ;;  %1328 = vmatpush.bf16.msra.mxu1 %v4916_v32  ;;  %v1026_v18 = vpop.f32.mrf.mxu1  ;;  %v4926_v32 = vld [vmem:[#allocation89_spill] sm:$0xff] }
  0xd8   :  { %1341 = vmatpush.bf16.msra.mxu2 %v4919_v1  ;;  %1354 = vmatpush.bf16.msra.mxu3 %v4920_v54  ;;  %v4928_v1 = vld [vmem:[#allocation91_spill] sm:$0xff]  ;;  %v4929_v54 = vld [vmem:[#allocation92_spill] sm:$0xff] }
  0xdb   :  { %1316 = vmatpush.bf16.msra.mxu0 %v4921_v31  ;;  %1329 = vmatpush.bf16.msra.mxu1 %v4922_v20  ;;  %v1039_v36 = vpop.f32.mrf.mxu2  ;;  %v4930_v31 = vld [vmem:[#allocation93_spill] sm:$0xff]  ;;  %v4931_v20 = vld [vmem:[#allocation94_spill] sm:$0xff]  ;;  %v3653_v41 = vpop.f32.mrf.mxu0 }
  0xdc   :  { %1342 = vmatpush.bf16.msra.mxu2 %v4923_v30  ;;  %1355 = vmatpush.bf16.msra.mxu3 %v4924_v37  ;;  %v1052_v4 = vpop.f32.mrf.mxu3  ;;  %v4932_v30 = vld [vmem:[#allocation95_spill] sm:$0xff]  ;;  %4933 = vst [vmem:[#allocation87_spill] sm:$0xff] %v3653_v41  ;;  %v4936_v36 = vld [vmem:[#allocation97_spill] sm:$0xff] }
  0xdd   :  { %v4937_v4 = vld [vmem:[#allocation98_spill] sm:$0xff] }
  0xdf   :  { %1317 = vmatpush.bf16.msra.mxu0 %v4925_v2  ;;  %1330 = vmatpush.bf16.msra.mxu1 %v4926_v32  ;;  %v3655_v18 = vpop.f32.mrf.mxu1  ;;  %v4935_v2 = vld [vmem:[#allocation96_spill] sm:$0xff] }
  0xe0   :  { %1343 = vmatpush.bf16.msra.mxu2 %v4927_v61  ;;  %1356 = vmatpush.bf16.msra.mxu3 %v4928_v1  ;;  %4934 = vst [vmem:[#allocation89_spill] sm:$0xff] %v3655_v18  ;;  %v4938_v61 = vld [vmem:[#allocation99_spill] sm:$0xff] }
  0xe3   :  { %1318 = vmatpush.bf16.msra.mxu0 %v4929_v54  ;;  %1331 = vmatpush.bf16.msra.mxu1 %v4930_v31  ;;  %v3661_v1 = vpop.f32.mrf.mxu2  ;;  %v4941_v31 = vld [vmem:[#allocation100_spill] sm:$0xff]  ;;  %v1065_v18 = vpop.f32.mrf.mxu0 }
  0xe4   :  { %1344 = vmatpush.bf16.msra.mxu2 %v4931_v20  ;;  %1357 = vmatpush.bf16.msra.mxu3 %v4932_v30  ;;  %4939 = vst [vmem:[#allocation95_spill] sm:$0xff] %v3661_v1  ;;  %v3663_v54 = vpop.f32.mrf.mxu3  ;;  %v4942_v20 = vld [vmem:[#allocation101_spill] sm:$0xff]  ;;  %v4951_v18 = vld [vmem:[#allocation115_spill] sm:$0xff] }
  0xe5   :  { %4940 = vst [vmem:[#allocation96_spill] sm:$0xff] %v3663_v54 }
  0xe7   :  { %1319 = vmatpush.bf16.msra.mxu0 %v4935_v2  ;;  %1332 = vmatpush.bf16.msra.mxu1 %v4936_v36  ;;  %v1078_v41 = vpop.f32.mrf.mxu1 }
  0xe8   :  { %1345 = vmatpush.bf16.msra.mxu2 %v4937_v4  ;;  %1358 = vmatpush.bf16.msra.mxu3 %v4938_v61  ;;  %v4943_v61 = vld [vmem:[#allocation107_spill] sm:$0xff]  ;;  %v4944_v4 = vld [vmem:[#allocation108_spill] sm:$0xff] }
  0xe9   :  { %v4948_v41 = vld [vmem:[#allocation112_spill] sm:$0xff] }
  0xeb   :  { %1320 = vmatpush.bf16.msra.mxu0 %v4941_v31  ;;  %1333 = vmatpush.bf16.msra.mxu1 %v4942_v20  ;;  %v1091_v1 = vpop.f32.mrf.mxu2  ;;  %v4945_v31 = vld [vmem:[#allocation109_spill] sm:$0xff]  ;;  %v4946_v20 = vld [vmem:[#allocation110_spill] sm:$0xff] }
  0xec   :  { %1346 = vmatpush.bf16.msra.mxu2 %v3429_v24  ;;  %1359 = vmatpush.bf16.msra.mxu3 %v3431_v42  ;;  %v1104_v54 = vpop.f32.mrf.mxu3  ;;  %v4947_v24 = vld [vmem:[#allocation111_spill] sm:$0xff]  ;;  %v4949_v1 = vld [vmem:[#allocation113_spill] sm:$0xff] }
  0xed   :  { %v4950_v54 = vld [vmem:[#allocation114_spill] sm:$0xff] }
  0xef   :  { %1321 = vmatpush.bf16.msra.mxu0 %v3435_v26  ;;  %1334 = vmatpush.bf16.msra.mxu1 %v3437_v53  ;;  %v4958_v53 = vld [vmem:[#allocation120_spill] sm:$0xff]  ;;  %v4966_v26 = vld [vmem:[#allocation126_spill] sm:$0xff] }
  0xf0   :  { %1347 = vmatpush.bf16.msra.mxu2 %v3441_v15  ;;  %1360 = vmatpush.bf16.msra.mxu3 %v4943_v61  ;;  %v4956_v61 = vld [vmem:[#allocation118_spill] sm:$0xff]  ;;  %v4957_v15 = vld [vmem:[#allocation119_spill] sm:$0xff] }
  0xf2   :  { %1322 = vmatmul.bf16.vlgmr.msra.gmra.mxu0 %v4880_v39  ;;  %1335 = vmatmul.bf16.vlgmr.msra.gmra.mxu1 %v4880_v39 }
  0xf3   :  { %1366 = vmatpush.bf16.msrb.mxu0 %v4944_v4  ;;  %1379 = vmatpush.bf16.msrb.mxu1 %v4945_v31  ;;  %v4952_v31 = vld [vmem:[#allocation116_spill] sm:$0xff]  ;;  %v3689_v4 = vpop.f32.mrf.mxu1 }
  0xf4   :  { %1392 = vmatpush.bf16.msrb.mxu2 %v4946_v20  ;;  %1405 = vmatpush.bf16.msrb.mxu3 %v4947_v24  ;;  %v4953_v20 = vld [vmem:[#allocation117_spill] sm:$0xff]  ;;  %v3687_v24 = vpop.f32.mrf.mxu0  ;;  %4955 = vst [vmem:[#allocation136_spill] sm:$0xff] %v3689_v4 }
  0xf5   :  { %1348 = vmatmul.bf16.vlgmr.msra.gmra.mxu2 %v4880_v39  ;;  %1361 = vmatmul.bf16.vlgmr.msra.gmra.mxu3 %v4880_v39  ;;  %4954 = vst [vmem:[#allocation97_spill] sm:$0xff] %v3687_v24  ;;  %v4965_v24 = vld [vmem:[#allocation125_spill] sm:$0xff] }
  0xf7   :  { %1367 = vmatpush.bf16.msrb.mxu0 %v4948_v41  ;;  %1380 = vmatpush.bf16.msrb.mxu1 %v4949_v1  ;;  %v4959_v41 = vld [vmem:[#allocation121_spill] sm:$0xff]  ;;  %v4960_v1 = vld [vmem:[#allocation122_spill] sm:$0xff] }
  0xf8   :  { %1393 = vmatpush.bf16.msrb.mxu2 %v4950_v54  ;;  %1406 = vmatpush.bf16.msrb.mxu3 %v4951_v18  ;;  %v4961_v54 = vld [vmem:[#allocation123_spill] sm:$0xff]  ;;  %v3697_v18 = vpop.f32.mrf.mxu2 }
  0xf9   :  { %4962 = vst [vmem:[#allocation122_spill] sm:$0xff] %v3697_v18 }
  0xfb   :  { %1368 = vmatpush.bf16.msrb.mxu0 %v4952_v31  ;;  %1381 = vmatpush.bf16.msrb.mxu1 %v4953_v20  ;;  %v3699_v31 = vpop.f32.mrf.mxu3  ;;  %v4964_v20 = vld [vmem:[#allocation124_spill] sm:$0xff] }
  0xfc   :  { %1394 = vmatpush.bf16.msrb.mxu2 %v4956_v61  ;;  %1407 = vmatpush.bf16.msrb.mxu3 %v4957_v15  ;;  %4963 = vst [vmem:[#allocation123_spill] sm:$0xff] %v3699_v31  ;;  %v1117_v4 = vpop.f32.mrf.mxu0  ;;  %v1130_v61 = vpop.f32.mrf.mxu1  ;;  %v4967_v15 = vld [vmem:[#allocation127_spill] sm:$0xff] }
  0xff   :  { %1369 = vmatpush.bf16.msrb.mxu0 %v4958_v53  ;;  %1382 = vmatpush.bf16.msrb.mxu1 %v4959_v41  ;;  %v4968_v53 = vld [vmem:[#allocation128_spill] sm:$0xff]  ;;  %v4969_v41 = vld [vmem:[#allocation129_spill] sm:$0xff] }
 0x100   :  { %1395 = vmatpush.bf16.msrb.mxu2 %v4960_v1  ;;  %1408 = vmatpush.bf16.msrb.mxu3 %v4961_v54  ;;  %v1143_v18 = vpop.f32.mrf.mxu2 }
 0x103   :  { %1370 = vmatpush.bf16.msrb.mxu0 %v4964_v20  ;;  %1383 = vmatpush.bf16.msrb.mxu1 %v4965_v24  ;;  %v1156_v31 = vpop.f32.mrf.mxu3 }
 0x104   :  { %1396 = vmatpush.bf16.msrb.mxu2 %v4966_v26  ;;  %1409 = vmatpush.bf16.msrb.mxu3 %v4967_v15 }
 0x107   :  { %1371 = vmatpush.bf16.msrb.mxu0 %v4968_v53  ;;  %1384 = vmatpush.bf16.msrb.mxu1 %v4969_v41 }
 0x108   :  { %1397 = vmatpush.bf16.msrb.mxu2 %v3517_v48  ;;  %1410 = vmatpush.bf16.msrb.mxu3 %v3519_v63 }
 0x10b   :  { %1372 = vmatpush.bf16.msrb.mxu0 %v3523_v47  ;;  %1385 = vmatpush.bf16.msrb.mxu1 %v3525_v13 }
 0x10c   :  { %1398 = vmatpush.bf16.msrb.mxu2 %v3529_v10  ;;  %1411 = vmatpush.bf16.msrb.mxu3 %v3531_v49 }
 0x10f   :  { %1373 = vmatpush.bf16.msrb.mxu0 %v3535_v40  ;;  %1386 = vmatpush.bf16.msrb.mxu1 %v3537_v11  ;;  %v3729_v61 = vpop.f32.mrf.mxu0  ;;  %v3731_v31 = vpop.f32.mrf.mxu1 }
 0x110   :  { %1399 = vmatpush.bf16.msrb.mxu2 %v3541_v19  ;;  %1412 = vmatpush.bf16.msrb.mxu3 %v3543_v22  ;;  %4970 = vst [vmem:[#allocation124_spill] sm:$0xff] %v3729_v61  ;;  %v360_v61 = vunpack.c.l.bf16 %v3323_v0 }
 0x111   :  { %4971 = vst [vmem:[#allocation125_spill] sm:$0xff] %v3731_v31 }
 0x112   :  { %1374 = vmatmul.bf16.vlgmr.msrb.gmra.mxu0 %v4880_v39  ;;  %1387 = vmatmul.bf16.vlgmr.msrb.gmra.mxu1 %v4880_v39 }
 0x113   :  { %1419 = vmatpush.bf16.msra.mxu0 %v3144_v3  ;;  %1432 = vmatpush.bf16.msra.mxu1 %v3146_v7 }
 0x114   :  { %1445 = vmatpush.bf16.msra.mxu2 %v3148_v8  ;;  %1458 = vmatpush.bf16.msra.mxu3 %v3151_v12 }
 0x115   :  { %1400 = vmatmul.bf16.vlgmr.msrb.gmra.mxu2 %v4880_v39  ;;  %1413 = vmatmul.bf16.vlgmr.msrb.gmra.mxu3 %v4880_v39 }
 0x117   :  { %1420 = vmatpush.bf16.msra.mxu0 %v3155_v16  ;;  %1433 = vmatpush.bf16.msra.mxu1 %v3157_v17  ;;  %v1169_v18 = vpop.f32.mrf.mxu0  ;;  %v1182_v31 = vpop.f32.mrf.mxu1 }
 0x118   :  { %1446 = vmatpush.bf16.msra.mxu2 %v3160_v21  ;;  %1459 = vmatpush.bf16.msra.mxu3 %v3162_v25  ;;  %v3741_v39 = vpop.f32.mrf.mxu2  ;;  %v3743_v4 = vpop.f32.mrf.mxu3  ;;  %v5020_v21 = vld [vmem:[#allocation85_spill] sm:$0xff] }
 0x119   :  { %4972 = vst [vmem:[#allocation126_spill] sm:$0xff] %v3741_v39 }
 0x11a   :  { %4973 = vst [vmem:[#allocation127_spill] sm:$0xff] %v3743_v4  ;;  %v4974_v4 = vld [vmem:[#allocation67_spill] sm:$0xff] }
 0x11b   :  { %1421 = vmatpush.bf16.msra.mxu0 %v3165_v29  ;;  %1434 = vmatpush.bf16.msra.mxu1 %v3169_v33  ;;  %v361_v39 = vsub.f32 %v4974_v4, %v360_v61  ;;  %v4976_v61 = vld [vmem:[#allocation44_spill] sm:$0xff]  ;;  %v4977_v4 = vld [vmem:[#allocation45_spill] sm:$0xff] }
 0x11c   :  { %1447 = vmatpush.bf16.msra.mxu2 %v3171_v34  ;;  %1460 = vmatpush.bf16.msra.mxu3 %v3174_v38  ;;  %v5013_v38 = vld [vmem:[#allocation79_spill] sm:$0xff] }
 0x11d   :  { %v3761_v0 = vpack.c.bf16 %v361_v39, %v361_v39 }
 0x11f   :  { %1422 = vmatpush.bf16.msra.mxu0 %v3177_v44  ;;  %1435 = vmatpush.bf16.msra.mxu1 %v3181_v45  ;;  %v5008_v44 = vld [vmem:[#allocation74_spill] sm:$0xff] }
 0x120   :  { %1448 = vmatpush.bf16.msra.mxu2 %v3183_v46  ;;  %1461 = vmatpush.bf16.msra.mxu3 %v3186_v50  ;;  %v1195_v18 = vpop.f32.mrf.mxu2  ;;  %v1208_v31 = vpop.f32.mrf.mxu3  ;;  %v5006_v50 = vld [vmem:[#allocation72_spill] sm:$0xff]  ;;  %v5007_v46 = vld [vmem:[#allocation73_spill] sm:$0xff] }
 0x121   :  { %v3765_v18 = vld [vmem:[#allocation2] sm:$0xff] }
 0x122   :  { %4975 = vst [vmem:[#allocation128_spill] sm:$0xff] %v3765_v18  ;;  %v3768_v31 = vmul.f32 0.62831855, %v3765_v18 }
 0x123   :  { %1423 = vmatpush.bf16.msra.mxu0 %v3189_v56  ;;  %1436 = vmatpush.bf16.msra.mxu1 %v3193_v57 }
 0x124   :  { %1449 = vmatpush.bf16.msra.mxu2 %v3195_v58  ;;  %1462 = vmatpush.bf16.msra.mxu3 %v3198_v62  ;;  %v198_v39 = vand.u32 2139095040, %v3768_v31  ;;  %vm197_vm12 = vcmp.lt.s32.totalorder %v3768_v31, 0 }
 0x127   :  { %1424 = vmatpush.bf16.msra.mxu0 %v3201_v5  ;;  %1437 = vmatpush.bf16.msra.mxu1 %v3205_v6  ;;  %v4997_v6 = vld [vmem:[#allocation61_spill] sm:$0xff] }
 0x128   :  { %1450 = vmatpush.bf16.msra.mxu2 %v3207_v9  ;;  %1463 = vmatpush.bf16.msra.mxu3 %v3210_v14  ;;  %v4995_v14 = vld [vmem:[#allocation59_spill] sm:$0xff]  ;;  %v3108_v9 = vmov 2475754826  }
 0x12b   :  { %1425 = vmatpush.bf16.msra.mxu0 %v3213_v23  ;;  %1438 = vmatpush.bf16.msra.mxu1 %v3217_v27  ;;  %v4985_v27 = vld [vmem:[#allocation51_spill] sm:$0xff]  ;;  %v4986_v23 = vld [vmem:[#allocation52_spill] sm:$0xff] }
 0x12c   :  { %1451 = vmatpush.bf16.msra.mxu2 %v3219_v28  ;;  %1464 = vmatpush.bf16.msra.mxu3 %v3222_v35  ;;  %v4984_v28 = vld [vmem:[#allocation50_spill] sm:$0xff] }
 0x12f   :  { %1426 = vmatpush.bf16.msra.mxu0 %v3225_v43  ;;  %1439 = vmatpush.bf16.msra.mxu1 %v3229_v51  ;;  %v3783_v51 = vpop.f32.mrf.mxu0  ;;  %v3785_v43 = vpop.f32.mrf.mxu1 }
 0x130   :  { %1452 = vmatpush.bf16.msra.mxu2 %v3231_v52  ;;  %1465 = vmatpush.bf16.msra.mxu3 %v3234_v55  ;;  %v199_v55 = vshrl.u32 %v198_v39, 23  ;;  %v4978_v52 = vld [vmem:[#allocation46_spill] sm:$0xff]  ;;  %4982 = vst [vmem:[#allocation129_spill] sm:$0xff] %v3783_v51  ;;  %v4987_v39 = vld [vmem:[#allocation53_spill] sm:$0xff] }
 0x131   :  { %4983 = vst [vmem:[#allocation67_spill] sm:$0xff] %v3785_v43  ;;  %v4991_v51 = vld [vmem:[#allocation57_spill] sm:$0xff] }
 0x132   :  { %1427 = vmatmul.bf16.vlgmr.msra.gmra.mxu0 %v3761_v0  ;;  %1440 = vmatmul.bf16.vlgmr.msra.gmra.mxu1 %v3761_v0 }
 0x133   :  { %1471 = vmatpush.bf16.msrb.mxu0 %v3236_v59  ;;  %1484 = vmatpush.bf16.msrb.mxu1 %v3238_v60  ;;  %v4979_v59 = vld [vmem:[#allocation47_spill] sm:$0xff]  ;;  %v4980_v60 = vld [vmem:[#allocation48_spill] sm:$0xff] }
 0x134   :  { %1497 = vmatpush.bf16.msrb.mxu2 %v4976_v61  ;;  %1510 = vmatpush.bf16.msrb.mxu3 %v4977_v4  ;;  %v4981_v61 = vld [vmem:[#allocation49_spill] sm:$0xff]  ;;  %v2261_v4 = vadd.s32 4294967169, %v199_v55  ;;  %v4990_v55 = vld [vmem:[#allocation56_spill] sm:$0xff] }
 0x135   :  { %1453 = vmatmul.bf16.vlgmr.msra.gmra.mxu2 %v3761_v0  ;;  %1466 = vmatmul.bf16.vlgmr.msra.gmra.mxu3 %v3761_v0 }
 0x136   :  { %v205_v35 = vadd.s32 1, %v2261_v4 }
 0x137   :  { %1472 = vmatpush.bf16.msrb.mxu0 %v4978_v52  ;;  %1485 = vmatpush.bf16.msrb.mxu1 %v4979_v59  ;;  %v1234_v43 = vpop.f32.mrf.mxu1 }
 0x138   :  { %1498 = vmatpush.bf16.msrb.mxu2 %v4980_v60  ;;  %1511 = vmatpush.bf16.msrb.mxu3 %v4981_v61  ;;  %vm206_vm0 = vcmp.gt.s32.totalorder %v205_v35, 0  ;;  %v4988_v60 = vld [vmem:[#allocation54_spill] sm:$0xff]  ;;  %v4989_v61 = vld [vmem:[#allocation55_spill] sm:$0xff] }
 0x139   :  { %v207_v59 = vsel %vm206_vm0, %v205_v35, 0  ;;  %v4994_v35 = vld [vmem:[#allocation58_spill] sm:$0xff] }
 0x13a   :  { %v209_v52 = vand.u32 31, %v207_v59 }
 0x13b   :  { %1473 = vmatpush.bf16.msrb.mxu0 %v4984_v28  ;;  %1486 = vmatpush.bf16.msrb.mxu1 %v4985_v27  ;;  %v3797_v28 = vpop.f32.mrf.mxu2  ;;  %v3799_v27 = vpop.f32.mrf.mxu3 }
 0x13c   :  { %1499 = vmatpush.bf16.msrb.mxu2 %v4986_v23  ;;  %1512 = vmatpush.bf16.msrb.mxu3 %v4987_v39  ;;  %v3795_v4 = vsub.s32 32, %v209_v52  ;;  %4992 = vst [vmem:[#allocation137_spill] sm:$0xff] %v3797_v28  ;;  %v4716_v23 = vand.u32 2147483647, %v3768_v31  ;;  %v1221_v39 = vpop.f32.mrf.mxu0  ;;  %v215_v43 = vshll.u32 %v3108_v9, %v209_v52 }
 0x13d   :  { %4993 = vst [vmem:[#allocation138_spill] sm:$0xff] %v3799_v27  ;;  %v4996_v27 = vld [vmem:[#allocation60_spill] sm:$0xff]  ;;  %v3109_v39 = vmov 2102212464  }
 0x13e   :  { %v213_v28 = vshrl.u32 %v3108_v9, %v3795_v4  ;;  %v4999_v9 = vld [vmem:[#allocation64_spill] sm:$0xff] }
 0x13f   :  { %1474 = vmatpush.bf16.msrb.mxu0 %v4988_v60  ;;  %1487 = vmatpush.bf16.msrb.mxu1 %v4989_v61  ;;  %v202_v61 = vand.u32 8388607, %v4716_v23 }
 0x140   :  { %1500 = vmatpush.bf16.msrb.mxu2 %v4990_v55  ;;  %1513 = vmatpush.bf16.msrb.mxu3 %v4991_v51  ;;  %v3806_v55 = vshrl.u32 %v207_v59, 5  ;;  %v4719_v51 = vmov 683565275   ;;  %v3110_v59 = vmov 2131351028  }
 0x141   :  { %v212_v60 = vshll.u32 %v4719_v51, %v209_v52  ;;  %v203_v5 = vor.u32 8388608, %v202_v61  ;;  %v216_v23 = vshrl.u32 %v3110_v59, %v3795_v4  ;;  %v218_v58 = vshll.u32 %v3110_v59, %v209_v52  ;;  %v5000_v61 = vld [vmem:[#allocation65_spill] sm:$0xff]  ;;  %v5001_v59 = vld [vmem:[#allocation66_spill] sm:$0xff] }
 0x142   :  { %v3111_v51 = vmov 920167782   ;;  %vm227_vm1 = vcmp.lt.s32.totalorder %v3806_v55, 1  ;;  %vm229_vm2 = vcmp.lt.s32.totalorder %v3806_v55, 3  ;;  %vm230_vm3 = vcmp.lt.s32.totalorder %v3806_v55, 4 }
 0x143   :  { %1475 = vmatpush.bf16.msrb.mxu0 %v4994_v35  ;;  %1488 = vmatpush.bf16.msrb.mxu1 %v4995_v14  ;;  %v219_v35 = vshrl.u32 %v3109_v39, %v3795_v4  ;;  %v221_v14 = vshll.u32 %v3109_v39, %v209_v52  ;;  %v3813_v62 = vor.u32 %v213_v28, %v212_v60  ;;  %v3112_v28 = vmov 1326507024  }
 0x144   :  { %1501 = vmatpush.bf16.msrb.mxu2 %v4996_v27  ;;  %1514 = vmatpush.bf16.msrb.mxu3 %v4997_v6  ;;  %v222_v57 = vshrl.u32 %v3111_v51, %v3795_v4  ;;  %v224_v56 = vshll.u32 %v3111_v51, %v209_v52  ;;  %v4998_v27 = vld [vmem:[#allocation62_spill] sm:$0xff]  ;;  %v3820_v6 = vor.u32 %v216_v23, %v215_v43  ;;  %v3829_v51 = vshll.u32 %v203_v5, 8  ;;  %v1247_v52 = vpop.f32.mrf.mxu2  ;;  %v5002_v5 = vld [vmem:[#allocation68_spill] sm:$0xff] }
 0x145   :  { %v3822_v39 = vor.u32 %v219_v35, %v218_v58  ;;  %v225_v60 = vshrl.u32 %v3112_v28, %v3795_v4  ;;  %vm228_vm4 = vcmp.lt.s32.totalorder %v3806_v55, 2  ;;  %v5005_v52 = vld [vmem:[#allocation71_spill] sm:$0xff] }
 0x146   :  { %v223_v18 = vor.u32 %v222_v57, %v221_v14  ;;  %v235_v58 = vsel %vm227_vm1, %v3813_v62, %v3820_v6  ;;  %v5003_v14 = vld [vmem:[#allocation69_spill] sm:$0xff]  ;;  %v245_v28 = vshrl.u32 %v3829_v51, 16 }
 0x147   :  { %1476 = vmatpush.bf16.msrb.mxu0 %v4998_v27  ;;  %1489 = vmatpush.bf16.msrb.mxu1 %v4999_v9  ;;  %v1260_v9 = vpop.f32.mrf.mxu3  ;;  %v226_v23 = vor.u32 %v225_v60, %v224_v56  ;;  %v239_v57 = vsel %vm227_vm1, %v3820_v6, %v3822_v39  ;;  %v5004_v60 = vld [vmem:[#allocation70_spill] sm:$0xff] }
 0x148   :  { %1502 = vmatpush.bf16.msrb.mxu2 %v5000_v61  ;;  %1515 = vmatpush.bf16.msrb.mxu3 %v5001_v59  ;;  %v236_v35 = vsel %vm230_vm3, %v223_v18, 920167782  ;;  %v244_v9 = vand.u32 65535, %v3829_v51 }
 0x149   :  { %v237_v56 = vsel %vm229_vm2, %v3822_v39, %v236_v35  ;;  %v240_v43 = vsel %vm230_vm3, %v226_v23, 1326507024 }
 0x14b   :  { %1477 = vmatpush.bf16.msrb.mxu0 %v5002_v5  ;;  %1490 = vmatpush.bf16.msrb.mxu1 %v5003_v14  ;;  %v238_v5 = vsel %vm228_vm4, %v235_v58, %v237_v56  ;;  %v241_v14 = vsel %vm229_vm2, %v223_v18, %v240_v43  ;;  %v5009_v58 = vld [vmem:[#allocation75_spill] sm:$0xff] }
 0x14c   :  { %1503 = vmatpush.bf16.msrb.mxu2 %v5004_v60  ;;  %1516 = vmatpush.bf16.msrb.mxu3 %v5005_v52  ;;  %v242_v35 = vsel %vm228_vm4, %v239_v57, %v241_v14  ;;  %v268_v59 = vand.u32 65535, %v238_v5  ;;  %v269_v61 = vshrl.u32 %v238_v5, 16  ;;  %v5010_v57 = vld [vmem:[#allocation76_spill] sm:$0xff]  ;;  %v5011_v5 = vld [vmem:[#allocation77_spill] sm:$0xff] }
 0x14d   :  { %v246_v23 = vand.u32 65535, %v242_v35  ;;  %v247_v27 = vshrl.u32 %v242_v35, 16 }
 0x14e   :  { %v270_v60 = vmul.u32 %v268_v59, %v244_v9  ;;  %v271_v45 = vmul.u32 %v269_v61, %v244_v9  ;;  %v3861_v52 = vmul.u32 %v268_v59, %v245_v28  ;;  %v273_v14 = vmul.u32 %v269_v61, %v245_v28 }
 0x14f   :  { %1478 = vmatpush.bf16.msrb.mxu0 %v5006_v50  ;;  %1491 = vmatpush.bf16.msrb.mxu1 %v5007_v46  ;;  %v248_v18 = vmul.u32 %v246_v23, %v244_v9  ;;  %v249_v56 = vmul.u32 %v247_v27, %v244_v9  ;;  %v250_v43 = vmul.u32 %v246_v23, %v245_v28  ;;  %v5012_v46 = vld [vmem:[#allocation78_spill] sm:$0xff]  ;;  %v3113_v23 = vmov 0  }
 0x150   :  { %1504 = vmatpush.bf16.msrb.mxu2 %v5008_v44  ;;  %1517 = vmatpush.bf16.msrb.mxu3 %v5009_v58  ;;  %v274_v35 = vshll.u32 %v271_v45, 16  ;;  %v276_v50 = vshll.u32 %v3861_v52, 16  ;;  %v251_v59 = vmul.u32 %v247_v27, %v245_v28  ;;  %v5017_v58 = vld [vmem:[#allocation83_spill] sm:$0xff]  ;;  %v275_v25 = vshrl.u32 %v271_v45, 16 }
 0x151   :  { %v252_v34 = vshll.u32 %v249_v56, 16  ;;  %v254_v44 = vshll.u32 %v250_v43, 16  ;;  %v253_v33 = vshrl.u32 %v249_v56, 16 }
 0x152   :  { %1479 = vmatmul.bf16.vlgmr.msrb.gmra.mxu0 %v3761_v0  ;;  %1492 = vmatmul.bf16.vlgmr.msrb.gmra.mxu1 %v3761_v0  ;;  %vm278_vm5 = vc.u32 %v270_v60, %v274_v35  ;;  %v280_v9 = vadd.s32 %v274_v35, %v270_v60  ;;  %v5018_v60 = vmov 683565275  }
 0x153   :  { %1523 = vmatpush.bf16.msra.mxu0 %v5010_v57  ;;  %1536 = vmatpush.bf16.msra.mxu1 %v5011_v5  ;;  %vm256_vm6 = vc.u32 %v248_v18, %v252_v34  ;;  %v258_v61 = vadd.s32 %v252_v34, %v248_v18  ;;  %v279_v5 = vsel %vm278_vm5, 1, %v3113_v23  ;;  %v5016_v57 = vld [vmem:[#allocation82_spill] sm:$0xff]  ;;  %v211_v35 = vshrl.u32 %v5018_v60, %v3795_v4 }
 0x154   :  { %1549 = vmatpush.bf16.msra.mxu2 %v5012_v46  ;;  %1562 = vmatpush.bf16.msra.mxu3 %v5013_v38  ;;  %v5014_v46 = vld [vmem:[#allocation80_spill] sm:$0xff]  ;;  %v5015_v38 = vld [vmem:[#allocation81_spill] sm:$0xff]  ;;  %v257_v27 = vsel %vm256_vm6, 1, %v3113_v23  ;;  %v281_v28 = vadd.s32 %v279_v5, %v273_v14  ;;  %vm282_vm7 = vc.u32 %v280_v9, %v276_v50  ;;  %v232_v34 = vsel %vm230_vm3, %v3822_v39, 2102212464  ;;  %v3885_v5 = vpop.f32.mrf.mxu1  ;;  %v5021_v39 = vld [vmem:[#allocation86_spill] sm:$0xff] }
 0x155   :  { %1505 = vmatmul.bf16.vlgmr.msrb.gmra.mxu2 %v3761_v0  ;;  %1518 = vmatmul.bf16.vlgmr.msrb.gmra.mxu3 %v3761_v0  ;;  %v259_v29 = vadd.s32 %v257_v27, %v251_v59  ;;  %vm260_vm8 = vc.u32 %v258_v61, %v254_v44  ;;  %v255_v14 = vshrl.u32 %v250_v43, 16  ;;  %v231_v44 = vsel %vm227_vm1, %v211_v35, %v3813_v62  ;;  %v5022_v27 = vld [vmem:[#allocation88_spill] sm:$0xff]  ;;  %v5023_v62 = vld [vmem:[#allocation90_spill] sm:$0xff] }
 0x156   :  { %v261_v18 = vsel %vm260_vm8, 1, %v3113_v23  ;;  %v233_v4 = vsel %vm229_vm2, %v3820_v6, %v232_v34  ;;  %v284_v43 = vadd.s32 %v280_v9, %v276_v50  ;;  %v5024_v6 = vld [vmem:[#allocation91_spill] sm:$0xff]  ;;  %v5027_v9 = vld [vmem:[#allocation94_spill] sm:$0xff]  ;;  %vm338_vm1 = vweird.f32 %v3768_v31 }
 0x157   :  { %1524 = vmatpush.bf16.msra.mxu0 %v5014_v46  ;;  %1537 = vmatpush.bf16.msra.mxu1 %v5015_v38  ;;  %v283_v46 = vsel %vm282_vm7, 1, %v3113_v23  ;;  %v3883_v38 = vpop.f32.mrf.mxu0  ;;  %v234_v59 = vsel %vm228_vm4, %v231_v44, %v233_v4 }
 0x158   :  { %1550 = vmatpush.bf16.msra.mxu2 %v5016_v57  ;;  %1563 = vmatpush.bf16.msra.mxu3 %v5017_v58  ;;  %v263_v57 = vadd.s32 %v261_v18, %v259_v29  ;;  %v5019_v58 = vld [vmem:[#allocation84_spill] sm:$0xff]  ;;  %v277_v29 = vshrl.u32 %v3861_v52, 16  ;;  %v285_v45 = vadd.s32 %v283_v46, %v281_v28  ;;  %v3904_v35 = vpop.f32.mrf.mxu2  ;;  %v288_v46 = vmul.u32 %v3829_v51, %v234_v59  ;;  %v5028_v51 = vld [vmem:[#allocation98_spill] sm:$0xff] }
 0x15a   :  { %v264_v56 = vadd.s32 %v263_v57, %v253_v33  ;;  %v286_v23 = vadd.s32 %v285_v45, %v275_v25  ;;  %v3906_v33 = vpop.f32.mrf.mxu3  ;;  %v5025_v25 = vld [vmem:[#allocation92_spill] sm:$0xff]  ;;  %v5026_v57 = vld [vmem:[#allocation93_spill] sm:$0xff] }
 0x15b   :  { %1525 = vmatpush.bf16.msra.mxu0 %v5019_v58  ;;  %1538 = vmatpush.bf16.msra.mxu1 %v5020_v21  ;;  %v5031_v45 = vld [vmem:[#allocation101_spill] sm:$0xff] }
 0x15c   :  { %1551 = vmatpush.bf16.msra.mxu2 %v5021_v39  ;;  %1564 = vmatpush.bf16.msra.mxu3 %v4924_v37  ;;  %v265_v61 = vadd.s32 %v264_v56, %v255_v14  ;;  %v287_v60 = vadd.s32 %v286_v23, %v277_v29  ;;  %v1286_v55 = vpop.f32.mrf.mxu1  ;;  %v5029_v14 = vld [vmem:[#allocation99_spill] sm:$0xff]  ;;  %v5030_v29 = vld [vmem:[#allocation100_spill] sm:$0xff]  ;;  %v5032_v23 = vld [vmem:[#allocation102_spill] sm:$0xff] }
 0x15e   :  { %vm290_vm9 = vc.u32 %v265_v61, %v284_v43  ;;  %v291_v52 = vadd.s32 1, %v287_v60 }
 0x15f   :  { %1526 = vmatpush.bf16.msra.mxu0 %v5022_v27  ;;  %1539 = vmatpush.bf16.msra.mxu1 %v4926_v32  ;;  %v1273_v50 = vpop.f32.mrf.mxu0 }
 0x160   :  { %1552 = vmatpush.bf16.msra.mxu2 %v5023_v62  ;;  %1565 = vmatpush.bf16.msra.mxu3 %v5024_v6  ;;  %v292_v28 = vsel %vm290_vm9, %v291_v52, %v287_v60  ;;  %v1299_v44 = vpop.f32.mrf.mxu2  ;;  %v5034_v50 = vld [vmem:[#allocation105_spill] sm:$0xff]  ;;  %v5035_v52 = vld [vmem:[#allocation106_spill] sm:$0xff] }
 0x161   :  { %v293_v34 = vadd.s32 %v292_v28, %v288_v46  ;;  %v5033_v46 = vld [vmem:[#allocation104_spill] sm:$0xff]  ;;  %v5036_v28 = vld [vmem:[#allocation107_spill] sm:$0xff]  ;;  %v5038_v44 = vld [vmem:[#allocation109_spill] sm:$0xff] }
 0x162   :  { %v1312_v4 = vpop.f32.mrf.mxu3 }
 0x163   :  { %1527 = vmatpush.bf16.msra.mxu0 %v5025_v25  ;;  %1540 = vmatpush.bf16.msra.mxu1 %v5026_v57  ;;  %v294_v18 = vadd.s32 536870912, %v293_v34 }
 0x164   :  { %1553 = vmatpush.bf16.msra.mxu2 %v5027_v9  ;;  %1566 = vmatpush.bf16.msra.mxu3 %v4932_v30 }
 0x165   :  { %v3917_v56 = vshrl.u32 %v294_v18, 30  ;;  %v5037_v18 = vld [vmem:[#allocation108_spill] sm:$0xff] }
 0x167   :  { %1528 = vmatpush.bf16.msra.mxu0 %v4935_v2  ;;  %1541 = vmatpush.bf16.msra.mxu1 %v4936_v36  ;;  %v296_v59 = vshll.u32 %v3917_v56, 30 }
 0x168   :  { %1554 = vmatpush.bf16.msra.mxu2 %v5028_v51  ;;  %1567 = vmatpush.bf16.msra.mxu3 %v5029_v14 }
 0x169   :  { %v297_v60 = vsub.s32 %v293_v34, %v296_v59 }
 0x16b   :  { %1529 = vmatpush.bf16.msra.mxu0 %v5030_v29  ;;  %1542 = vmatpush.bf16.msra.mxu1 %v5031_v45  ;;  %vm298_vm10 = vcmp.lt.s32.totalorder %v297_v60, 0  ;;  %v299_v55 = vsub.s32 0, %v297_v60  ;;  %v5039_v45 = vld [vmem:[#allocation110_spill] sm:$0xff]  ;;  %v5046_v29 = vld [vmem:[#allocation116_spill] sm:$0xff] }
 0x16c   :  { %1555 = vmatpush.bf16.msra.mxu2 %v5032_v23  ;;  %1568 = vmatpush.bf16.msra.mxu3 %v3431_v42  ;;  %v5040_v23 = vld [vmem:[#allocation111_spill] sm:$0xff] }
 0x16d   :  { %v300_v4 = vsel %vm298_vm10, %v299_v55, %v297_v60  ;;  %v5044_v55 = vld [vmem:[#allocation115_spill] sm:$0xff] }
 0x16e   :  { %v301_v34 = vclz %v300_v4 }
 0x16f   :  { %1530 = vmatpush.bf16.msra.mxu0 %v5033_v46  ;;  %1543 = vmatpush.bf16.msra.mxu1 %v5034_v50 }
 0x170   :  { %1556 = vmatpush.bf16.msra.mxu2 %v5035_v52  ;;  %1569 = vmatpush.bf16.msra.mxu3 %v5036_v28  ;;  %v2262_v59 = vadd.s32 4294967294, %v301_v34  ;;  %v5041_v28 = vld [vmem:[#allocation112_spill] sm:$0xff]  ;;  %v3942_v52 = vpop.f32.mrf.mxu1  ;;  %v5047_v34 = vld [vmem:[#allocation117_spill] sm:$0xff] }
 0x172   :  { %1531 = vmatmul.bf16.vlgmr.msra.gmra.mxu0 %v3761_v0  ;;  %1544 = vmatmul.bf16.vlgmr.msra.gmra.mxu1 %v3761_v0  ;;  %vm2263_vm11 = vcmp.lt.s32.totalorder %v2262_v59, 0 }
 0x173   :  { %1575 = vmatpush.bf16.msrb.mxu0 %v5037_v18  ;;  %1588 = vmatpush.bf16.msrb.mxu1 %v5038_v44  ;;  %v5042_v18 = vld [vmem:[#allocation113_spill] sm:$0xff]  ;;  %v5043_v44 = vld [vmem:[#allocation114_spill] sm:$0xff]  ;;  %v304_v4 = vsel %vm2263_vm11, 0, %v2262_v59  ;;  %v5050_v59 = vld [vmem:[#allocation120_spill] sm:$0xff] }
 0x174   :  { %1601 = vmatpush.bf16.msrb.mxu2 %v5039_v45  ;;  %1614 = vmatpush.bf16.msrb.mxu3 %v5040_v23  ;;  %v289_v45 = vadd.s32 %v284_v43, %v265_v61  ;;  %v3940_v23 = vpop.f32.mrf.mxu0  ;;  %v305_v50 = vsub.s32 32, %v304_v4  ;;  %v306_v46 = vshll.u32 %v297_v60, %v304_v4  ;;  %v309_v42 = vsub.s32 4294967266, %v304_v4 }
 0x175   :  { %1557 = vmatmul.bf16.vlgmr.msra.gmra.mxu2 %v3761_v0  ;;  %1570 = vmatmul.bf16.vlgmr.msra.gmra.mxu3 %v3761_v0  ;;  %5045 = vst [vmem:[#allocation84_spill] sm:$0xff] %v3940_v23  ;;  %v5051_v23 = vld [vmem:[#allocation121_spill] sm:$0xff] }
 0x177   :  { %1576 = vmatpush.bf16.msrb.mxu0 %v5041_v28  ;;  %1589 = vmatpush.bf16.msrb.mxu1 %v5042_v18  ;;  %v5048_v28 = vld [vmem:[#allocation118_spill] sm:$0xff]  ;;  %v5049_v18 = vld [vmem:[#allocation119_spill] sm:$0xff] }
 0x178   :  { %1602 = vmatpush.bf16.msrb.mxu2 %v5043_v44  ;;  %1615 = vmatpush.bf16.msrb.mxu3 %v5044_v55  ;;  %v307_v44 = vshrl.u32 %v289_v45, %v305_v50  ;;  %v310_v55 = vadd.s32 127, %v309_v42  ;;  %v5055_v50 = vld [vmem:[#allocation16_spill] sm:$0xff] }
 0x17a   :  { %v308_v43 = vor.u32 %v307_v44, %v306_v46  ;;  %v311_v61 = vshll.u32 %v310_v55, 23  ;;  %v5052_v46 = vand.u32 2147483647, %v3768_v31 }
 0x17b   :  { %1577 = vmatpush.bf16.msrb.mxu0 %v5046_v29  ;;  %1590 = vmatpush.bf16.msrb.mxu1 %v5047_v34  ;;  %v3952_v29 = vpop.f32.mrf.mxu2  ;;  %v3954_v34 = vpop.f32.mrf.mxu3 }
 0x17c   :  { %1603 = vmatpush.bf16.msrb.mxu2 %v5048_v28  ;;  %1616 = vmatpush.bf16.msrb.mxu3 %v5049_v18  ;;  %v312_v60 = vor.u32 4788187, %v311_v61  ;;  %v315_v4 = vcvt.s32.f32 %v308_v43  ;;  %v1325_v28 = vpop.f32.mrf.mxu0  ;;  %v1338_v18 = vpop.f32.mrf.mxu1  ;;  %vm3963_vm13 = vcmp.le.f32.partialorder %v5052_v46, 0.7853982 }
 0x17e   :  { %v313_v45 = vand.u32 2147483647, %v312_v60 }
 0x17f   :  { %1578 = vmatpush.bf16.msrb.mxu0 %v5050_v59  ;;  %1591 = vmatpush.bf16.msrb.mxu1 %v5051_v23 }
 0x180   :  { %1604 = vmatpush.bf16.msrb.mxu2 %v4960_v1  ;;  %1617 = vmatpush.bf16.msrb.mxu3 %v4961_v54  ;;  %v316_v42 = vmul.f32 %v315_v4, %v313_v45  ;;  %v319_v45 = vsub.s32 4, %v3917_v56 }
 0x182   :  { %v317_v28 = vxor.u32 2147483648, %v316_v42 }
 0x183   :  { %1579 = vmatpush.bf16.msrb.mxu0 %v4964_v20  ;;  %1592 = vmatpush.bf16.msrb.mxu1 %v4965_v24  ;;  %v1351_v44 = vpop.f32.mrf.mxu2  ;;  %v1364_v55 = vpop.f32.mrf.mxu3 }
 0x184   :  { %1605 = vmatpush.bf16.msrb.mxu2 %v4966_v26  ;;  %1618 = vmatpush.bf16.msrb.mxu3 %v4967_v15  ;;  %v318_v18 = vsel %vm197_vm12, %v317_v28, %v316_v42  ;;  %v320_v28 = vsel %vm197_vm12, %v319_v45, %v3917_v56 }
 0x185   :  { %v321_v43 = vsel %vm3963_vm13, %v3768_v31, %v318_v18  ;;  %v322_v55 = vsel %vm3963_vm13, 0, %v320_v28  ;;  %v5070_v31 = vld [vmem:[#allocation26_spill] sm:$0xff] }
 0x186   :  { %v323_v61 = vmul.f32 %v321_v43, %v321_v43  ;;  %v339_v56 = vand.u32 3, %v322_v55 }
 0x187   :  { %1580 = vmatpush.bf16.msrb.mxu0 %v4968_v53  ;;  %1593 = vmatpush.bf16.msrb.mxu1 %v4969_v41 }
 0x188   :  { %1606 = vmatpush.bf16.msrb.mxu2 %v3517_v48  ;;  %1619 = vmatpush.bf16.msrb.mxu3 %v3519_v63  ;;  %v324_v60 = vmul.f32 -0.001358992, %v323_v61  ;;  %v331_v4 = vmul.f32 -0.00019511016, %v323_v61  ;;  %vm344_vm14 = vcmp.eq.s32.totalorder %v339_v56, 2  ;;  %vm341_vm15 = vcmp.eq.s32.totalorder %v339_v56, 0 }
 0x189   :  { %vm340_vm0 = vcmp.lt.s32.totalorder %v339_v56, 2 }
 0x18a   :  { %v325_v42 = vadd.f32 0.041655596, %v324_v60  ;;  %v332_v46 = vadd.f32 0.008332121, %v331_v4 }
 0x18b   :  { %1581 = vmatpush.bf16.msrb.mxu0 %v3523_v47  ;;  %1594 = vmatpush.bf16.msrb.mxu1 %v3525_v13 }
 0x18c   :  { %1607 = vmatpush.bf16.msrb.mxu2 %v3529_v10  ;;  %1620 = vmatpush.bf16.msrb.mxu3 %v3531_v49  ;;  %v326_v18 = vmul.f32 %v325_v42, %v323_v61  ;;  %v333_v44 = vmul.f32 %v332_v46, %v323_v61  ;;  %v5056_v46 = vld [vmem:[#allocation17_spill] sm:$0xff] }
 0x18e   :  { %v327_v60 = vadd.f32 -0.4999988, %v326_v18  ;;  %v334_v4 = vadd.f32 -0.16666654, %v333_v44 }
 0x18f   :  { %1582 = vmatpush.bf16.msrb.mxu0 %v3535_v40  ;;  %1595 = vmatpush.bf16.msrb.mxu1 %v3537_v11  ;;  %v4002_v44 = vpop.f32.mrf.mxu0  ;;  %v4004_v55 = vpop.f32.mrf.mxu1 }
 0x190   :  { %1608 = vmatpush.bf16.msrb.mxu2 %v3541_v19  ;;  %1621 = vmatpush.bf16.msrb.mxu3 %v3543_v22  ;;  %v328_v45 = vmul.f32 %v327_v60, %v323_v61  ;;  %v335_v42 = vmul.f32 %v334_v4, %v323_v61  ;;  %5057 = vst [vmem:[#allocation85_spill] sm:$0xff] %v4002_v44  ;;  %v5060_v61 = vld [vmem:[#allocation19_spill] sm:$0xff]  ;;  %v5061_v60 = vld [vmem:[#allocation20_spill] sm:$0xff]  ;;  %v5062_v4 = vld [vmem:[#allocation21_spill] sm:$0xff] }
 0x191   :  { %5058 = vst [vmem:[#allocation86_spill] sm:$0xff] %v4004_v55  ;;  %v5063_v44 = vld [vmem:[#allocation22_spill] sm:$0xff]  ;;  %v5064_v55 = vld [vmem:[#allocation23_spill] sm:$0xff] }
 0x192   :  { %1583 = vmatmul.bf16.vlgmr.msrb.gmra.mxu0 %v3761_v0  ;;  %1596 = vmatmul.bf16.vlgmr.msrb.gmra.mxu1 %v3761_v0  ;;  %v329_v28 = vadd.f32 1.0, %v328_v45  ;;  %v336_v18 = vadd.f32 1.0, %v335_v42 }
 0x193   :  { %1647 = vmatpush.bf16.msra.mxu0 %v3144_v3  ;;  %1660 = vmatpush.bf16.msra.mxu1 %v3146_v7 }
 0x194   :  { %1673 = vmatpush.bf16.msra.mxu2 %v3148_v8  ;;  %1686 = vmatpush.bf16.msra.mxu3 %v3151_v12  ;;  %v337_v12 = vmul.f32 %v336_v18, %v321_v43  ;;  %v345_v8 = vxor.u32 2147483648, %v329_v28  ;;  %v5065_v18 = vld [vmem:[#allocation24_spill] sm:$0xff] }
 0x195   :  { %1609 = vmatmul.bf16.vlgmr.msrb.gmra.mxu2 %v3761_v0  ;;  %1622 = vmatmul.bf16.vlgmr.msrb.gmra.mxu3 %v3761_v0  ;;  %v5059_v0 = vld [vmem:[#allocation18_spill] sm:$0xff] }
 0x196   :  { %v346_v45 = vsel %vm344_vm14, %v345_v8, %v337_v12 }
 0x197   :  { %1648 = vmatpush.bf16.msra.mxu0 %v3155_v16  ;;  %1661 = vmatpush.bf16.msra.mxu1 %v3157_v17  ;;  %v1390_v8 = vpop.f32.mrf.mxu1  ;;  %v5110_v17 = vld [vmem:[#allocation138_spill] sm:$0xff]  ;;  %v5111_v16 = vld [vmem:[#allocation56_spill] sm:$0xff] }
 0x198   :  { %1674 = vmatpush.bf16.msra.mxu2 %v5055_v50  ;;  %1687 = vmatpush.bf16.msra.mxu3 %v5056_v46  ;;  %v342_v46 = vxor.u32 2147483648, %v337_v12  ;;  %v4015_v50 = vpop.f32.mrf.mxu2  ;;  %v5069_v12 = vld [vmem:[#allocation128_spill] sm:$0xff] }
 0x199   :  { %5067 = vst [vmem:[#allocation88_spill] sm:$0xff] %v4015_v50  ;;  %vm351_vm2 = vcmp.lt.f32.partialorder %v5069_v12, 5.0  ;;  %v5077_v8 = vld [vmem:[#allocation32_spill] sm:$0xff]  ;;  %v5082_v12 = vld [vmem:[#allocation37_spill] sm:$0xff] }
 0x19a   :  { %v343_v42 = vsel %vm341_vm15, %v329_v28, %v342_v46  ;;  %v5071_v46 = vld [vmem:[#allocation27_spill] sm:$0xff]  ;;  %v5081_v50 = vld [vmem:[#allocation36_spill] sm:$0xff]  ;;  %vm4258_vm3 = vmpackc.low %vm351_vm2, %vm351_vm2 }
 0x19b   :  { %1649 = vmatpush.bf16.msra.mxu0 %v5059_v0  ;;  %1662 = vmatpush.bf16.msra.mxu1 %v5060_v61  ;;  %v347_v43 = vsel %vm340_vm0, %v343_v42, %v346_v45  ;;  %v5066_v0 = vld [vmem:[#allocation25_spill] sm:$0xff]  ;;  %v5073_v45 = vld [vmem:[#allocation28_spill] sm:$0xff] }
 0x19c   :  { %1675 = vmatpush.bf16.msra.mxu2 %v5061_v60  ;;  %1688 = vmatpush.bf16.msra.mxu3 %v5062_v4  ;;  %v348_v61 = vsel %vm338_vm1, nan, %v347_v43  ;;  %v4017_v60 = vpop.f32.mrf.mxu3  ;;  %v1377_v4 = vpop.f32.mrf.mxu0  ;;  %v5074_v42 = vld [vmem:[#allocation29_spill] sm:$0xff] }
 0x19d   :  { %5068 = vst [vmem:[#allocation90_spill] sm:$0xff] %v4017_v60  ;;  %v349_v56 = vadd.f32 1.0, %v348_v61  ;;  %v5075_v61 = vld [vmem:[#allocation30_spill] sm:$0xff]  ;;  %v5076_v4 = vld [vmem:[#allocation31_spill] sm:$0xff] }
 0x19e   :  { %v5079_v60 = vld [vmem:[#allocation34_spill] sm:$0xff] }
 0x19f   :  { %1650 = vmatpush.bf16.msra.mxu0 %v5063_v44  ;;  %1663 = vmatpush.bf16.msra.mxu1 %v5064_v55  ;;  %v4022_v28 = vmul.f32 0.5, %v349_v56  ;;  %v5109_v44 = vld [vmem:[#allocation135_spill] sm:$0xff] }
 0x1a0   :  { %1676 = vmatpush.bf16.msra.mxu2 %v5065_v18  ;;  %1689 = vmatpush.bf16.msra.mxu3 %v5066_v0  ;;  %v1403_v56 = vpop.f32.mrf.mxu2 }
 0x1a1   :  { %5072 = vst [vmem:[#allocation91_spill] sm:$0xff] %v4022_v28  ;;  %v352_v43 = vsel %vm351_vm2, %v4022_v28, 0.0  ;;  %v5083_v28 = vld [vmem:[#allocation38_spill] sm:$0xff]  ;;  %v5088_v56 = vld [vmem:[#allocation43_spill] sm:$0xff] }
 0x1a2   :  { %v1643_v0 = vpack.c.bf16 %v352_v43, %v352_v43 }
 0x1a3   :  { %1651 = vmatpush.bf16.msra.mxu0 %v5070_v31  ;;  %1664 = vmatpush.bf16.msra.mxu1 %v5071_v46  ;;  %v5078_v31 = vld [vmem:[#allocation33_spill] sm:$0xff] }
 0x1a4   :  { %1677 = vmatpush.bf16.msra.mxu2 %v5073_v45  ;;  %1690 = vmatpush.bf16.msra.mxu3 %v5074_v42  ;;  %v1644_v46 = vunpack.c.l.bf16 %v1643_v0  ;;  %v1416_v18 = vpop.f32.mrf.mxu3  ;;  %v5080_v45 = vld [vmem:[#allocation35_spill] sm:$0xff]  ;;  %v5086_v0 = vld [vmem:[#allocation41_spill] sm:$0xff] }
 0x1a5   :  { %v5087_v18 = vld [vmem:[#allocation42_spill] sm:$0xff] }
 0x1a6   :  { %v1645_v42 = vsub.f32 %v352_v43, %v1644_v46  ;;  %v5090_v46 = vld [vmem:[#allocation45_spill] sm:$0xff]  ;;  %v5092_v43 = vld [vmem:[#allocation47_spill] sm:$0xff] }
 0x1a7   :  { %1652 = vmatpush.bf16.msra.mxu0 %v5075_v61  ;;  %1665 = vmatpush.bf16.msra.mxu1 %v5076_v4  ;;  %v5084_v61 = vld [vmem:[#allocation39_spill] sm:$0xff] }
 0x1a8   :  { %1678 = vmatpush.bf16.msra.mxu2 %v5077_v8  ;;  %1691 = vmatpush.bf16.msra.mxu3 %v5078_v31  ;;  %v4039_v4 = vpack.c.bf16 %v1645_v42, %v1645_v42  ;;  %v5085_v8 = vld [vmem:[#allocation40_spill] sm:$0xff]  ;;  %v5091_v42 = vld [vmem:[#allocation46_spill] sm:$0xff]  ;;  %v5100_v31 = vld [vmem:[#allocation51_spill] sm:$0xff] }
 0x1ab   :  { %1653 = vmatpush.bf16.msra.mxu0 %v5079_v60  ;;  %1666 = vmatpush.bf16.msra.mxu1 %v5080_v45  ;;  %v5089_v45 = vld [vmem:[#allocation44_spill] sm:$0xff]  ;;  %v5099_v60 = vld [vmem:[#allocation50_spill] sm:$0xff] }
 0x1ac   :  { %1679 = vmatpush.bf16.msra.mxu2 %v5081_v50  ;;  %1692 = vmatpush.bf16.msra.mxu3 %v5082_v12 }
 0x1af   :  { %1654 = vmatpush.bf16.msra.mxu0 %v5083_v28  ;;  %1667 = vmatpush.bf16.msra.mxu1 %v5084_v61  ;;  %v5098_v61 = vld [vmem:[#allocation67_spill] sm:$0xff]  ;;  %v1428_v12 = vpop.f32.mrf.mxu0  ;;  %v1441_v50 = vpop.f32.mrf.mxu1 }
 0x1b0   :  { %1680 = vmatpush.bf16.msra.mxu2 %v5085_v8  ;;  %1693 = vmatpush.bf16.msra.mxu3 %v5086_v0  ;;  %v5093_v0 = vld [vmem:[#allocation48_spill] sm:$0xff] }
 0x1b2   :  { %1655 = vmatmul.bf16.vlgmr.msra.gmra.mxu0 %v4039_v4  ;;  %1668 = vmatmul.bf16.vlgmr.msra.gmra.mxu1 %v4039_v4 }
 0x1b3   :  { %1699 = vmatpush.bf16.msrb.mxu0 %v5087_v18  ;;  %1712 = vmatpush.bf16.msrb.mxu1 %v5088_v56  ;;  %v5094_v18 = vld [vmem:[#allocation49_spill] sm:$0xff]  ;;  %v5095_v56 = vld [vmem:[#allocation63_spill] sm:$0xff] }
 0x1b4   :  { %1725 = vmatpush.bf16.msrb.mxu2 %v5089_v45  ;;  %1738 = vmatpush.bf16.msrb.mxu3 %v5090_v46  ;;  %v5096_v45 = vld [vmem:[#allocation129_spill] sm:$0xff] }
 0x1b5   :  { %1681 = vmatmul.bf16.vlgmr.msra.gmra.mxu2 %v4039_v4  ;;  %1694 = vmatmul.bf16.vlgmr.msra.gmra.mxu3 %v4039_v4  ;;  %v1220_v8 = vadd.f32 %v5096_v45, %v5095_v56  ;;  %v5097_v46 = vld [vmem:[#allocation133_spill] sm:$0xff]  ;;  %v5106_v45 = vld [vmem:[#allocation55_spill] sm:$0xff]  ;;  %v5107_v56 = vld [vmem:[#allocation134_spill] sm:$0xff] }
 0x1b6   :  { %v1233_v28 = vadd.f32 %v5098_v61, %v5097_v46  ;;  %v5108_v61 = vld [vmem:[#allocation137_spill] sm:$0xff] }
 0x1b7   :  { %1700 = vmatpush.bf16.msrb.mxu0 %v5091_v42  ;;  %1713 = vmatpush.bf16.msrb.mxu1 %v5092_v43  ;;  %v4061_v55 = vadd.f32 %v1428_v12, %v1220_v8  ;;  %v5103_v43 = vld [vmem:[#allocation52_spill] sm:$0xff]  ;;  %v1246_v46 = vadd.f32 %v5108_v61, %v5107_v56  ;;  %v5112_v12 = vld [vmem:[#allocation57_spill] sm:$0xff] }
 0x1b8   :  { %1726 = vmatpush.bf16.msrb.mxu2 %v5093_v0  ;;  %1739 = vmatpush.bf16.msrb.mxu3 %v5094_v18  ;;  %v4063_v42 = vadd.f32 %v1441_v50, %v1233_v28  ;;  %v5104_v0 = vld [vmem:[#allocation53_spill] sm:$0xff]  ;;  %v5105_v18 = vld [vmem:[#allocation54_spill] sm:$0xff]  ;;  %v1454_v50 = vpop.f32.mrf.mxu2  ;;  %v1467_v28 = vpop.f32.mrf.mxu3  ;;  %v5117_v56 = vld [vmem:[#allocation60_spill] sm:$0xff] }
 0x1b9   :  { %5101 = vst [vmem:[#allocation92_spill] sm:$0xff] %v4061_v55  ;;  %v4075_v8 = vadd.f32 %v1454_v50, %v1246_v46  ;;  %v1430_v55 = vpop.f32.mrf.mxu0  ;;  %v5118_v61 = vld [vmem:[#allocation61_spill] sm:$0xff]  ;;  %v5122_v46 = vld [vmem:[#allocation66_spill] sm:$0xff] }
 0x1ba   :  { %5102 = vst [vmem:[#allocation93_spill] sm:$0xff] %v4063_v42  ;;  %v5123_v55 = vld [vmem:[#allocation68_spill] sm:$0xff] }
 0x1bb   :  { %1701 = vmatpush.bf16.msrb.mxu0 %v5099_v60  ;;  %1714 = vmatpush.bf16.msrb.mxu1 %v5100_v31  ;;  %v1259_v60 = vadd.f32 %v5110_v17, %v5109_v44  ;;  %5113 = vst [vmem:[#allocation94_spill] sm:$0xff] %v4075_v8  ;;  %v5119_v17 = vld [vmem:[#allocation62_spill] sm:$0xff]  ;;  %v5120_v44 = vld [vmem:[#allocation64_spill] sm:$0xff] }
 0x1bc   :  { %1727 = vmatpush.bf16.msrb.mxu2 %v5103_v43  ;;  %1740 = vmatpush.bf16.msrb.mxu3 %v5104_v0  ;;  %v5115_v0 = vld [vmem:[#allocation58_spill] sm:$0xff]  ;;  %v5127_v8 = vld [vmem:[#allocation72_spill] sm:$0xff] }
 0x1bd   :  { %v4077_v42 = vadd.f32 %v1467_v28, %v1259_v60  ;;  %v5125_v28 = vld [vmem:[#allocation70_spill] sm:$0xff] }
 0x1bf   :  { %1702 = vmatpush.bf16.msrb.mxu0 %v5105_v18  ;;  %1715 = vmatpush.bf16.msrb.mxu1 %v5106_v45  ;;  %5114 = vst [vmem:[#allocation120_spill] sm:$0xff] %v4077_v42  ;;  %v1443_v18 = vpop.f32.mrf.mxu1  ;;  %v5116_v45 = vld [vmem:[#allocation59_spill] sm:$0xff] }
 0x1c0   :  { %1728 = vmatpush.bf16.msrb.mxu2 %v5111_v16  ;;  %1741 = vmatpush.bf16.msrb.mxu3 %v5112_v12  ;;  %v5121_v12 = vld [vmem:[#allocation65_spill] sm:$0xff]  ;;  %v1456_v60 = vpop.f32.mrf.mxu2  ;;  %v1469_v50 = vpop.f32.mrf.mxu3  ;;  %v5126_v42 = vld [vmem:[#allocation71_spill] sm:$0xff] }
 0x1c1   :  { %v5124_v18 = vld [vmem:[#allocation69_spill] sm:$0xff]  ;;  %v5133_v50 = vld [vmem:[#allocation78_spill] sm:$0xff] }
 0x1c2   :  { %v5132_v60 = vld [vmem:[#allocation77_spill] sm:$0xff] }
 0x1c3   :  { %1703 = vmatpush.bf16.msrb.mxu0 %v5115_v0  ;;  %1716 = vmatpush.bf16.msrb.mxu1 %v5116_v45 }
 0x1c4   :  { %1729 = vmatpush.bf16.msrb.mxu2 %v5117_v56  ;;  %1742 = vmatpush.bf16.msrb.mxu3 %v5118_v61  ;;  %v5128_v61 = vld [vmem:[#allocation73_spill] sm:$0xff] }
 0x1c7   :  { %1704 = vmatpush.bf16.msrb.mxu0 %v5119_v17  ;;  %1717 = vmatpush.bf16.msrb.mxu1 %v5120_v44  ;;  %v5129_v17 = vld [vmem:[#allocation74_spill] sm:$0xff]  ;;  %v5130_v44 = vld [vmem:[#allocation75_spill] sm:$0xff] }
 0x1c8   :  { %1730 = vmatpush.bf16.msrb.mxu2 %v5121_v12  ;;  %1743 = vmatpush.bf16.msrb.mxu3 %v5122_v46  ;;  %v5131_v12 = vld [vmem:[#allocation76_spill] sm:$0xff] }
 0x1cb   :  { %1705 = vmatpush.bf16.msrb.mxu0 %v5123_v55  ;;  %1718 = vmatpush.bf16.msrb.mxu1 %v5124_v18  ;;  %v5134_v55 = vld [vmem:[#allocation79_spill] sm:$0xff] }
 0x1cc   :  { %1731 = vmatpush.bf16.msrb.mxu2 %v5125_v28  ;;  %1744 = vmatpush.bf16.msrb.mxu3 %v5126_v42 }
 0x1cf   :  { %1706 = vmatpush.bf16.msrb.mxu0 %v5127_v8  ;;  %1719 = vmatpush.bf16.msrb.mxu1 %v5128_v61  ;;  %v5135_v61 = vld [vmem:[#allocation80_spill] sm:$0xff]  ;;  %v1480_v42 = vpop.f32.mrf.mxu0  ;;  %v1493_v28 = vpop.f32.mrf.mxu1 }
 0x1d0   :  { %1732 = vmatpush.bf16.msrb.mxu2 %v5129_v17  ;;  %1745 = vmatpush.bf16.msrb.mxu3 %v5130_v44  ;;  %v5136_v17 = vld [vmem:[#allocation81_spill] sm:$0xff]  ;;  %v5137_v44 = vld [vmem:[#allocation82_spill] sm:$0xff] }
 0x1d2   :  { %1707 = vmatmul.bf16.vlgmr.msrb.gmra.mxu0 %v4039_v4  ;;  %1720 = vmatmul.bf16.vlgmr.msrb.gmra.mxu1 %v4039_v4 }
 0x1d3   :  { %1751 = vmatpush.bf16.msra.mxu0 %v5131_v12  ;;  %1764 = vmatpush.bf16.msra.mxu1 %v5132_v60  ;;  %v5138_v12 = vld [vmem:[#allocation83_spill] sm:$0xff] }
 0x1d4   :  { %1777 = vmatpush.bf16.msra.mxu2 %v5133_v50  ;;  %1790 = vmatpush.bf16.msra.mxu3 %v5134_v55  ;;  %v5139_v60 = vld [vmem:[#allocation87_spill] sm:$0xff]  ;;  %v5140_v55 = vld [vmem:[#allocation89_spill] sm:$0xff] }
 0x1d5   :  { %1733 = vmatmul.bf16.vlgmr.msrb.gmra.mxu2 %v4039_v4  ;;  %1746 = vmatmul.bf16.vlgmr.msrb.gmra.mxu3 %v4039_v4  ;;  %v1272_v50 = vadd.f32 %v3883_v38, %v5139_v60  ;;  %v1285_v8 = vadd.f32 %v3885_v5, %v5140_v55  ;;  %v5143_v38 = vld [vmem:[#allocation95_spill] sm:$0xff]  ;;  %v5144_v55 = vld [vmem:[#allocation96_spill] sm:$0xff] }
 0x1d6   :  { %v1298_v5 = vadd.f32 %v3904_v35, %v5143_v38  ;;  %v1311_v60 = vadd.f32 %v3906_v33, %v5144_v55  ;;  %v5149_v38 = vld [vmem:[#allocation102_spill] sm:$0xff]  ;;  %v5151_v55 = vld [vmem:[#allocation104_spill] sm:$0xff] }
 0x1d7   :  { %1752 = vmatpush.bf16.msra.mxu0 %v5135_v61  ;;  %1765 = vmatpush.bf16.msra.mxu1 %v5136_v17  ;;  %v4113_v18 = vadd.f32 %v1480_v42, %v1272_v50  ;;  %v4115_v61 = vadd.f32 %v1493_v28, %v1285_v8 }
 0x1d8   :  { %1778 = vmatpush.bf16.msra.mxu2 %v5137_v44  ;;  %1791 = vmatpush.bf16.msra.mxu3 %v5138_v12  ;;  %v1506_v42 = vpop.f32.mrf.mxu2  ;;  %v1519_v8 = vpop.f32.mrf.mxu3 }
 0x1d9   :  { %5141 = vst [vmem:[#allocation121_spill] sm:$0xff] %v4113_v18  ;;  %v4127_v28 = vadd.f32 %v1506_v42, %v1298_v5  ;;  %v4129_v50 = vadd.f32 %v1519_v8, %v1311_v60  ;;  %v1495_v18 = vpop.f32.mrf.mxu1  ;;  %v5150_v5 = vld [vmem:[#allocation103_spill] sm:$0xff]  ;;  %v5152_v60 = vld [vmem:[#allocation105_spill] sm:$0xff]  ;;  %v5153_v42 = vld [vmem:[#allocation106_spill] sm:$0xff] }
 0x1da   :  { %5142 = vst [vmem:[#allocation63_spill] sm:$0xff] %v4115_v61  ;;  %v1482_v61 = vpop.f32.mrf.mxu0  ;;  %v5148_v18 = vld [vmem:[#allocation101_spill] sm:$0xff]  ;;  %v5154_v8 = vld [vmem:[#allocation107_spill] sm:$0xff] }
 0x1db   :  { %1753 = vmatpush.bf16.msra.mxu0 %v5019_v58  ;;  %1766 = vmatpush.bf16.msra.mxu1 %v5020_v21  ;;  %5145 = vst [vmem:[#allocation129_spill] sm:$0xff] %v4127_v28  ;;  %v5147_v61 = vld [vmem:[#allocation100_spill] sm:$0xff]  ;;  %v5158_v28 = vld [vmem:[#allocation111_spill] sm:$0xff] }
 0x1dc   :  { %1779 = vmatpush.bf16.msra.mxu2 %v5021_v39  ;;  %1792 = vmatpush.bf16.msra.mxu3 %v4924_v37  ;;  %5146 = vst [vmem:[#allocation133_spill] sm:$0xff] %v4129_v50  ;;  %v5155_v50 = vld [vmem:[#allocation108_spill] sm:$0xff] }
 0x1df   :  { %1754 = vmatpush.bf16.msra.mxu0 %v5022_v27  ;;  %1767 = vmatpush.bf16.msra.mxu1 %v4926_v32 }
 0x1e0   :  { %1780 = vmatpush.bf16.msra.mxu2 %v5023_v62  ;;  %1793 = vmatpush.bf16.msra.mxu3 %v5024_v6  ;;  %v1508_v35 = vpop.f32.mrf.mxu2  ;;  %v1521_v33 = vpop.f32.mrf.mxu3 }
 0x1e1   :  { %v5156_v35 = vld [vmem:[#allocation109_spill] sm:$0xff]  ;;  %v5157_v33 = vld [vmem:[#allocation110_spill] sm:$0xff] }
 0x1e3   :  { %1755 = vmatpush.bf16.msra.mxu0 %v5025_v25  ;;  %1768 = vmatpush.bf16.msra.mxu1 %v5026_v57 }
 0x1e4   :  { %1781 = vmatpush.bf16.msra.mxu2 %v5027_v9  ;;  %1794 = vmatpush.bf16.msra.mxu3 %v4932_v30 }
 0x1e7   :  { %1756 = vmatpush.bf16.msra.mxu0 %v4935_v2  ;;  %1769 = vmatpush.bf16.msra.mxu1 %v4936_v36 }
 0x1e8   :  { %1782 = vmatpush.bf16.msra.mxu2 %v5028_v51  ;;  %1795 = vmatpush.bf16.msra.mxu3 %v5029_v14  ;;  %v5167_v14 = vld [vmem:[#allocation117_spill] sm:$0xff] }
 0x1eb   :  { %1757 = vmatpush.bf16.msra.mxu0 %v5147_v61  ;;  %1770 = vmatpush.bf16.msra.mxu1 %v5148_v18  ;;  %v5166_v61 = vld [vmem:[#allocation116_spill] sm:$0xff] }
 0x1ec   :  { %1783 = vmatpush.bf16.msra.mxu2 %v5149_v38  ;;  %1796 = vmatpush.bf16.msra.mxu3 %v5150_v5 }
 0x1ef   :  { %1758 = vmatpush.bf16.msra.mxu0 %v5151_v55  ;;  %1771 = vmatpush.bf16.msra.mxu1 %v5152_v60  ;;  %v5159_v60 = vld [vmem:[#allocation112_spill] sm:$0xff]  ;;  %v1532_v38 = vpop.f32.mrf.mxu0  ;;  %v1545_v18 = vpop.f32.mrf.mxu1 }
 0x1f0   :  { %1784 = vmatpush.bf16.msra.mxu2 %v5153_v42  ;;  %1797 = vmatpush.bf16.msra.mxu3 %v5154_v8  ;;  %v5160_v42 = vld [vmem:[#allocation113_spill] sm:$0xff]  ;;  %v5161_v8 = vld [vmem:[#allocation114_spill] sm:$0xff] }
 0x1f2   :  { %1759 = vmatmul.bf16.vlgmr.msra.gmra.mxu0 %v4039_v4  ;;  %1772 = vmatmul.bf16.vlgmr.msra.gmra.mxu1 %v4039_v4 }
 0x1f3   :  { %1803 = vmatpush.bf16.msrb.mxu0 %v5155_v50  ;;  %1816 = vmatpush.bf16.msrb.mxu1 %v5156_v35  ;;  %v5162_v50 = vld [vmem:[#allocation115_spill] sm:$0xff]  ;;  %v5163_v35 = vld [vmem:[#allocation97_spill] sm:$0xff] }
 0x1f4   :  { %1829 = vmatpush.bf16.msrb.mxu2 %v5157_v33  ;;  %1842 = vmatpush.bf16.msrb.mxu3 %v5158_v28  ;;  %v5164_v33 = vld [vmem:[#allocation84_spill] sm:$0xff] }
 0x1f5   :  { %1785 = vmatmul.bf16.vlgmr.msra.gmra.mxu2 %v4039_v4  ;;  %1798 = vmatmul.bf16.vlgmr.msra.gmra.mxu3 %v4039_v4  ;;  %v1324_v55 = vadd.f32 %v5164_v33, %v5163_v35  ;;  %v5165_v28 = vld [vmem:[#allocation136_spill] sm:$0xff]  ;;  %v5172_v35 = vld [vmem:[#allocation122_spill] sm:$0xff] }
 0x1f6   :  { %v1337_v5 = vadd.f32 %v3942_v52, %v5165_v28  ;;  %v1350_v52 = vadd.f32 %v3952_v29, %v5172_v35  ;;  %v5173_v28 = vld [vmem:[#allocation123_spill] sm:$0xff]  ;;  %v5178_v35 = vld [vmem:[#allocation14_spill] sm:$0xff] }
 0x1f7   :  { %1804 = vmatpush.bf16.msrb.mxu0 %v5159_v60  ;;  %1817 = vmatpush.bf16.msrb.mxu1 %v5160_v42  ;;  %v4165_v51 = vadd.f32 %v1532_v38, %v1324_v55  ;;  %v5170_v42 = vld [vmem:[#allocation118_spill] sm:$0xff]  ;;  %v1363_v33 = vadd.f32 %v3954_v34, %v5173_v28  ;;  %v5180_v28 = vld [vmem:[#allocation16_spill] sm:$0xff] }
 0x1f8   :  { %1830 = vmatpush.bf16.msrb.mxu2 %v5161_v8  ;;  %1843 = vmatpush.bf16.msrb.mxu3 %v5162_v50  ;;  %v4167_v60 = vadd.f32 %v1545_v18, %v1337_v5  ;;  %v5171_v8 = vld [vmem:[#allocation119_spill] sm:$0xff]  ;;  %v1558_v18 = vpop.f32.mrf.mxu2  ;;  %v1571_v38 = vpop.f32.mrf.mxu3 }
 0x1f9   :  { %5168 = vst [vmem:[#allocation67_spill] sm:$0xff] %v4165_v51  ;;  %v4179_v5 = vadd.f32 %v1558_v18, %v1350_v52  ;;  %v4181_v55 = vadd.f32 %v1571_v38, %v1363_v33  ;;  %v1547_v51 = vpop.f32.mrf.mxu1  ;;  %v5179_v52 = vld [vmem:[#allocation15_spill] sm:$0xff]  ;;  %v5183_v33 = vld [vmem:[#allocation85_spill] sm:$0xff] }
 0x1fa   :  { %5169 = vst [vmem:[#allocation51_spill] sm:$0xff] %v4167_v60  ;;  %v1534_v60 = vpop.f32.mrf.mxu0  ;;  %v5176_v51 = vld [vmem:[#allocation12_spill] sm:$0xff]  ;;  %v5184_v38 = vld [vmem:[#allocation125_spill] sm:$0xff] }
 0x1fb   :  { %1805 = vmatpush.bf16.msrb.mxu0 %v5166_v61  ;;  %1818 = vmatpush.bf16.msrb.mxu1 %v5167_v14  ;;  %5174 = vst [vmem:[#allocation52_spill] sm:$0xff] %v4179_v5  ;;  %v5177_v60 = vld [vmem:[#allocation13_spill] sm:$0xff]  ;;  %v5187_v5 = vld [vmem:[#allocation19_spill] sm:$0xff] }
 0x1fc   :  { %1831 = vmatpush.bf16.msrb.mxu2 %v5170_v42  ;;  %1844 = vmatpush.bf16.msrb.mxu3 %v5171_v8  ;;  %5175 = vst [vmem:[#allocation134_spill] sm:$0xff] %v4181_v55  ;;  %v5186_v55 = vld [vmem:[#allocation18_spill] sm:$0xff] }
 0x1ff   :  { %1806 = vmatpush.bf16.msrb.mxu0 %v5050_v59  ;;  %1819 = vmatpush.bf16.msrb.mxu1 %v5051_v23 }
 0x200   :  { %1832 = vmatpush.bf16.msrb.mxu2 %v4960_v1  ;;  %1845 = vmatpush.bf16.msrb.mxu3 %v4961_v54  ;;  %v1560_v29 = vpop.f32.mrf.mxu2  ;;  %v1573_v34 = vpop.f32.mrf.mxu3 }
 0x201   :  { %v5185_v29 = vld [vmem:[#allocation86_spill] sm:$0xff] }
 0x202   :  { %v1389_v34 = vadd.f32 %v5185_v29, %v5184_v38  ;;  %v5193_v38 = vld [vmem:[#allocation88_spill] sm:$0xff] }
 0x203   :  { %1807 = vmatpush.bf16.msrb.mxu0 %v4964_v20  ;;  %1820 = vmatpush.bf16.msrb.mxu1 %v4965_v24 }
 0x204   :  { %1833 = vmatpush.bf16.msrb.mxu2 %v4966_v26  ;;  %1846 = vmatpush.bf16.msrb.mxu3 %v4967_v15 }
 0x207   :  { %1808 = vmatpush.bf16.msrb.mxu0 %v4968_v53  ;;  %1821 = vmatpush.bf16.msrb.mxu1 %v4969_v41 }
 0x208   :  { %1834 = vmatpush.bf16.msrb.mxu2 %v3517_v48  ;;  %1847 = vmatpush.bf16.msrb.mxu3 %v3519_v63 }
 0x20b   :  { %1809 = vmatpush.bf16.msrb.mxu0 %v3523_v47  ;;  %1822 = vmatpush.bf16.msrb.mxu1 %v3525_v13 }
 0x20c   :  { %1835 = vmatpush.bf16.msrb.mxu2 %v3529_v10  ;;  %1848 = vmatpush.bf16.msrb.mxu3 %v3531_v49 }
 0x20f   :  { %1810 = vmatpush.bf16.msrb.mxu0 %v3535_v40  ;;  %1823 = vmatpush.bf16.msrb.mxu1 %v3537_v11  ;;  %v5196_v11 = vld [vmem:[#allocation24_spill] sm:$0xff] }
 0x210   :  { %1836 = vmatpush.bf16.msrb.mxu2 %v3541_v19  ;;  %1849 = vmatpush.bf16.msrb.mxu3 %v3543_v22  ;;  %v5194_v22 = vld [vmem:[#allocation127_spill] sm:$0xff]  ;;  %v5195_v19 = vld [vmem:[#allocation90_spill] sm:$0xff] }
 0x212   :  { %1811 = vmatmul.bf16.vlgmr.msrb.gmra.mxu0 %v4039_v4  ;;  %1824 = vmatmul.bf16.vlgmr.msrb.gmra.mxu1 %v4039_v4 }
 0x213   :  { %1855 = vmatpush.bf16.msra.mxu0 %v3144_v3  ;;  %1868 = vmatpush.bf16.msra.mxu1 %v3146_v7  ;;  %v5181_v3 = vld [vmem:[#allocation17_spill] sm:$0xff]  ;;  %v5182_v7 = vld [vmem:[#allocation124_spill] sm:$0xff] }
 0x214   :  { %1881 = vmatpush.bf16.msra.mxu2 %v5176_v51  ;;  %1894 = vmatpush.bf16.msra.mxu3 %v5177_v60  ;;  %v1376_v18 = vadd.f32 %v5183_v33, %v5182_v7  ;;  %v1584_v51 = vpop.f32.mrf.mxu0  ;;  %v1597_v60 = vpop.f32.mrf.mxu1  ;;  %v5191_v7 = vld [vmem:[#allocation23_spill] sm:$0xff]  ;;  %v5192_v33 = vld [vmem:[#allocation126_spill] sm:$0xff] }
 0x215   :  { %1837 = vmatmul.bf16.vlgmr.msrb.gmra.mxu2 %v4039_v4  ;;  %1850 = vmatmul.bf16.vlgmr.msrb.gmra.mxu3 %v4039_v4  ;;  %v1402_v29 = vadd.f32 %v5193_v38, %v5192_v33  ;;  %v5200_v33 = vld [vmem:[#allocation28_spill] sm:$0xff]  ;;  %v5201_v38 = vld [vmem:[#allocation29_spill] sm:$0xff] }
 0x216   :  { %v4217_v4 = vadd.f32 %v1584_v51, %v1376_v18 }
 0x217   :  { %1856 = vmatpush.bf16.msra.mxu0 %v5178_v35  ;;  %1869 = vmatpush.bf16.msra.mxu1 %v5179_v52  ;;  %v4219_v35 = vadd.f32 %v1597_v60, %v1389_v34  ;;  %v5188_v52 = vld [vmem:[#allocation20_spill] sm:$0xff] }
 0x218   :  { %1882 = vmatpush.bf16.msra.mxu2 %v5180_v28  ;;  %1895 = vmatpush.bf16.msra.mxu3 %v5181_v3  ;;  %v5189_v28 = vld [vmem:[#allocation21_spill] sm:$0xff]  ;;  %v5190_v3 = vld [vmem:[#allocation22_spill] sm:$0xff]  ;;  %v1610_v18 = vpop.f32.mrf.mxu2  ;;  %v1623_v34 = vpop.f32.mrf.mxu3 }
 0x219   :  { %v4231_v51 = vadd.f32 %v1610_v18, %v1402_v29  ;;  %v5205_v29 = vld [vmem:[#allocation33_spill] sm:$0xff]  ;;  %v5206_v18 = vld [vmem:[#allocation34_spill] sm:$0xff] }
 0x21b   :  { %1857 = vmatpush.bf16.msra.mxu0 %v5186_v55  ;;  %1870 = vmatpush.bf16.msra.mxu1 %v5187_v5  ;;  %v1415_v55 = vadd.f32 %v5195_v19, %v5194_v22  ;;  %v5197_v5 = vld [vmem:[#allocation25_spill] sm:$0xff]  ;;  %v5202_v19 = vld [vmem:[#allocation30_spill] sm:$0xff]  ;;  %v5204_v22 = vld [vmem:[#allocation32_spill] sm:$0xff] }
 0x21c   :  { %1883 = vmatpush.bf16.msra.mxu2 %v5188_v52  ;;  %1896 = vmatpush.bf16.msra.mxu3 %v5189_v28  ;;  %v1586_v52 = vpop.f32.mrf.mxu0  ;;  %v1599_v28 = vpop.f32.mrf.mxu1 }
 0x21d   :  { %v4233_v60 = vadd.f32 %v1623_v34, %v1415_v55  ;;  %v5207_v34 = vld [vmem:[#allocation35_spill] sm:$0xff]  ;;  %v5208_v52 = vld [vmem:[#allocation36_spill] sm:$0xff]  ;;  %v5209_v28 = vld [vmem:[#allocation37_spill] sm:$0xff] }
 0x21f   :  { %1858 = vmatpush.bf16.msra.mxu0 %v5190_v3  ;;  %1871 = vmatpush.bf16.msra.mxu1 %v5191_v7  ;;  %v5198_v3 = vld [vmem:[#allocation26_spill] sm:$0xff]  ;;  %v5199_v7 = vld [vmem:[#allocation27_spill] sm:$0xff] }
 0x220   :  { %1884 = vmatpush.bf16.msra.mxu2 %v5196_v11  ;;  %1897 = vmatpush.bf16.msra.mxu3 %v5197_v5  ;;  %v5203_v11 = vld [vmem:[#allocation31_spill] sm:$0xff]  ;;  %v1612_v55 = vpop.f32.mrf.mxu2  ;;  %v1625_v5 = vpop.f32.mrf.mxu3 }
 0x221   :  { %v5218_v55 = vld [vmem:[#allocation42_spill] sm:$0xff]  ;;  %v5219_v5 = vld [vmem:[#allocation43_spill] sm:$0xff] }
 0x223   :  { %1859 = vmatpush.bf16.msra.mxu0 %v5198_v3  ;;  %1872 = vmatpush.bf16.msra.mxu1 %v5199_v7  ;;  %v5210_v3 = vld [vmem:[#allocation38_spill] sm:$0xff]  ;;  %v5211_v7 = vld [vmem:[#allocation39_spill] sm:$0xff] }
 0x224   :  { %1885 = vmatpush.bf16.msra.mxu2 %v5200_v33  ;;  %1898 = vmatpush.bf16.msra.mxu3 %v5201_v38  ;;  %v5212_v33 = vld [vmem:[#allocation91_spill] sm:$0xff] }
 0x225   :  { %v4251_v38 = vpack.c.bf16 %v5212_v33, %v5212_v33  ;;  %v5226_v33 = vld [vmem:[#allocation50_spill] sm:$0xff] }
 0x227   :  { %1860 = vmatpush.bf16.msra.mxu0 %v5202_v19  ;;  %1873 = vmatpush.bf16.msra.mxu1 %v5203_v11  ;;  %v5213_v19 = vld [vmem:[#allocation40_spill] sm:$0xff]  ;;  %v5214_v11 = vld [vmem:[#allocation41_spill] sm:$0xff] }
 0x228   :  { %1886 = vmatpush.bf16.msra.mxu2 %v5204_v22  ;;  %1899 = vmatpush.bf16.msra.mxu3 %v5205_v29  ;;  %v5227_v22 = vld [vmem:[#allocation53_spill] sm:$0xff] }
 0x22b   :  { %1861 = vmatpush.bf16.msra.mxu0 %v5206_v18  ;;  %1874 = vmatpush.bf16.msra.mxu1 %v5207_v34  ;;  %v5220_v18 = vld [vmem:[#allocation44_spill] sm:$0xff]  ;;  %v5221_v34 = vld [vmem:[#allocation45_spill] sm:$0xff] }
 0x22c   :  { %1887 = vmatpush.bf16.msra.mxu2 %v5208_v52  ;;  %1900 = vmatpush.bf16.msra.mxu3 %v5209_v28  ;;  %v5222_v52 = vld [vmem:[#allocation46_spill] sm:$0xff]  ;;  %v5223_v28 = vld [vmem:[#allocation47_spill] sm:$0xff] }
 0x22f   :  { %1862 = vmatpush.bf16.msra.mxu0 %v5210_v3  ;;  %1875 = vmatpush.bf16.msra.mxu1 %v5211_v7  ;;  %v5224_v3 = vld [vmem:[#allocation48_spill] sm:$0xff]  ;;  %v5225_v7 = vld [vmem:[#allocation49_spill] sm:$0xff] }
 0x230   :  { %1888 = vmatpush.bf16.msra.mxu2 %v5213_v19  ;;  %1901 = vmatpush.bf16.msra.mxu3 %v5214_v11  ;;  %v4284_v19 = vpop.f32.mrf.mxu0  ;;  %v4286_v11 = vpop.f32.mrf.mxu1 }
 0x232   :  { %2778 = vmatmul.msk.bf16.vlgmr.msra.gmra.mxu0 %vm4258_vm3, %v4251_v38  ;;  %2781 = vmatmul.msk.bf16.vlgmr.msra.gmra.mxu1 %vm4258_vm3, %v4251_v38 }
 0x233   :  { %1907 = vmatpush.bf16.msrb.mxu0 %v5218_v55  ;;  %1920 = vmatpush.bf16.msrb.mxu1 %v5219_v5  ;;  %v5228_v55 = vld [vmem:[#allocation54_spill] sm:$0xff]  ;;  %v5229_v5 = vld [vmem:[#allocation55_spill] sm:$0xff] }
 0x234   :  { %1933 = vmatpush.bf16.msrb.mxu2 %v5220_v18  ;;  %1946 = vmatpush.bf16.msrb.mxu3 %v5221_v34  ;;  %v5230_v18 = vld [vmem:[#allocation57_spill] sm:$0xff] }
 0x235   :  { %2784 = vmatmul.msk.bf16.vlgmr.msra.gmra.mxu2 %vm4258_vm3, %v4251_v38  ;;  %2787 = vmatmul.msk.bf16.vlgmr.msra.gmra.mxu3 %vm4258_vm3, %v4251_v38 }
 0x237   :  { %1908 = vmatpush.bf16.msrb.mxu0 %v5222_v52  ;;  %1921 = vmatpush.bf16.msrb.mxu1 %v5223_v28  ;;  %v5231_v28 = vld [vmem:[#allocation61_spill] sm:$0xff] }
 0x238   :  { %1934 = vmatpush.bf16.msrb.mxu2 %v5224_v3  ;;  %1947 = vmatpush.bf16.msrb.mxu3 %v5225_v7  ;;  %v4294_v34 = vpop.f32.mrf.mxu2  ;;  %v4296_v52 = vpop.f32.mrf.mxu3  ;;  %v5232_v3 = vld [vmem:[#allocation62_spill] sm:$0xff]  ;;  %v5233_v7 = vld [vmem:[#allocation64_spill] sm:$0xff] }
 0x23b   :  { %1909 = vmatpush.bf16.msrb.mxu0 %v5226_v33  ;;  %1922 = vmatpush.bf16.msrb.mxu1 %v5100_v31  ;;  %v1658_v31 = vpop.f32.mrf.mxu0 }
 0x23c   :  { %1935 = vmatpush.bf16.msrb.mxu2 %v5103_v43  ;;  %1948 = vmatpush.bf16.msrb.mxu3 %v5227_v22  ;;  %v1671_v43 = vpop.f32.mrf.mxu1  ;;  %v5241_v31 = vld [vmem:[#allocation74_spill] sm:$0xff] }
 0x23d   :  { %v5242_v43 = vld [vmem:[#allocation75_spill] sm:$0xff] }
 0x23f   :  { %1910 = vmatpush.bf16.msrb.mxu0 %v5228_v55  ;;  %1923 = vmatpush.bf16.msrb.mxu1 %v5229_v5  ;;  %v5235_v55 = vld [vmem:[#allocation68_spill] sm:$0xff]  ;;  %v5238_v5 = vld [vmem:[#allocation71_spill] sm:$0xff] }
 0x240   :  { %1936 = vmatpush.bf16.msrb.mxu2 %v5111_v16  ;;  %1949 = vmatpush.bf16.msrb.mxu3 %v5230_v18  ;;  %v5234_v16 = vld [vmem:[#allocation65_spill] sm:$0xff]  ;;  %v1684_v33 = vpop.f32.mrf.mxu2  ;;  %v1697_v22 = vpop.f32.mrf.mxu3 }
 0x241   :  { %v5240_v18 = vld [vmem:[#allocation73_spill] sm:$0xff] }
 0x243   :  { %1911 = vmatpush.bf16.msrb.mxu0 %v5115_v0  ;;  %1924 = vmatpush.bf16.msrb.mxu1 %v5116_v45  ;;  %v5236_v0 = vld [vmem:[#allocation69_spill] sm:$0xff]  ;;  %v5237_v45 = vld [vmem:[#allocation70_spill] sm:$0xff] }
 0x244   :  { %1937 = vmatpush.bf16.msrb.mxu2 %v5117_v56  ;;  %1950 = vmatpush.bf16.msrb.mxu3 %v5231_v28  ;;  %v5239_v56 = vld [vmem:[#allocation72_spill] sm:$0xff] }
 0x245   :  { %v5243_v28 = vld [vmem:[#allocation76_spill] sm:$0xff] }
 0x247   :  { %1912 = vmatpush.bf16.msrb.mxu0 %v5232_v3  ;;  %1925 = vmatpush.bf16.msrb.mxu1 %v5233_v7  ;;  %v5245_v3 = vld [vmem:[#allocation78_spill] sm:$0xff]  ;;  %v5246_v7 = vld [vmem:[#allocation79_spill] sm:$0xff] }
 0x248   :  { %1938 = vmatpush.bf16.msrb.mxu2 %v5234_v16  ;;  %1951 = vmatpush.bf16.msrb.mxu3 %v5122_v46  ;;  %v5244_v46 = vld [vmem:[#allocation77_spill] sm:$0xff]  ;;  %v5247_v16 = vld [vmem:[#allocation80_spill] sm:$0xff] }
 0x24b   :  { %1913 = vmatpush.bf16.msrb.mxu0 %v5235_v55  ;;  %1926 = vmatpush.bf16.msrb.mxu1 %v5236_v0  ;;  %v5259_v55 = vld [vmem:[#allocation109_spill] sm:$0xff]  ;;  %v5260_v0 = vld [vmem:[#allocation110_spill] sm:$0xff] }
 0x24c   :  { %1939 = vmatpush.bf16.msrb.mxu2 %v5237_v45  ;;  %1952 = vmatpush.bf16.msrb.mxu3 %v5238_v5  ;;  %v5261_v45 = vld [vmem:[#allocation111_spill] sm:$0xff]  ;;  %v5262_v5 = vld [vmem:[#allocation112_spill] sm:$0xff] }
 0x24f   :  { %1914 = vmatpush.bf16.msrb.mxu0 %v5239_v56  ;;  %1927 = vmatpush.bf16.msrb.mxu1 %v5240_v18  ;;  %v4336_v33 = vpop.f32.mrf.mxu0  ;;  %v4338_v22 = vpop.f32.mrf.mxu1  ;;  %v5263_v56 = vld [vmem:[#allocation113_spill] sm:$0xff]  ;;  %v5264_v18 = vld [vmem:[#allocation114_spill] sm:$0xff] }
 0x250   :  { %1940 = vmatpush.bf16.msrb.mxu2 %v5241_v31  ;;  %1953 = vmatpush.bf16.msrb.mxu3 %v5242_v43 }
 0x252   :  { %2790 = vmatmul.msk.bf16.vlgmr.msrb.gmra.mxu0 %vm4258_vm3, %v4251_v38  ;;  %2793 = vmatmul.msk.bf16.vlgmr.msrb.gmra.mxu1 %vm4258_vm3, %v4251_v38 }
 0x253   :  { %1959 = vmatpush.bf16.msra.mxu0 %v5243_v28  ;;  %1972 = vmatpush.bf16.msra.mxu1 %v5244_v46 }
 0x254   :  { %1985 = vmatpush.bf16.msra.mxu2 %v5245_v3  ;;  %1998 = vmatpush.bf16.msra.mxu3 %v5246_v7 }
 0x255   :  { %2796 = vmatmul.msk.bf16.vlgmr.msrb.gmra.mxu2 %vm4258_vm3, %v4251_v38  ;;  %2799 = vmatmul.msk.bf16.vlgmr.msrb.gmra.mxu3 %vm4258_vm3, %v4251_v38 }
 0x257   :  { %1960 = vmatpush.bf16.msra.mxu0 %v5247_v16  ;;  %1973 = vmatpush.bf16.msra.mxu1 %v5136_v17  ;;  %v5253_v17 = vld [vmem:[#allocation103_spill] sm:$0xff] }
 0x258   :  { %1986 = vmatpush.bf16.msra.mxu2 %v5137_v44  ;;  %1999 = vmatpush.bf16.msra.mxu3 %v5138_v12  ;;  %v4346_v12 = vpop.f32.mrf.mxu2  ;;  %v5258_v44 = vld [vmem:[#allocation108_spill] sm:$0xff] }
 0x25b   :  { %1961 = vmatpush.bf16.msra.mxu0 %v5019_v58  ;;  %1974 = vmatpush.bf16.msra.mxu1 %v5020_v21  ;;  %v4348_v58 = vpop.f32.mrf.mxu3  ;;  %v1710_v21 = vpop.f32.mrf.mxu0 }
 0x25c   :  { %1987 = vmatpush.bf16.msra.mxu2 %v5021_v39  ;;  %2000 = vmatpush.bf16.msra.mxu3 %v4924_v37  ;;  %v1723_v39 = vpop.f32.mrf.mxu1  ;;  %v5248_v37 = vld [vmem:[#allocation98_spill] sm:$0xff] }
 0x25f   :  { %1962 = vmatpush.bf16.msra.mxu0 %v5022_v27  ;;  %1975 = vmatpush.bf16.msra.mxu1 %v4926_v32  ;;  %v5249_v32 = vld [vmem:[#allocation99_spill] sm:$0xff] }
 0x260   :  { %1988 = vmatpush.bf16.msra.mxu2 %v5023_v62  ;;  %2001 = vmatpush.bf16.msra.mxu3 %v5024_v6  ;;  %v1736_v27 = vpop.f32.mrf.mxu2  ;;  %v5250_v6 = vld [vmem:[#allocation100_spill] sm:$0xff] }
 0x263   :  { %1963 = vmatpush.bf16.msra.mxu0 %v5025_v25  ;;  %1976 = vmatpush.bf16.msra.mxu1 %v5026_v57  ;;  %v1749_v62 = vpop.f32.mrf.mxu3  ;;  %v5251_v25 = vld [vmem:[#allocation101_spill] sm:$0xff]  ;;  %v5252_v57 = vld [vmem:[#allocation102_spill] sm:$0xff] }
 0x264   :  { %1989 = vmatpush.bf16.msra.mxu2 %v5027_v9  ;;  %2002 = vmatpush.bf16.msra.mxu3 %v4932_v30  ;;  %v5254_v9 = vld [vmem:[#allocation104_spill] sm:$0xff]  ;;  %v5255_v30 = vld [vmem:[#allocation105_spill] sm:$0xff] }
 0x267   :  { %1964 = vmatpush.bf16.msra.mxu0 %v4935_v2  ;;  %1977 = vmatpush.bf16.msra.mxu1 %v4936_v36  ;;  %v5256_v2 = vld [vmem:[#allocation106_spill] sm:$0xff]  ;;  %v5257_v36 = vld [vmem:[#allocation107_spill] sm:$0xff] }
 0x268   :  { %1990 = vmatpush.bf16.msra.mxu2 %v5248_v37  ;;  %2003 = vmatpush.bf16.msra.mxu3 %v5249_v32  ;;  %v5270_v37 = vld [vmem:[#allocation94_spill] sm:$0xff] }
 0x26b   :  { %1965 = vmatpush.bf16.msra.mxu0 %v5250_v6  ;;  %1978 = vmatpush.bf16.msra.mxu1 %v5251_v25  ;;  %v5271_v6 = vld [vmem:[#allocation120_spill] sm:$0xff] }
 0x26c   :  { %1991 = vmatpush.bf16.msra.mxu2 %v5252_v57  ;;  %2004 = vmatpush.bf16.msra.mxu3 %v5253_v17 }
 0x26f   :  { %1966 = vmatpush.bf16.msra.mxu0 %v5254_v9  ;;  %1979 = vmatpush.bf16.msra.mxu1 %v5255_v30  ;;  %v4388_v31 = vpop.f32.mrf.mxu0  ;;  %v4390_v43 = vpop.f32.mrf.mxu1 }
 0x270   :  { %1992 = vmatpush.bf16.msra.mxu2 %v5256_v2  ;;  %2005 = vmatpush.bf16.msra.mxu3 %v5257_v36 }
 0x272   :  { %2802 = vmatmul.msk.bf16.vlgmr.msra.gmra.mxu0 %vm4258_vm3, %v4251_v38  ;;  %2805 = vmatmul.msk.bf16.vlgmr.msra.gmra.mxu1 %vm4258_vm3, %v4251_v38 }
 0x273   :  { %2011 = vmatpush.bf16.msrb.mxu0 %v5258_v44  ;;  %2024 = vmatpush.bf16.msrb.mxu1 %v5259_v55 }
 0x274   :  { %2037 = vmatpush.bf16.msrb.mxu2 %v5260_v0  ;;  %2050 = vmatpush.bf16.msrb.mxu3 %v5261_v45 }
 0x275   :  { %2808 = vmatmul.msk.bf16.vlgmr.msra.gmra.mxu2 %vm4258_vm3, %v4251_v38  ;;  %2811 = vmatmul.msk.bf16.vlgmr.msra.gmra.mxu3 %vm4258_vm3, %v4251_v38 }
 0x277   :  { %2012 = vmatpush.bf16.msrb.mxu0 %v5262_v5  ;;  %2025 = vmatpush.bf16.msrb.mxu1 %v5263_v56 }
 0x278   :  { %2038 = vmatpush.bf16.msrb.mxu2 %v5264_v18  ;;  %2051 = vmatpush.bf16.msrb.mxu3 %v5162_v50  ;;  %v4398_v50 = vpop.f32.mrf.mxu2 }
 0x27b   :  { %2013 = vmatpush.bf16.msrb.mxu0 %v5166_v61  ;;  %2026 = vmatpush.bf16.msrb.mxu1 %v5167_v14  ;;  %v4400_v61 = vpop.f32.mrf.mxu3  ;;  %v1762_v14 = vpop.f32.mrf.mxu0 }
 0x27c   :  { %2039 = vmatpush.bf16.msrb.mxu2 %v5170_v42  ;;  %2052 = vmatpush.bf16.msrb.mxu3 %v5171_v8  ;;  %v1775_v42 = vpop.f32.mrf.mxu1 }
 0x27f   :  { %2014 = vmatpush.bf16.msrb.mxu0 %v5050_v59  ;;  %2027 = vmatpush.bf16.msrb.mxu1 %v5051_v23  ;;  %v5268_v23 = vld [vmem:[#allocation92_spill] sm:$0xff] }
 0x280   :  { %2040 = vmatpush.bf16.msrb.mxu2 %v4960_v1  ;;  %2053 = vmatpush.bf16.msrb.mxu3 %v4961_v54  ;;  %v1788_v1 = vpop.f32.mrf.mxu2 }
 0x283   :  { %2015 = vmatpush.bf16.msrb.mxu0 %v4964_v20  ;;  %2028 = vmatpush.bf16.msrb.mxu1 %v4965_v24  ;;  %v1801_v54 = vpop.f32.mrf.mxu3  ;;  %v5267_v24 = vld [vmem:[#allocation132_spill] sm:$0xff] }
 0x284   :  { %2041 = vmatpush.bf16.msrb.mxu2 %v4966_v26  ;;  %2054 = vmatpush.bf16.msrb.mxu3 %v4967_v15  ;;  %v5265_v26 = vld [vmem:[#allocation130_spill] sm:$0xff] }
 0x287   :  { %2016 = vmatpush.bf16.msrb.mxu0 %v4968_v53  ;;  %2029 = vmatpush.bf16.msrb.mxu1 %v4969_v41  ;;  %v5266_v53 = vld [vmem:[#allocation131_spill] sm:$0xff] }
 0x288   :  { %2042 = vmatpush.bf16.msrb.mxu2 %v3517_v48  ;;  %2055 = vmatpush.bf16.msrb.mxu3 %v3519_v63  ;;  %v4434_v63 = vld [vmem:[#allocation7] ss:$2 sm:$0xff] }
 0x289   :  { %v2067_v46 = vperm.slane %v4434_v63, 2  ;;  %v2068_v7 = vperm.slane %v4434_v63, 3 }
 0x28b   :  { %2017 = vmatpush.bf16.msrb.mxu0 %v3523_v47  ;;  %2030 = vmatpush.bf16.msrb.mxu1 %v3525_v13  ;;  %v2065_v47 = vperm.slane %v4434_v63, 0  ;;  %v4437_v13 = vld [vmem:[#allocation7 + $0x1] ss:$2 sm:$0xff]  ;;  %v2099_v32 = vsub.f32 %v5270_v37, %v2067_v46  ;;  %v2100_v25 = vsub.f32 %v5271_v6, %v2068_v7 }
 0x28c   :  { %2043 = vmatpush.bf16.msrb.mxu2 %v3529_v10  ;;  %2056 = vmatpush.bf16.msrb.mxu3 %v3531_v49  ;;  %v2066_v10 = vperm.slane %v4434_v63, 1  ;;  %v2115_v8 = vperm.slane %v4437_v13, 0  ;;  %v2116_v28 = vperm.slane %v4437_v13, 1  ;;  %v2117_v27 = vperm.slane %v4437_v13, 2 }
 0x28d   :  { %v2097_v59 = vsub.f32 %v5268_v23, %v2065_v47  ;;  %v2118_v57 = vperm.slane %v4437_v13, 3  ;;  %v2121_v6 = vperm.slane %v4437_v13, 6 }
 0x28e   :  { %v2149_v9 = vmul.f32 %v2117_v27, %v2099_v32  ;;  %v5274_v27 = vld [vmem:[#allocation129_spill] sm:$0xff] }
 0x28f   :  { %2018 = vmatpush.bf16.msrb.mxu0 %v3535_v40  ;;  %2031 = vmatpush.bf16.msrb.mxu1 %v5265_v26  ;;  %v4430_v15 = vpop.f32.mrf.mxu0  ;;  %v4432_v48 = vpop.f32.mrf.mxu1  ;;  %v2147_v3 = vmul.f32 %v2115_v8, %v2097_v59  ;;  %v2150_v2 = vmul.f32 %v2118_v57, %v2100_v25  ;;  %v5272_v8 = vld [vmem:[#allocation121_spill] sm:$0xff] }
 0x290   :  { %2044 = vmatpush.bf16.msrb.mxu2 %v5266_v53  ;;  %2057 = vmatpush.bf16.msrb.mxu3 %v5267_v24  ;;  %v2165_v44 = vmul.f32 %v2149_v9, %v2099_v32  ;;  %v2069_v53 = vperm.slane %v4434_v63, 4  ;;  %v2070_v24 = vperm.slane %v4434_v63, 5  ;;  %v5275_v57 = vld [vmem:[#allocation133_spill] sm:$0xff]  ;;  %v2122_v9 = vperm.slane %v4437_v13, 7 }
 0x291   :  { %v2163_v62 = vmul.f32 %v2147_v3, %v2097_v59  ;;  %v2166_v55 = vmul.f32 %v2150_v2, %v2100_v25  ;;  %v2120_v3 = vperm.slane %v4437_v13, 5 }
 0x292   :  { %2814 = vmatmul.msk.bf16.vlgmr.msrb.gmra.mxu0 %vm4258_vm3, %v4251_v38  ;;  %2817 = vmatmul.msk.bf16.vlgmr.msrb.gmra.mxu1 %vm4258_vm3, %v4251_v38  ;;  %v2183_v0 = vmul.f32 1.442695, %v2165_v44 }
 0x293   :  { %2820 = vmatmul.msk.bf16.vlgmr.msrb.gmra.mxu2 %vm4258_vm3, %v4251_v38  ;;  %2823 = vmatmul.msk.bf16.vlgmr.msrb.gmra.mxu3 %vm4258_vm3, %v4251_v38  ;;  %v5269_v38 = vld [vmem:[#allocation93_spill] sm:$0xff]  ;;  %v2179_v30 = vmul.f32 1.442695, %v2163_v62  ;;  %v2185_v45 = vmul.f32 1.442695, %v2166_v55 }
 0x294   :  { %v2098_v29 = vsub.f32 %v5269_v38, %v2066_v10  ;;  %v2101_v38 = vsub.f32 %v5272_v8, %v2069_v53  ;;  %v5276_v8 = vld [vmem:[#allocation67_spill] sm:$0xff] }
 0x295   :  { %2967 = vpow2.f32 %v2179_v30 }
 0x296   :  { %v2148_v16 = vmul.f32 %v2116_v28, %v2098_v29  ;;  %v5273_v28 = vld [vmem:[#allocation63_spill] sm:$0xff] }
 0x297   :  { %v1814_v20 = vpop.f32.mrf.mxu0  ;;  %v1827_v41 = vpop.f32.mrf.mxu1  ;;  %v2102_v46 = vsub.f32 %v5273_v28, %v2070_v24  ;;  %v5277_v28 = vld [vmem:[#allocation51_spill] sm:$0xff] }
 0x298   :  { %v4440_v49 = vpop.f32.mrf.mxu2  ;;  %v4442_v40 = vpop.f32.mrf.mxu3  ;;  %v2164_v17 = vmul.f32 %v2148_v16, %v2098_v29  ;;  %v2119_v29 = vperm.slane %v4437_v13, 4  ;;  %v4472_v13 = vld [vmem:[#allocation7 + $0x10] ss:$2 sm:$0xff] }
 0x299   :  { %v2073_v24 = vperm.slane %v4472_v13, 0 }
 0x29a   :  { %v2181_v36 = vmul.f32 1.442695, %v2164_v17 }
 0x29b   :  { %v2968_v18 = vpop.eup %2967 }
 0x29c   :  { %2969 = vpow2.f32 %v2181_v36 }
 0x29d   :  { %2971 = vpow2.f32 %v2183_v0 }
 0x29e   :  { %2973 = vpow2.f32 %v2185_v45 }
 0x2a0   :  { %v1840_v21 = vpop.f32.mrf.mxu2  ;;  %v1853_v39 = vpop.f32.mrf.mxu3 }
 0x2a1   :  { %v2071_v21 = vperm.slane %v4434_v63, 6  ;;  %v2151_v39 = vmul.f32 %v2119_v29, %v2101_v38 }
 0x2a2   :  { %v2970_v1 = vpop.eup %2969 }
 0x2a3   :  { %v2972_v20 = vpop.eup %2971  ;;  %v2103_v62 = vsub.f32 %v5274_v27, %v2071_v21  ;;  %v2167_v25 = vmul.f32 %v2151_v39, %v2101_v38  ;;  %v2105_v38 = vsub.f32 %v5276_v8, %v2073_v24  ;;  %v2075_v21 = vperm.slane %v4472_v13, 2 }
 0x2a4   :  { %v2974_v59 = vpop.eup %2973 }
 0x2a5   :  { %v2153_v2 = vmul.f32 %v2121_v6, %v2103_v62  ;;  %v2187_v36 = vmul.f32 1.442695, %v2167_v25  ;;  %v5279_v6 = vld [vmem:[#allocation134_spill] sm:$0xff] }
 0x2a7   :  { %v2169_v0 = vmul.f32 %v2153_v2, %v2103_v62  ;;  %2975 = vpow2.f32 %v2187_v36 }
 0x2a9   :  { %v2191_v45 = vmul.f32 1.442695, %v2169_v0 }
 0x2af   :  { %v1864_v5 = vpop.f32.mrf.mxu0  ;;  %v1877_v56 = vpop.f32.mrf.mxu1 }
 0x2b0   :  { %v1865_v14 = vadd.f32 %v1864_v5, %v4284_v19  ;;  %v1878_v42 = vadd.f32 %v1877_v56, %v4286_v11 }
 0x2b2   :  { %v2211_v54 = vmul.f32 %v2968_v18, %v1865_v14  ;;  %v2212_v26 = vmul.f32 %v2970_v1, %v1878_v42  ;;  %v2976_v14 = vpop.eup %2975 }
 0x2b4   :  { %2227 = vst [vmem:[#allocation8] sm:$0xff] %v2211_v54 }
 0x2b5   :  { %2228 = vst [vmem:[#allocation8 + $0x8] sm:$0xff] %v2212_v26 }
 0x2b7   :  { %v1866_v23 = vpop.f32.mrf.mxu0  ;;  %v1879_v11 = vpop.f32.mrf.mxu1 }
 0x2b8   :  { %v1890_v47 = vpop.f32.mrf.mxu2  ;;  %v1903_v10 = vpop.f32.mrf.mxu3 }
 0x2b9   :  { %v1891_v41 = vadd.f32 %v1890_v47, %v4294_v34  ;;  %v1904_v19 = vadd.f32 %v1903_v10, %v4296_v52  ;;  %v2072_v34 = vperm.slane %v4434_v63, 7  ;;  %v2152_v52 = vmul.f32 %v2120_v3, %v2102_v46  ;;  %v4475_v47 = vld [vmem:[#allocation7 + $0x11] ss:$2 sm:$0xff] }
 0x2ba   :  { %v2074_v10 = vperm.slane %v4472_v13, 1  ;;  %v2123_v29 = vperm.slane %v4475_v47, 0  ;;  %v2124_v3 = vperm.slane %v4475_v47, 1  ;;  %v2125_v27 = vperm.slane %v4475_v47, 2 }
 0x2bb   :  { %v2213_v7 = vmul.f32 %v2972_v20, %v1891_v41  ;;  %v2214_v16 = vmul.f32 %v2974_v59, %v1904_v19  ;;  %v2104_v17 = vsub.f32 %v5275_v57, %v2072_v34  ;;  %v2168_v30 = vmul.f32 %v2152_v52, %v2102_v46 }
 0x2bc   :  { %v2106_v46 = vsub.f32 %v5277_v28, %v2074_v10  ;;  %v2155_v39 = vmul.f32 %v2123_v29, %v2105_v38  ;;  %v2126_v57 = vperm.slane %v4475_v47, 3  ;;  %v2079_v29 = vperm.slane %v4472_v13, 6 }
 0x2bd   :  { %2229 = vst [vmem:[#allocation8 + $0x10] sm:$0xff] %v2213_v7  ;;  %v2154_v44 = vmul.f32 %v2122_v9, %v2104_v17  ;;  %v2189_v55 = vmul.f32 1.442695, %v2168_v30 }
 0x2be   :  { %2230 = vst [vmem:[#allocation8 + $0x18] sm:$0xff] %v2214_v16  ;;  %v2171_v62 = vmul.f32 %v2155_v39, %v2105_v38 }
 0x2bf   :  { %v2170_v63 = vmul.f32 %v2154_v44, %v2104_v17  ;;  %2977 = vpow2.f32 %v2189_v55 }
 0x2c0   :  { %v1892_v37 = vpop.f32.mrf.mxu2  ;;  %v1905_v32 = vpop.f32.mrf.mxu3  ;;  %2979 = vpow2.f32 %v2191_v45  ;;  %v2195_v30 = vmul.f32 1.442695, %v2171_v62 }
 0x2c1   :  { %v2193_v5 = vmul.f32 1.442695, %v2170_v63  ;;  %v5278_v37 = vld [vmem:[#allocation52_spill] sm:$0xff] }
 0x2c2   :  { %v2107_v32 = vsub.f32 %v5278_v37, %v2075_v21  ;;  %v2130_v21 = vperm.slane %v4475_v47, 7 }
 0x2c3   :  { %2981 = vpow2.f32 %v2193_v5 }
 0x2c4   :  { %v2157_v9 = vmul.f32 %v2125_v27, %v2107_v32  ;;  %2983 = vpow2.f32 %v2195_v30 }
 0x2c5   :  { %v2978_v54 = vpop.eup %2977 }
 0x2c6   :  { %v2173_v44 = vmul.f32 %v2157_v9, %v2107_v32 }
 0x2c8   :  { %v2199_v0 = vmul.f32 1.442695, %v2173_v44 }
 0x2cf   :  { %v1916_v56 = vpop.f32.mrf.mxu0  ;;  %v1929_v18 = vpop.f32.mrf.mxu1 }
 0x2d0   :  { %v1917_v42 = vadd.f32 %v1916_v56, %v4336_v33  ;;  %v1930_v1 = vadd.f32 %v1929_v18, %v4338_v22  ;;  %v2980_v33 = vpop.eup %2979 }
 0x2d1   :  { %v2982_v59 = vpop.eup %2981 }
 0x2d2   :  { %v2215_v26 = vmul.f32 %v2976_v14, %v1917_v42  ;;  %v2216_v53 = vmul.f32 %v2978_v54, %v1930_v1  ;;  %v2984_v56 = vpop.eup %2983 }
 0x2d4   :  { %2231 = vst [vmem:[#allocation8 + $0x20] sm:$0xff] %v2215_v26  ;;  %v2077_v26 = vperm.slane %v4472_v13, 4 }
 0x2d5   :  { %2232 = vst [vmem:[#allocation8 + $0x28] sm:$0xff] %v2216_v53  ;;  %v2078_v53 = vperm.slane %v4472_v13, 5 }
 0x2d7   :  { %v1918_v23 = vpop.f32.mrf.mxu0  ;;  %v1931_v11 = vpop.f32.mrf.mxu1 }
 0x2d8   :  { %v1942_v20 = vpop.f32.mrf.mxu2  ;;  %v1955_v41 = vpop.f32.mrf.mxu3  ;;  %v2110_v11 = vsub.f32 %v4219_v35, %v2078_v53 }
 0x2d9   :  { %v1943_v22 = vadd.f32 %v1942_v20, %v4346_v12  ;;  %v1956_v19 = vadd.f32 %v1955_v41, %v4348_v58  ;;  %v2076_v12 = vperm.slane %v4472_v13, 3  ;;  %v2156_v58 = vmul.f32 %v2124_v3, %v2106_v46 }
 0x2da   :  { %v2109_v41 = vsub.f32 %v4217_v4, %v2077_v26  ;;  %v2080_v4 = vperm.slane %v4472_v13, 7 }
 0x2db   :  { %v2217_v7 = vmul.f32 %v2980_v33, %v1943_v22  ;;  %v2218_v16 = vmul.f32 %v2982_v59, %v1956_v19  ;;  %v2108_v25 = vsub.f32 %v5279_v6, %v2076_v12  ;;  %v2172_v17 = vmul.f32 %v2156_v58, %v2106_v46 }
 0x2dc   :  { %v2128_v59 = vperm.slane %v4475_v47, 5  ;;  %v2112_v35 = vsub.f32 %v4233_v60, %v2080_v4 }
 0x2dd   :  { %2233 = vst [vmem:[#allocation8 + $0x30] sm:$0xff] %v2217_v7  ;;  %v2158_v2 = vmul.f32 %v2126_v57, %v2108_v25  ;;  %v2197_v36 = vmul.f32 1.442695, %v2172_v17 }
 0x2de   :  { %2234 = vst [vmem:[#allocation8 + $0x38] sm:$0xff] %v2218_v16  ;;  %v2160_v46 = vmul.f32 %v2128_v59, %v2110_v11 }
 0x2df   :  { %v2174_v55 = vmul.f32 %v2158_v2, %v2108_v25  ;;  %2985 = vpow2.f32 %v2197_v36 }
 0x2e0   :  { %v1944_v34 = vpop.f32.mrf.mxu2  ;;  %v1957_v52 = vpop.f32.mrf.mxu3  ;;  %2987 = vpow2.f32 %v2199_v0  ;;  %v2176_v39 = vmul.f32 %v2160_v46, %v2110_v11 }
 0x2e1   :  { %v2201_v63 = vmul.f32 1.442695, %v2174_v55  ;;  %v2162_v34 = vmul.f32 %v2130_v21, %v2112_v35 }
 0x2e2   :  { %v2205_v52 = vmul.f32 1.442695, %v2176_v39 }
 0x2e3   :  { %2989 = vpow2.f32 %v2201_v63  ;;  %v2178_v37 = vmul.f32 %v2162_v34, %v2112_v35 }
 0x2e5   :  { %v2986_v42 = vpop.eup %2985 }
 0x2e6   :  { %v2988_v20 = vpop.eup %2987 }
 0x2e9   :  { %v2990_v23 = vpop.eup %2989 }
 0x2ef   :  { %v1968_v45 = vpop.f32.mrf.mxu0  ;;  %v1981_v5 = vpop.f32.mrf.mxu1 }
 0x2f0   :  { %v1969_v18 = vadd.f32 %v1968_v45, %v4388_v31  ;;  %v1982_v14 = vadd.f32 %v1981_v5, %v4390_v43  ;;  %v2127_v31 = vperm.slane %v4475_v47, 4 }
 0x2f2   :  { %v2219_v1 = vmul.f32 %v2984_v56, %v1969_v18  ;;  %v2220_v54 = vmul.f32 %v2986_v42, %v1982_v14  ;;  %v2159_v28 = vmul.f32 %v2127_v31, %v2109_v41 }
 0x2f4   :  { %2235 = vst [vmem:[#allocation8 + $0x40] sm:$0xff] %v2219_v1  ;;  %v2175_v16 = vmul.f32 %v2159_v28, %v2109_v41 }
 0x2f5   :  { %2236 = vst [vmem:[#allocation8 + $0x48] sm:$0xff] %v2220_v54 }
 0x2f6   :  { %v2203_v58 = vmul.f32 1.442695, %v2175_v16 }
 0x2f7   :  { %v1970_v22 = vpop.f32.mrf.mxu0  ;;  %v1983_v19 = vpop.f32.mrf.mxu1 }
 0x2f8   :  { %v1994_v24 = vpop.f32.mrf.mxu2  ;;  %v2007_v10 = vpop.f32.mrf.mxu3  ;;  %2991 = vpow2.f32 %v2203_v58 }
 0x2f9   :  { %v1995_v43 = vadd.f32 %v1994_v24, %v4398_v50  ;;  %v2008_v33 = vadd.f32 %v2007_v10, %v4400_v61  ;;  %v2111_v50 = vsub.f32 %v4231_v51, %v2079_v29  ;;  %v2129_v61 = vperm.slane %v4475_v47, 6 }
 0x2fa   :  { %2993 = vpow2.f32 %v2205_v52  ;;  %v2209_v51 = vmul.f32 1.442695, %v2178_v37 }
 0x2fb   :  { %v2221_v8 = vmul.f32 %v2988_v20, %v1995_v43  ;;  %v2222_v38 = vmul.f32 %v2990_v23, %v2008_v33  ;;  %v2161_v12 = vmul.f32 %v2129_v61, %v2111_v50 }
 0x2fd   :  { %2237 = vst [vmem:[#allocation8 + $0x50] sm:$0xff] %v2221_v8  ;;  %v2177_v13 = vmul.f32 %v2161_v12, %v2111_v50 }
 0x2fe   :  { %2238 = vst [vmem:[#allocation8 + $0x58] sm:$0xff] %v2222_v38  ;;  %v2992_v6 = vpop.eup %2991 }
 0x2ff   :  { %v2207_v32 = vmul.f32 1.442695, %v2177_v13 }
 0x300   :  { %v1996_v3 = vpop.f32.mrf.mxu2  ;;  %v2009_v7 = vpop.f32.mrf.mxu3 }
 0x301   :  { %v2994_v57 = vpop.eup %2993  ;;  %2995 = vpow2.f32 %v2207_v32 }
 0x302   :  { %2997 = vpow2.f32 %v2209_v51 }
 0x307   :  { %v2996_v2 = vpop.eup %2995 }
 0x30f   :  { %v2020_v27 = vpop.f32.mrf.mxu0  ;;  %v2033_v62 = vpop.f32.mrf.mxu1 }
 0x310   :  { %v2021_v25 = vadd.f32 %v2020_v27, %v4430_v15  ;;  %v2034_v60 = vadd.f32 %v2033_v62, %v4432_v48  ;;  %v2998_v15 = vpop.eup %2997 }
 0x312   :  { %v2223_v47 = vmul.f32 %v2992_v6, %v2021_v25  ;;  %v2224_v17 = vmul.f32 %v2994_v57, %v2034_v60 }
 0x314   :  { %2239 = vst [vmem:[#allocation8 + $0x60] sm:$0xff] %v2223_v47 }
 0x315   :  { %2240 = vst [vmem:[#allocation8 + $0x68] sm:$0xff] %v2224_v17 }
 0x316   :  { %v2046_v9 = vpop.f32.mrf.mxu2  ;;  %v2059_v30 = vpop.f32.mrf.mxu3 }
 0x317   :  { %v2047_v36 = vadd.f32 %v2046_v9, %v4440_v49  ;;  %v2060_v44 = vadd.f32 %v2059_v30, %v4442_v40  ;;  %v2022_v55 = vpop.f32.mrf.mxu0  ;;  %v2035_v0 = vpop.f32.mrf.mxu1 }
 0x319   :  { %v2225_v48 = vmul.f32 %v2996_v2, %v2047_v36  ;;  %v2226_v63 = vmul.f32 %v2998_v15, %v2060_v44 }
 0x31b   :  { %2241 = vst [vmem:[#allocation8 + $0x70] sm:$0xff] %v2225_v48 }
 0x31c   :  { %2242 = vst [vmem:[#allocation8 + $0x78] sm:$0xff] %v2226_v63 }
 0x31d   :  { %2253 = dma.vmem_to_hbm [thread:$0]  %s2249_s2, 2048, %s2251_s30, [#allocation4]  }
 0x31e   :  { %v2048_v45 = vpop.f32.mrf.mxu2  ;;  %v2061_v49 = vpop.f32.mrf.mxu3 }
 0x31f   :  { %3100 = dma.done.wait [#allocation4], 2048  }
 0x320   :  { %3101 = vsyncadd [#allocation4], 4294965248 }
 0x321   :  { %2258 = vsyncpa [#allocation3], 1 }
 0x322   :  { %2259 = vsyncpa [#allocation6], 1 }
 0x323   :  { %2260 = vsyncpa [#allocation4], 1 }

</bundles_post_ra>
